<compile_context>
chip_gen: v7x
topology: tpu7x:2x2x1
jax: 0.10.0
libtpu: 0.0.40
codegen_flags: <defaults>
</compile_context>

<pallas_src>
import functools

import numpy as np
import jax
import jax.numpy as jnp
from jax.experimental import pallas as pl
from jax.experimental.pallas import tpu as pltpu

LANE = 128  # lane (last-dim) padding; TODO(synk): 256-wide lane tiles on v6e/v7x


def _round_up(n, m):
    return ((n + m - 1) // m) * m


# -----------------------------------------------------------------------------
# Fused Pallas kernel: W_i projection -> depth-1 gather/matmul updates -> W_o
# -----------------------------------------------------------------------------
def fused_mpn_kernel(a2b_ref, b2a_ref, b2revb_ref,            # scalar prefetch (SMEM)
                     fb_ref, fa_ref, wi_ref, wh_ref,          # VMEM inputs
                     woa_ref, woh_ref, bo_ref,
                     out_ref,                                  # VMEM output
                     msg_ref, amsg_ref, agg_ref,               # VMEM f32 scratch
                     *, depth, n_atoms, n_bonds, max_deg, compute_dtype):
    cdt = compute_dtype

    # input = W_i(f_bonds)  (raw pre-activation; reused as residual each depth)
    inp = jnp.dot(fb_ref[...], wi_ref[...], preferred_element_type=jnp.float32)
    msg_ref[...] = jnp.maximum(inp, 0.0)      # message = ReLU(input), f32 resident
    agg_ref[...] = jnp.zeros_like(agg_ref)    # keep padded rows deterministic

    def gather_atom_sums():
        # a_message[a] = sum_k message[a2b[a, k]]   (index_select_ND(...).sum(1))
        amsg_ref[...] = jnp.zeros_like(amsg_ref)
        for a in range(n_atoms):               # static rows; loads use SMEM indices
            acc = jnp.zeros((1, LANE), jnp.float32)
            for k in range(max_deg):
                idx = a2b_ref[a * max_deg + k]                 # SMEM scalar read
                acc = acc + msg_ref[pl.ds(idx, 1), :]          # dynamic row gather
            amsg_ref[pl.ds(a, 1), :] = acc

    # depth-1 message-passing updates, statically unrolled (kept per review)
    for _ in range(depth - 1):
        gather_atom_sums()
        # agg[b] = a_message[b2a[b]] - message[b2revb[b]]
        for b in range(n_bonds):
            src = b2a_ref[b]
            rev = b2revb_ref[b]
            agg_ref[pl.ds(b, 1), :] = (amsg_ref[pl.ds(src, 1), :]
                                       - msg_ref[pl.ds(rev, 1), :])
        h = jnp.dot(agg_ref[...].astype(cdt), wh_ref[...],
                    preferred_element_type=jnp.float32)
        msg_ref[...] = jnp.maximum(inp + h, 0.0)   # ReLU(input + W_h(agg))

    # readout: atom_hiddens = ReLU(W_o([f_atoms, a_message]) + b_o)
    gather_atom_sums()
    h = (jnp.dot(fa_ref[...], woa_ref[...], preferred_element_type=jnp.float32)
         + jnp.dot(amsg_ref[...].astype(cdt), woh_ref[...],
                   preferred_element_type=jnp.float32)
         + bo_ref[...])
    out_ref[...] = jnp.maximum(h, 0.0)


# -----------------------------------------------------------------------------
# Host glue: padding + pallas_call orchestration
# -----------------------------------------------------------------------------
def _pad2(x, dtype, rows, cols=LANE):
    out = jnp.zeros((rows, cols), dtype)
    return out.at[: x.shape[0], : x.shape[1]].set(x.astype(dtype))


def mpn_forward(f_atoms, f_bonds, a2b, b2a, b2revb, degree, params, depth,
                compute_dtype=jnp.bfloat16):
    """Pallas MPN.forward (atom_messages=False, undirected=False, attention=False,
    bias=False on W_i/W_h, ReLU activation, dropout=0).
    Returns (atom_hiddens[NA, H], degree)."""
    W_i, W_h, W_o, b_o = params["W_i"], params["W_h"], params["W_o"], params["b_o"]
    NA, AF = f_atoms.shape
    NB, BF = f_bonds.shape
    H = W_i.shape[0]
    max_deg = a2b.shape[1]
    assert AF <= LANE and BF <= LANE and H <= LANE

    # Row padding: minimum sublane-tile multiples; only lanes must be 128-wide.
    NB_pad = _round_up(NB, 16)
    NA_pad = _round_up(NA, 16)

    cd = compute_dtype
    fb_p = _pad2(f_bonds, cd, NB_pad)            # (NB_pad, 128)
    fa_p = _pad2(f_atoms, cd, NA_pad)            # (NA_pad, 128)
    Wi_p = _pad2(W_i.T, cd, LANE)                # (bond_fdim, H) -> (128, 128)
    Wh_p = _pad2(W_h.T, cd, LANE)                # (H, H)        -> (128, 128)
    WoA_p = _pad2(W_o[:, :AF].T, cd, LANE)       # (AF, H)       -> (128, 128)
    WoH_p = _pad2(W_o[:, AF:].T, cd, LANE)       # (H, H)        -> (128, 128)
    bo_p = jnp.zeros((1, LANE), jnp.float32).at[0, :H].set(b_o.astype(jnp.float32))

    a2b_flat = a2b.reshape(-1).astype(jnp.int32)
    b2a_i = b2a.astype(jnp.int32)
    b2revb_i = b2revb.astype(jnp.int32)

    def full(shape):
        return pl.BlockSpec(shape, lambda i, *_: (0,) * len(shape))

    grid_spec = pltpu.PrefetchScalarGridSpec(
        num_scalar_prefetch=3,                   # a2b / b2a / b2revb -> SMEM
        grid=(1,),
        in_specs=[full(fb_p.shape), full(fa_p.shape), full(Wi_p.shape),
                  full(Wh_p.shape), full(WoA_p.shape), full(WoH_p.shape),
                  full(bo_p.shape)],
        out_specs=full((NA_pad, LANE)),
        scratch_shapes=[pltpu.VMEM((NB_pad, LANE), jnp.float32),   # message
                        pltpu.VMEM((NA_pad, LANE), jnp.float32),   # a_message
                        pltpu.VMEM((NB_pad, LANE), jnp.float32)],  # agg
    )

    # Advisory cost estimate (MXU matmuls dominate; gathers are O(rows) adds).
    flops = 2 * LANE * LANE * (NB_pad * depth + 2 * NA_pad)
    bytes_accessed = sum(int(np.prod(x.shape)) * x.dtype.itemsize
                         for x in (fb_p, fa_p, Wi_p, Wh_p, WoA_p, WoH_p, bo_p))
    bytes_accessed += NA_pad * LANE * 4

    kernel = functools.partial(
        fused_mpn_kernel, depth=depth, n_atoms=NA, n_bonds=NB,
        max_deg=max_deg, compute_dtype=cd)

    atom_hiddens_p = pl.pallas_call(
        kernel,
        out_shape=jax.ShapeDtypeStruct((NA_pad, LANE), jnp.float32),
        grid_spec=grid_spec,
        compiler_params=pltpu.CompilerParams(
            dimension_semantics=("arbitrary",),
            vmem_limit_bytes=32 * 1024 * 1024),
        cost_estimate=pl.CostEstimate(flops=flops, transcendentals=0,
                                      bytes_accessed=bytes_accessed),
    )(a2b_flat, b2a_i, b2revb_i, fb_p, fa_p, Wi_p, Wh_p, WoA_p, WoH_p, bo_p)

    atom_hiddens = atom_hiddens_p[:NA, :H]       # single contiguous slab -> slice once
    return atom_hiddens, degree


# -----------------------------------------------------------------------------
# Exact host-side reference (float64 NumPy), mirroring the PyTorch code path.
# -----------------------------------------------------------------------------
def reference_atom_hiddens_np(f_atoms, f_bonds, a2b, b2a, b2revb, params, depth):
    fa = np.asarray(f_atoms, np.float64)
    fb = np.asarray(f_bonds, np.float64)
    a2b = np.asarray(a2b)
    b2a = np.asarray(b2a)
    b2revb = np.asarray(b2revb)
    W_i = np.asarray(params["W_i"], np.float64)
    W_h = np.asarray(params["W_h"], np.float64)
    W_o = np.asarray(params["W_o"], np.float64)
    b_o = np.asarray(params["b_o"], np.float64)

    inp = fb @ W_i.T
    message = np.maximum(inp, 0.0)
    for _ in range(depth - 1):
        a_message = message[a2b].sum(axis=1)      # index_select_ND(...).sum(1)
        rev_message = message[b2revb]
        message = a_message[b2a] - rev_message
        message = np.maximum(inp + message @ W_h.T, 0.0)
    a_message = message[a2b].sum(axis=1)
    a_input = np.concatenate([fa, a_message], axis=1)
    return np.maximum(a_input @ W_o.T + b_o, 0.0)


# -----------------------------------------------------------------------------
# Main: deterministic synthetic graph + parameters
# -----------------------------------------------------------------------------
if __name__ == "__main__":
    ATOM_FDIM = 16
    BOND_FDIM = 24   # bond_fdim includes atom_fdim when atom_messages=False
    HIDDEN = 32
    DEPTH = 3

    # Two molecules, each a 4-atom ring. Index 0 of atoms/bonds is the padding row.
    NA = 9           # 1 pad + 8 atoms
    NB = 17          # 1 pad + 16 directed bonds

    a2b = jnp.array(
        [
            [0, 0, 0, 0],     # pad atom
            [2, 7, 0, 0],     # atom 1
            [1, 4, 0, 0],     # atom 2
            [3, 6, 0, 0],     # atom 3
            [5, 8, 0, 0],     # atom 4
            [10, 15, 0, 0],   # atom 5
            [9, 12, 0, 0],    # atom 6
            [11, 14, 0, 0],   # atom 7
            [13, 16, 0, 0],   # atom 8
        ],
        dtype=jnp.int32,
    )
    b2a = jnp.array(
        [0, 1, 2, 2, 3, 3, 4, 4, 1, 5, 6, 6, 7, 7, 8, 8, 5], dtype=jnp.int32
    )
    b2revb = jnp.array(
        [0, 2, 1, 4, 3, 6, 5, 8, 7, 10, 9, 12, 11, 14, 13, 16, 15], dtype=jnp.int32
    )
    a_scope = [(1, 4), (5, 4)]
    degree = jnp.array([0, 2, 2, 2, 2, 2, 2, 2, 2], dtype=jnp.int32)  # batch.degree

    key = jax.random.PRNGKey(0)
    k_fa, k_fb, k_wi, k_wh, k_wo, k_bo = jax.random.split(key, 6)

    f_atoms = jax.random.normal(k_fa, (NA, ATOM_FDIM), jnp.float32)
    f_atoms = f_atoms.at[0].set(0.0)  # padding atom is zero
    f_bonds = jax.random.normal(k_fb, (NB, BOND_FDIM), jnp.float32)
    f_bonds = f_bonds.at[0].set(0.0)  # padding bond is zero

    def _uni(k, shape, fan_in):
        b = 1.0 / np.sqrt(fan_in)
        return jax.random.uniform(k, shape, jnp.float32, -b, b)

    params = {
        "W_i": _uni(k_wi, (HIDDEN, BOND_FDIM), BOND_FDIM),          # bias=False
        "W_h": _uni(k_wh, (HIDDEN, HIDDEN), HIDDEN),                # bias=False
        "W_o": _uni(k_wo, (HIDDEN, ATOM_FDIM + HIDDEN), ATOM_FDIM + HIDDEN),
        "b_o": _uni(k_bo, (HIDDEN,), ATOM_FDIM + HIDDEN),
    }

    ref = reference_atom_hiddens_np(f_atoms, f_bonds, a2b, b2a, b2revb, params, DEPTH)

    # f32 MXU operands: tight check (gathers + residuals are exact, matmuls f32).
    atom_hiddens_f32, deg_out = mpn_forward(
        f_atoms, f_bonds, a2b, b2a, b2revb, degree, params, DEPTH,
        compute_dtype=jnp.float32,
    )
    got_f32 = np.asarray(jax.block_until_ready(atom_hiddens_f32))
    np.testing.assert_allclose(got_f32, ref, rtol=1e-3, atol=1e-3)

    # bf16 MXU operands (f32 accumulation, f32-resident message): loose check.
    atom_hiddens_bf16, _ = mpn_forward(
        f_atoms, f_bonds, a2b, b2a, b2revb, degree, params, DEPTH,
        compute_dtype=jnp.bfloat16,
    )
    got_bf16 = np.asarray(jax.block_until_ready(atom_hiddens_bf16))
    np.testing.assert_allclose(got_bf16, ref, rtol=5e-2, atol=5e-2)

    # Module return structure: [mol_vecs, degree], sliced from the one
    # contiguous output on the host (no per-slice device ops).
    mol_vecs = [got_f32[start:start + size] for (start, size) in a_scope]
    # TODO(synk): a_size == 0 branch would append cached_zero_vector; not hit here.
    out = [mol_vecs, deg_out]

    print("KERNEL_OK")
</pallas_src>

<mosaic_0001>
module attributes {stable_mosaic.version = 11 : i64} {
  func.func @fused_mpn_kernel(%arg0: i32, %arg1: memref<36xi32, #tpu.memory_space<smem>>, %arg2: memref<17xi32, #tpu.memory_space<smem>>, %arg3: memref<17xi32, #tpu.memory_space<smem>>, %arg4: memref<32x128xf32, #tpu.memory_space<vmem>>, %arg5: memref<16x128xf32, #tpu.memory_space<vmem>>, %arg6: memref<128x128xf32, #tpu.memory_space<vmem>>, %arg7: memref<128x128xf32, #tpu.memory_space<vmem>>, %arg8: memref<128x128xf32, #tpu.memory_space<vmem>>, %arg9: memref<128x128xf32, #tpu.memory_space<vmem>>, %arg10: memref<1x128xf32, #tpu.memory_space<vmem>>, %arg11: memref<16x128xf32, #tpu.memory_space<vmem>>, %arg12: memref<32x128xf32, #tpu.memory_space<vmem>>, %arg13: memref<16x128xf32, #tpu.memory_space<vmem>>, %arg14: memref<32x128xf32, #tpu.memory_space<vmem>>) attributes {dimension_semantics = [#tpu.dimension_semantics<arbitrary>], iteration_bounds = array<i64: 1>, scalar_prefetch = 3 : i64, scratch_operands = 3 : i64, tpu.core_type = #tpu.core_type<tc>, window_params = [{pipeline_mode = #tpu.pipeline_mode<synchronous>, transform_indices = @transform_0, window_bounds = array<i64: 32, 128>}, {pipeline_mode = #tpu.pipeline_mode<synchronous>, transform_indices = @transform_1, window_bounds = array<i64: 16, 128>}, {pipeline_mode = #tpu.pipeline_mode<synchronous>, transform_indices = @transform_2, window_bounds = array<i64: 128, 128>}, {pipeline_mode = #tpu.pipeline_mode<synchronous>, transform_indices = @transform_3, window_bounds = array<i64: 128, 128>}, {pipeline_mode = #tpu.pipeline_mode<synchronous>, transform_indices = @transform_4, window_bounds = array<i64: 128, 128>}, {pipeline_mode = #tpu.pipeline_mode<synchronous>, transform_indices = @transform_5, window_bounds = array<i64: 128, 128>}, {pipeline_mode = #tpu.pipeline_mode<synchronous>, transform_indices = @transform_6, window_bounds = array<i64: 1, 128>}, {pipeline_mode = #tpu.pipeline_mode<synchronous>, transform_indices = @transform_7, window_bounds = array<i64: 16, 128>}]} {
    %c0 = arith.constant 0 : index
    %c0_0 = arith.constant 0 : index
    %0 = vector.load %arg4[%c0, %c0_0] : memref<32x128xf32, #tpu.memory_space<vmem>>, vector<32x128xf32>
    %c0_1 = arith.constant 0 : index
    %c0_2 = arith.constant 0 : index
    %1 = vector.load %arg6[%c0_1, %c0_2] : memref<128x128xf32, #tpu.memory_space<vmem>>, vector<128x128xf32>
    %cst = arith.constant dense<0.000000e+00> : vector<32x128xf32>
    %2 = tpu.matmul %0, %1, %cst {dimension_numbers = #tpu.dot_dimension_numbers<[1], [0], [0], [1], [0, 0, 1, 1], [], []>} : vector<32x128xf32>, vector<128x128xf32>, vector<32x128xf32> -> vector<32x128xf32>
    %cst_3 = arith.constant 0.000000e+00 : f32
    %3 = vector.broadcast %cst_3 : f32 to vector<32x128xf32>
    %4 = arith.maximumf %2, %3 : vector<32x128xf32>
    %c0_4 = arith.constant 0 : index
    %c0_5 = arith.constant 0 : index
    %5 = vector.load %arg12[%c0_4, %c0_5] : memref<32x128xf32, #tpu.memory_space<vmem>>, vector<32x128xf32>
    tpu.vector_store %arg12[%c0_4, %c0_5], %4 {strides = array<i32>} : memref<32x128xf32, #tpu.memory_space<vmem>>, vector<32x128xf32>,
    %cst_6 = arith.constant 0.000000e+00 : f32
    %6 = vector.broadcast %cst_6 : f32 to vector<32x128xf32>
    %c0_7 = arith.constant 0 : index
    %c0_8 = arith.constant 0 : index
    %7 = vector.load %arg14[%c0_7, %c0_8] : memref<32x128xf32, #tpu.memory_space<vmem>>, vector<32x128xf32>
    tpu.vector_store %arg14[%c0_7, %c0_8], %6 {strides = array<i32>} : memref<32x128xf32, #tpu.memory_space<vmem>>, vector<32x128xf32>,
    %cst_9 = arith.constant 0.000000e+00 : f32
    %8 = vector.broadcast %cst_9 : f32 to vector<16x128xf32>
    %c0_10 = arith.constant 0 : index
    %c0_11 = arith.constant 0 : index
    %9 = vector.load %arg13[%c0_10, %c0_11] : memref<16x128xf32, #tpu.memory_space<vmem>>, vector<16x128xf32>
    tpu.vector_store %arg13[%c0_10, %c0_11], %8 {strides = array<i32>} : memref<16x128xf32, #tpu.memory_space<vmem>>, vector<16x128xf32>,
    %cst_12 = arith.constant 0.000000e+00 : f32
    %10 = vector.broadcast %cst_12 : f32 to vector<1x128xf32>
    %c0_13 = arith.constant 0 : index
    %11 = memref.load %arg1[%c0_13] : memref<36xi32, #tpu.memory_space<smem>>
    %12 = arith.index_cast %11 : i32 to index
    %c0_14 = arith.constant 0 : index
    %13 = vector.load %arg12[%12, %c0_14] : memref<32x128xf32, #tpu.memory_space<vmem>>, vector<1x128xf32>
    %14 = arith.addf %10, %13 : vector<1x128xf32>
    %c1 = arith.constant 1 : index
    %15 = memref.load %arg1[%c1] : memref<36xi32, #tpu.memory_space<smem>>
    %16 = arith.index_cast %15 : i32 to index
    %c0_15 = arith.constant 0 : index
    %17 = vector.load %arg12[%16, %c0_15] : memref<32x128xf32, #tpu.memory_space<vmem>>, vector<1x128xf32>
    %18 = arith.addf %14, %17 : vector<1x128xf32>
    %c2 = arith.constant 2 : index
    %19 = memref.load %arg1[%c2] : memref<36xi32, #tpu.memory_space<smem>>
    %20 = arith.index_cast %19 : i32 to index
    %c0_16 = arith.constant 0 : index
    %21 = vector.load %arg12[%20, %c0_16] : memref<32x128xf32, #tpu.memory_space<vmem>>, vector<1x128xf32>
    %22 = arith.addf %18, %21 : vector<1x128xf32>
    %c3 = arith.constant 3 : index
    %23 = memref.load %arg1[%c3] : memref<36xi32, #tpu.memory_space<smem>>
    %24 = arith.index_cast %23 : i32 to index
    %c0_17 = arith.constant 0 : index
    %25 = vector.load %arg12[%24, %c0_17] : memref<32x128xf32, #tpu.memory_space<vmem>>, vector<1x128xf32>
    %26 = arith.addf %22, %25 : vector<1x128xf32>
    %c0_18 = arith.constant 0 : index
    %c0_19 = arith.constant 0 : index
    %27 = vector.load %arg13[%c0_18, %c0_19] : memref<16x128xf32, #tpu.memory_space<vmem>>, vector<1x128xf32>
    tpu.vector_store %arg13[%c0_18, %c0_19], %26 {strides = array<i32>} : memref<16x128xf32, #tpu.memory_space<vmem>>, vector<1x128xf32>,
    %cst_20 = arith.constant 0.000000e+00 : f32
    %28 = vector.broadcast %cst_20 : f32 to vector<1x128xf32>
    %c4 = arith.constant 4 : index
    %29 = memref.load %arg1[%c4] : memref<36xi32, #tpu.memory_space<smem>>
    %30 = arith.index_cast %29 : i32 to index
    %c0_21 = arith.constant 0 : index
    %31 = vector.load %arg12[%30, %c0_21] : memref<32x128xf32, #tpu.memory_space<vmem>>, vector<1x128xf32>
    %32 = arith.addf %28, %31 : vector<1x128xf32>
    %c5 = arith.constant 5 : index
    %33 = memref.load %arg1[%c5] : memref<36xi32, #tpu.memory_space<smem>>
    %34 = arith.index_cast %33 : i32 to index
    %c0_22 = arith.constant 0 : index
    %35 = vector.load %arg12[%34, %c0_22] : memref<32x128xf32, #tpu.memory_space<vmem>>, vector<1x128xf32>
    %36 = arith.addf %32, %35 : vector<1x128xf32>
    %c6 = arith.constant 6 : index
    %37 = memref.load %arg1[%c6] : memref<36xi32, #tpu.memory_space<smem>>
    %38 = arith.index_cast %37 : i32 to index
    %c0_23 = arith.constant 0 : index
    %39 = vector.load %arg12[%38, %c0_23] : memref<32x128xf32, #tpu.memory_space<vmem>>, vector<1x128xf32>
    %40 = arith.addf %36, %39 : vector<1x128xf32>
    %c7 = arith.constant 7 : index
    %41 = memref.load %arg1[%c7] : memref<36xi32, #tpu.memory_space<smem>>
    %42 = arith.index_cast %41 : i32 to index
    %c0_24 = arith.constant 0 : index
    %43 = vector.load %arg12[%42, %c0_24] : memref<32x128xf32, #tpu.memory_space<vmem>>, vector<1x128xf32>
    %44 = arith.addf %40, %43 : vector<1x128xf32>
    %c1_25 = arith.constant 1 : index
    %c0_26 = arith.constant 0 : index
    %45 = vector.load %arg13[%c1_25, %c0_26] : memref<16x128xf32, #tpu.memory_space<vmem>>, vector<1x128xf32>
    tpu.vector_store %arg13[%c1_25, %c0_26], %44 {strides = array<i32>} : memref<16x128xf32, #tpu.memory_space<vmem>>, vector<1x128xf32>,
    %cst_27 = arith.constant 0.000000e+00 : f32
    %46 = vector.broadcast %cst_27 : f32 to vector<1x128xf32>
    %c8 = arith.constant 8 : index
    %47 = memref.load %arg1[%c8] : memref<36xi32, #tpu.memory_space<smem>>
    %48 = arith.index_cast %47 : i32 to index
    %c0_28 = arith.constant 0 : index
    %49 = vector.load %arg12[%48, %c0_28] : memref<32x128xf32, #tpu.memory_space<vmem>>, vector<1x128xf32>
    %50 = arith.addf %46, %49 : vector<1x128xf32>
    %c9 = arith.constant 9 : index
    %51 = memref.load %arg1[%c9] : memref<36xi32, #tpu.memory_space<smem>>
    %52 = arith.index_cast %51 : i32 to index
    %c0_29 = arith.constant 0 : index
    %53 = vector.load %arg12[%52, %c0_29] : memref<32x128xf32, #tpu.memory_space<vmem>>, vector<1x128xf32>
    %54 = arith.addf %50, %53 : vector<1x128xf32>
    %c10 = arith.constant 10 : index
    %55 = memref.load %arg1[%c10] : memref<36xi32, #tpu.memory_space<smem>>
    %56 = arith.index_cast %55 : i32 to index
    %c0_30 = arith.constant 0 : index
    %57 = vector.load %arg12[%56, %c0_30] : memref<32x128xf32, #tpu.memory_space<vmem>>, vector<1x128xf32>
    %58 = arith.addf %54, %57 : vector<1x128xf32>
    %c11 = arith.constant 11 : index
    %59 = memref.load %arg1[%c11] : memref<36xi32, #tpu.memory_space<smem>>
    %60 = arith.index_cast %59 : i32 to index
    %c0_31 = arith.constant 0 : index
    %61 = vector.load %arg12[%60, %c0_31] : memref<32x128xf32, #tpu.memory_space<vmem>>, vector<1x128xf32>
    %62 = arith.addf %58, %61 : vector<1x128xf32>
    %c2_32 = arith.constant 2 : index
    %c0_33 = arith.constant 0 : index
    %63 = vector.load %arg13[%c2_32, %c0_33] : memref<16x128xf32, #tpu.memory_space<vmem>>, vector<1x128xf32>
    tpu.vector_store %arg13[%c2_32, %c0_33], %62 {strides = array<i32>} : memref<16x128xf32, #tpu.memory_space<vmem>>, vector<1x128xf32>,
    %cst_34 = arith.constant 0.000000e+00 : f32
    %64 = vector.broadcast %cst_34 : f32 to vector<1x128xf32>
    %c12 = arith.constant 12 : index
    %65 = memref.load %arg1[%c12] : memref<36xi32, #tpu.memory_space<smem>>
    %66 = arith.index_cast %65 : i32 to index
    %c0_35 = arith.constant 0 : index
    %67 = vector.load %arg12[%66, %c0_35] : memref<32x128xf32, #tpu.memory_space<vmem>>, vector<1x128xf32>
    %68 = arith.addf %64, %67 : vector<1x128xf32>
    %c13 = arith.constant 13 : index
    %69 = memref.load %arg1[%c13] : memref<36xi32, #tpu.memory_space<smem>>
    %70 = arith.index_cast %69 : i32 to index
    %c0_36 = arith.constant 0 : index
    %71 = vector.load %arg12[%70, %c0_36] : memref<32x128xf32, #tpu.memory_space<vmem>>, vector<1x128xf32>
    %72 = arith.addf %68, %71 : vector<1x128xf32>
    %c14 = arith.constant 14 : index
    %73 = memref.load %arg1[%c14] : memref<36xi32, #tpu.memory_space<smem>>
    %74 = arith.index_cast %73 : i32 to index
    %c0_37 = arith.constant 0 : index
    %75 = vector.load %arg12[%74, %c0_37] : memref<32x128xf32, #tpu.memory_space<vmem>>, vector<1x128xf32>
    %76 = arith.addf %72, %75 : vector<1x128xf32>
    %c15 = arith.constant 15 : index
    %77 = memref.load %arg1[%c15] : memref<36xi32, #tpu.memory_space<smem>>
    %78 = arith.index_cast %77 : i32 to index
    %c0_38 = arith.constant 0 : index
    %79 = vector.load %arg12[%78, %c0_38] : memref<32x128xf32, #tpu.memory_space<vmem>>, vector<1x128xf32>
    %80 = arith.addf %76, %79 : vector<1x128xf32>
    %c3_39 = arith.constant 3 : index
    %c0_40 = arith.constant 0 : index
    %81 = vector.load %arg13[%c3_39, %c0_40] : memref<16x128xf32, #tpu.memory_space<vmem>>, vector<1x128xf32>
    tpu.vector_store %arg13[%c3_39, %c0_40], %80 {strides = array<i32>} : memref<16x128xf32, #tpu.memory_space<vmem>>, vector<1x128xf32>,
    %cst_41 = arith.constant 0.000000e+00 : f32
    %82 = vector.broadcast %cst_41 : f32 to vector<1x128xf32>
    %c16 = arith.constant 16 : index
    %83 = memref.load %arg1[%c16] : memref<36xi32, #tpu.memory_space<smem>>
    %84 = arith.index_cast %83 : i32 to index
    %c0_42 = arith.constant 0 : index
    %85 = vector.load %arg12[%84, %c0_42] : memref<32x128xf32, #tpu.memory_space<vmem>>, vector<1x128xf32>
    %86 = arith.addf %82, %85 : vector<1x128xf32>
    %c17 = arith.constant 17 : index
    %87 = memref.load %arg1[%c17] : memref<36xi32, #tpu.memory_space<smem>>
    %88 = arith.index_cast %87 : i32 to index
    %c0_43 = arith.constant 0 : index
    %89 = vector.load %arg12[%88, %c0_43] : memref<32x128xf32, #tpu.memory_space<vmem>>, vector<1x128xf32>
    %90 = arith.addf %86, %89 : vector<1x128xf32>
    %c18 = arith.constant 18 : index
    %91 = memref.load %arg1[%c18] : memref<36xi32, #tpu.memory_space<smem>>
    %92 = arith.index_cast %91 : i32 to index
    %c0_44 = arith.constant 0 : index
    %93 = vector.load %arg12[%92, %c0_44] : memref<32x128xf32, #tpu.memory_space<vmem>>, vector<1x128xf32>
    %94 = arith.addf %90, %93 : vector<1x128xf32>
    %c19 = arith.constant 19 : index
    %95 = memref.load %arg1[%c19] : memref<36xi32, #tpu.memory_space<smem>>
    %96 = arith.index_cast %95 : i32 to index
    %c0_45 = arith.constant 0 : index
    %97 = vector.load %arg12[%96, %c0_45] : memref<32x128xf32, #tpu.memory_space<vmem>>, vector<1x128xf32>
    %98 = arith.addf %94, %97 : vector<1x128xf32>
    %c4_46 = arith.constant 4 : index
    %c0_47 = arith.constant 0 : index
    %99 = vector.load %arg13[%c4_46, %c0_47] : memref<16x128xf32, #tpu.memory_space<vmem>>, vector<1x128xf32>
    tpu.vector_store %arg13[%c4_46, %c0_47], %98 {strides = array<i32>} : memref<16x128xf32, #tpu.memory_space<vmem>>, vector<1x128xf32>,
    %cst_48 = arith.constant 0.000000e+00 : f32
    %100 = vector.broadcast %cst_48 : f32 to vector<1x128xf32>
    %c20 = arith.constant 20 : index
    %101 = memref.load %arg1[%c20] : memref<36xi32, #tpu.memory_space<smem>>
    %102 = arith.index_cast %101 : i32 to index
    %c0_49 = arith.constant 0 : index
    %103 = vector.load %arg12[%102, %c0_49] : memref<32x128xf32, #tpu.memory_space<vmem>>, vector<1x128xf32>
    %104 = arith.addf %100, %103 : vector<1x128xf32>
    %c21 = arith.constant 21 : index
    %105 = memref.load %arg1[%c21] : memref<36xi32, #tpu.memory_space<smem>>
    %106 = arith.index_cast %105 : i32 to index
    %c0_50 = arith.constant 0 : index
    %107 = vector.load %arg12[%106, %c0_50] : memref<32x128xf32, #tpu.memory_space<vmem>>, vector<1x128xf32>
    %108 = arith.addf %104, %107 : vector<1x128xf32>
    %c22 = arith.constant 22 : index
    %109 = memref.load %arg1[%c22] : memref<36xi32, #tpu.memory_space<smem>>
    %110 = arith.index_cast %109 : i32 to index
    %c0_51 = arith.constant 0 : index
    %111 = vector.load %arg12[%110, %c0_51] : memref<32x128xf32, #tpu.memory_space<vmem>>, vector<1x128xf32>
    %112 = arith.addf %108, %111 : vector<1x128xf32>
    %c23 = arith.constant 23 : index
    %113 = memref.load %arg1[%c23] : memref<36xi32, #tpu.memory_space<smem>>
    %114 = arith.index_cast %113 : i32 to index
    %c0_52 = arith.constant 0 : index
    %115 = vector.load %arg12[%114, %c0_52] : memref<32x128xf32, #tpu.memory_space<vmem>>, vector<1x128xf32>
    %116 = arith.addf %112, %115 : vector<1x128xf32>
    %c5_53 = arith.constant 5 : index
    %c0_54 = arith.constant 0 : index
    %117 = vector.load %arg13[%c5_53, %c0_54] : memref<16x128xf32, #tpu.memory_space<vmem>>, vector<1x128xf32>
    tpu.vector_store %arg13[%c5_53, %c0_54], %116 {strides = array<i32>} : memref<16x128xf32, #tpu.memory_space<vmem>>, vector<1x128xf32>,
    %cst_55 = arith.constant 0.000000e+00 : f32
    %118 = vector.broadcast %cst_55 : f32 to vector<1x128xf32>
    %c24 = arith.constant 24 : index
    %119 = memref.load %arg1[%c24] : memref<36xi32, #tpu.memory_space<smem>>
    %120 = arith.index_cast %119 : i32 to index
    %c0_56 = arith.constant 0 : index
    %121 = vector.load %arg12[%120, %c0_56] : memref<32x128xf32, #tpu.memory_space<vmem>>, vector<1x128xf32>
    %122 = arith.addf %118, %121 : vector<1x128xf32>
    %c25 = arith.constant 25 : index
    %123 = memref.load %arg1[%c25] : memref<36xi32, #tpu.memory_space<smem>>
    %124 = arith.index_cast %123 : i32 to index
    %c0_57 = arith.constant 0 : index
    %125 = vector.load %arg12[%124, %c0_57] : memref<32x128xf32, #tpu.memory_space<vmem>>, vector<1x128xf32>
    %126 = arith.addf %122, %125 : vector<1x128xf32>
    %c26 = arith.constant 26 : index
    %127 = memref.load %arg1[%c26] : memref<36xi32, #tpu.memory_space<smem>>
    %128 = arith.index_cast %127 : i32 to index
    %c0_58 = arith.constant 0 : index
    %129 = vector.load %arg12[%128, %c0_58] : memref<32x128xf32, #tpu.memory_space<vmem>>, vector<1x128xf32>
    %130 = arith.addf %126, %129 : vector<1x128xf32>
    %c27 = arith.constant 27 : index
    %131 = memref.load %arg1[%c27] : memref<36xi32, #tpu.memory_space<smem>>
    %132 = arith.index_cast %131 : i32 to index
    %c0_59 = arith.constant 0 : index
    %133 = vector.load %arg12[%132, %c0_59] : memref<32x128xf32, #tpu.memory_space<vmem>>, vector<1x128xf32>
    %134 = arith.addf %130, %133 : vector<1x128xf32>
    %c6_60 = arith.constant 6 : index
    %c0_61 = arith.constant 0 : index
    %135 = vector.load %arg13[%c6_60, %c0_61] : memref<16x128xf32, #tpu.memory_space<vmem>>, vector<1x128xf32>
    tpu.vector_store %arg13[%c6_60, %c0_61], %134 {strides = array<i32>} : memref<16x128xf32, #tpu.memory_space<vmem>>, vector<1x128xf32>,
    %cst_62 = arith.constant 0.000000e+00 : f32
    %136 = vector.broadcast %cst_62 : f32 to vector<1x128xf32>
    %c28 = arith.constant 28 : index
    %137 = memref.load %arg1[%c28] : memref<36xi32, #tpu.memory_space<smem>>
    %138 = arith.index_cast %137 : i32 to index
    %c0_63 = arith.constant 0 : index
    %139 = vector.load %arg12[%138, %c0_63] : memref<32x128xf32, #tpu.memory_space<vmem>>, vector<1x128xf32>
    %140 = arith.addf %136, %139 : vector<1x128xf32>
    %c29 = arith.constant 29 : index
    %141 = memref.load %arg1[%c29] : memref<36xi32, #tpu.memory_space<smem>>
    %142 = arith.index_cast %141 : i32 to index
    %c0_64 = arith.constant 0 : index
    %143 = vector.load %arg12[%142, %c0_64] : memref<32x128xf32, #tpu.memory_space<vmem>>, vector<1x128xf32>
    %144 = arith.addf %140, %143 : vector<1x128xf32>
    %c30 = arith.constant 30 : index
    %145 = memref.load %arg1[%c30] : memref<36xi32, #tpu.memory_space<smem>>
    %146 = arith.index_cast %145 : i32 to index
    %c0_65 = arith.constant 0 : index
    %147 = vector.load %arg12[%146, %c0_65] : memref<32x128xf32, #tpu.memory_space<vmem>>, vector<1x128xf32>
    %148 = arith.addf %144, %147 : vector<1x128xf32>
    %c31 = arith.constant 31 : index
    %149 = memref.load %arg1[%c31] : memref<36xi32, #tpu.memory_space<smem>>
    %150 = arith.index_cast %149 : i32 to index
    %c0_66 = arith.constant 0 : index
    %151 = vector.load %arg12[%150, %c0_66] : memref<32x128xf32, #tpu.memory_space<vmem>>, vector<1x128xf32>
    %152 = arith.addf %148, %151 : vector<1x128xf32>
    %c7_67 = arith.constant 7 : index
    %c0_68 = arith.constant 0 : index
    %153 = vector.load %arg13[%c7_67, %c0_68] : memref<16x128xf32, #tpu.memory_space<vmem>>, vector<1x128xf32>
    tpu.vector_store %arg13[%c7_67, %c0_68], %152 {strides = array<i32>} : memref<16x128xf32, #tpu.memory_space<vmem>>, vector<1x128xf32>,
    %cst_69 = arith.constant 0.000000e+00 : f32
    %154 = vector.broadcast %cst_69 : f32 to vector<1x128xf32>
    %c32 = arith.constant 32 : index
    %155 = memref.load %arg1[%c32] : memref<36xi32, #tpu.memory_space<smem>>
    %156 = arith.index_cast %155 : i32 to index
    %c0_70 = arith.constant 0 : index
    %157 = vector.load %arg12[%156, %c0_70] : memref<32x128xf32, #tpu.memory_space<vmem>>, vector<1x128xf32>
    %158 = arith.addf %154, %157 : vector<1x128xf32>
    %c33 = arith.constant 33 : index
    %159 = memref.load %arg1[%c33] : memref<36xi32, #tpu.memory_space<smem>>
    %160 = arith.index_cast %159 : i32 to index
    %c0_71 = arith.constant 0 : index
    %161 = vector.load %arg12[%160, %c0_71] : memref<32x128xf32, #tpu.memory_space<vmem>>, vector<1x128xf32>
    %162 = arith.addf %158, %161 : vector<1x128xf32>
    %c34 = arith.constant 34 : index
    %163 = memref.load %arg1[%c34] : memref<36xi32, #tpu.memory_space<smem>>
    %164 = arith.index_cast %163 : i32 to index
    %c0_72 = arith.constant 0 : index
    %165 = vector.load %arg12[%164, %c0_72] : memref<32x128xf32, #tpu.memory_space<vmem>>, vector<1x128xf32>
    %166 = arith.addf %162, %165 : vector<1x128xf32>
    %c35 = arith.constant 35 : index
    %167 = memref.load %arg1[%c35] : memref<36xi32, #tpu.memory_space<smem>>
    %168 = arith.index_cast %167 : i32 to index
    %c0_73 = arith.constant 0 : index
    %169 = vector.load %arg12[%168, %c0_73] : memref<32x128xf32, #tpu.memory_space<vmem>>, vector<1x128xf32>
    %170 = arith.addf %166, %169 : vector<1x128xf32>
    %c8_74 = arith.constant 8 : index
    %c0_75 = arith.constant 0 : index
    %171 = vector.load %arg13[%c8_74, %c0_75] : memref<16x128xf32, #tpu.memory_space<vmem>>, vector<1x128xf32>
    tpu.vector_store %arg13[%c8_74, %c0_75], %170 {strides = array<i32>} : memref<16x128xf32, #tpu.memory_space<vmem>>, vector<1x128xf32>,
    %c0_76 = arith.constant 0 : index
    %172 = memref.load %arg2[%c0_76] : memref<17xi32, #tpu.memory_space<smem>>
    %c0_77 = arith.constant 0 : index
    %173 = memref.load %arg3[%c0_77] : memref<17xi32, #tpu.memory_space<smem>>
    %174 = arith.index_cast %172 : i32 to index
    %c0_78 = arith.constant 0 : index
    %175 = vector.load %arg13[%174, %c0_78] : memref<16x128xf32, #tpu.memory_space<vmem>>, vector<1x128xf32>
    %176 = arith.index_cast %173 : i32 to index
    %c0_79 = arith.constant 0 : index
    %177 = vector.load %arg12[%176, %c0_79] : memref<32x128xf32, #tpu.memory_space<vmem>>, vector<1x128xf32>
    %178 = arith.subf %175, %177 : vector<1x128xf32>
    %c0_80 = arith.constant 0 : index
    %c0_81 = arith.constant 0 : index
    %179 = vector.load %arg14[%c0_80, %c0_81] : memref<32x128xf32, #tpu.memory_space<vmem>>, vector<1x128xf32>
    tpu.vector_store %arg14[%c0_80, %c0_81], %178 {strides = array<i32>} : memref<32x128xf32, #tpu.memory_space<vmem>>, vector<1x128xf32>,
    %c1_82 = arith.constant 1 : index
    %180 = memref.load %arg2[%c1_82] : memref<17xi32, #tpu.memory_space<smem>>
    %c1_83 = arith.constant 1 : index
    %181 = memref.load %arg3[%c1_83] : memref<17xi32, #tpu.memory_space<smem>>
    %182 = arith.index_cast %180 : i32 to index
    %c0_84 = arith.constant 0 : index
    %183 = vector.load %arg13[%182, %c0_84] : memref<16x128xf32, #tpu.memory_space<vmem>>, vector<1x128xf32>
    %184 = arith.index_cast %181 : i32 to index
    %c0_85 = arith.constant 0 : index
    %185 = vector.load %arg12[%184, %c0_85] : memref<32x128xf32, #tpu.memory_space<vmem>>, vector<1x128xf32>
    %186 = arith.subf %183, %185 : vector<1x128xf32>
    %c1_86 = arith.constant 1 : index
    %c0_87 = arith.constant 0 : index
    %187 = vector.load %arg14[%c1_86, %c0_87] : memref<32x128xf32, #tpu.memory_space<vmem>>, vector<1x128xf32>
    tpu.vector_store %arg14[%c1_86, %c0_87], %186 {strides = array<i32>} : memref<32x128xf32, #tpu.memory_space<vmem>>, vector<1x128xf32>,
    %c2_88 = arith.constant 2 : index
    %188 = memref.load %arg2[%c2_88] : memref<17xi32, #tpu.memory_space<smem>>
    %c2_89 = arith.constant 2 : index
    %189 = memref.load %arg3[%c2_89] : memref<17xi32, #tpu.memory_space<smem>>
    %190 = arith.index_cast %188 : i32 to index
    %c0_90 = arith.constant 0 : index
    %191 = vector.load %arg13[%190, %c0_90] : memref<16x128xf32, #tpu.memory_space<vmem>>, vector<1x128xf32>
    %192 = arith.index_cast %189 : i32 to index
    %c0_91 = arith.constant 0 : index
    %193 = vector.load %arg12[%192, %c0_91] : memref<32x128xf32, #tpu.memory_space<vmem>>, vector<1x128xf32>
    %194 = arith.subf %191, %193 : vector<1x128xf32>
    %c2_92 = arith.constant 2 : index
    %c0_93 = arith.constant 0 : index
    %195 = vector.load %arg14[%c2_92, %c0_93] : memref<32x128xf32, #tpu.memory_space<vmem>>, vector<1x128xf32>
    tpu.vector_store %arg14[%c2_92, %c0_93], %194 {strides = array<i32>} : memref<32x128xf32, #tpu.memory_space<vmem>>, vector<1x128xf32>,
    %c3_94 = arith.constant 3 : index
    %196 = memref.load %arg2[%c3_94] : memref<17xi32, #tpu.memory_space<smem>>
    %c3_95 = arith.constant 3 : index
    %197 = memref.load %arg3[%c3_95] : memref<17xi32, #tpu.memory_space<smem>>
    %198 = arith.index_cast %196 : i32 to index
    %c0_96 = arith.constant 0 : index
    %199 = vector.load %arg13[%198, %c0_96] : memref<16x128xf32, #tpu.memory_space<vmem>>, vector<1x128xf32>
    %200 = arith.index_cast %197 : i32 to index
    %c0_97 = arith.constant 0 : index
    %201 = vector.load %arg12[%200, %c0_97] : memref<32x128xf32, #tpu.memory_space<vmem>>, vector<1x128xf32>
    %202 = arith.subf %199, %201 : vector<1x128xf32>
    %c3_98 = arith.constant 3 : index
    %c0_99 = arith.constant 0 : index
    %203 = vector.load %arg14[%c3_98, %c0_99] : memref<32x128xf32, #tpu.memory_space<vmem>>, vector<1x128xf32>
    tpu.vector_store %arg14[%c3_98, %c0_99], %202 {strides = array<i32>} : memref<32x128xf32, #tpu.memory_space<vmem>>, vector<1x128xf32>,
    %c4_100 = arith.constant 4 : index
    %204 = memref.load %arg2[%c4_100] : memref<17xi32, #tpu.memory_space<smem>>
    %c4_101 = arith.constant 4 : index
    %205 = memref.load %arg3[%c4_101] : memref<17xi32, #tpu.memory_space<smem>>
    %206 = arith.index_cast %204 : i32 to index
    %c0_102 = arith.constant 0 : index
    %207 = vector.load %arg13[%206, %c0_102] : memref<16x128xf32, #tpu.memory_space<vmem>>, vector<1x128xf32>
    %208 = arith.index_cast %205 : i32 to index
    %c0_103 = arith.constant 0 : index
    %209 = vector.load %arg12[%208, %c0_103] : memref<32x128xf32, #tpu.memory_space<vmem>>, vector<1x128xf32>
    %210 = arith.subf %207, %209 : vector<1x128xf32>
    %c4_104 = arith.constant 4 : index
    %c0_105 = arith.constant 0 : index
    %211 = vector.load %arg14[%c4_104, %c0_105] : memref<32x128xf32, #tpu.memory_space<vmem>>, vector<1x128xf32>
    tpu.vector_store %arg14[%c4_104, %c0_105], %210 {strides = array<i32>} : memref<32x128xf32, #tpu.memory_space<vmem>>, vector<1x128xf32>,
    %c5_106 = arith.constant 5 : index
    %212 = memref.load %arg2[%c5_106] : memref<17xi32, #tpu.memory_space<smem>>
    %c5_107 = arith.constant 5 : index
    %213 = memref.load %arg3[%c5_107] : memref<17xi32, #tpu.memory_space<smem>>
    %214 = arith.index_cast %212 : i32 to index
    %c0_108 = arith.constant 0 : index
    %215 = vector.load %arg13[%214, %c0_108] : memref<16x128xf32, #tpu.memory_space<vmem>>, vector<1x128xf32>
    %216 = arith.index_cast %213 : i32 to index
    %c0_109 = arith.constant 0 : index
    %217 = vector.load %arg12[%216, %c0_109] : memref<32x128xf32, #tpu.memory_space<vmem>>, vector<1x128xf32>
    %218 = arith.subf %215, %217 : vector<1x128xf32>
    %c5_110 = arith.constant 5 : index
    %c0_111 = arith.constant 0 : index
    %219 = vector.load %arg14[%c5_110, %c0_111] : memref<32x128xf32, #tpu.memory_space<vmem>>, vector<1x128xf32>
    tpu.vector_store %arg14[%c5_110, %c0_111], %218 {strides = array<i32>} : memref<32x128xf32, #tpu.memory_space<vmem>>, vector<1x128xf32>,
    %c6_112 = arith.constant 6 : index
    %220 = memref.load %arg2[%c6_112] : memref<17xi32, #tpu.memory_space<smem>>
    %c6_113 = arith.constant 6 : index
    %221 = memref.load %arg3[%c6_113] : memref<17xi32, #tpu.memory_space<smem>>
    %222 = arith.index_cast %220 : i32 to index
    %c0_114 = arith.constant 0 : index
    %223 = vector.load %arg13[%222, %c0_114] : memref<16x128xf32, #tpu.memory_space<vmem>>, vector<1x128xf32>
    %224 = arith.index_cast %221 : i32 to index
    %c0_115 = arith.constant 0 : index
    %225 = vector.load %arg12[%224, %c0_115] : memref<32x128xf32, #tpu.memory_space<vmem>>, vector<1x128xf32>
    %226 = arith.subf %223, %225 : vector<1x128xf32>
    %c6_116 = arith.constant 6 : index
    %c0_117 = arith.constant 0 : index
    %227 = vector.load %arg14[%c6_116, %c0_117] : memref<32x128xf32, #tpu.memory_space<vmem>>, vector<1x128xf32>
    tpu.vector_store %arg14[%c6_116, %c0_117], %226 {strides = array<i32>} : memref<32x128xf32, #tpu.memory_space<vmem>>, vector<1x128xf32>,
    %c7_118 = arith.constant 7 : index
    %228 = memref.load %arg2[%c7_118] : memref<17xi32, #tpu.memory_space<smem>>
    %c7_119 = arith.constant 7 : index
    %229 = memref.load %arg3[%c7_119] : memref<17xi32, #tpu.memory_space<smem>>
    %230 = arith.index_cast %228 : i32 to index
    %c0_120 = arith.constant 0 : index
    %231 = vector.load %arg13[%230, %c0_120] : memref<16x128xf32, #tpu.memory_space<vmem>>, vector<1x128xf32>
    %232 = arith.index_cast %229 : i32 to index
    %c0_121 = arith.constant 0 : index
    %233 = vector.load %arg12[%232, %c0_121] : memref<32x128xf32, #tpu.memory_space<vmem>>, vector<1x128xf32>
    %234 = arith.subf %231, %233 : vector<1x128xf32>
    %c7_122 = arith.constant 7 : index
    %c0_123 = arith.constant 0 : index
    %235 = vector.load %arg14[%c7_122, %c0_123] : memref<32x128xf32, #tpu.memory_space<vmem>>, vector<1x128xf32>
    tpu.vector_store %arg14[%c7_122, %c0_123], %234 {strides = array<i32>} : memref<32x128xf32, #tpu.memory_space<vmem>>, vector<1x128xf32>,
    %c8_124 = arith.constant 8 : index
    %236 = memref.load %arg2[%c8_124] : memref<17xi32, #tpu.memory_space<smem>>
    %c8_125 = arith.constant 8 : index
    %237 = memref.load %arg3[%c8_125] : memref<17xi32, #tpu.memory_space<smem>>
    %238 = arith.index_cast %236 : i32 to index
    %c0_126 = arith.constant 0 : index
    %239 = vector.load %arg13[%238, %c0_126] : memref<16x128xf32, #tpu.memory_space<vmem>>, vector<1x128xf32>
    %240 = arith.index_cast %237 : i32 to index
    %c0_127 = arith.constant 0 : index
    %241 = vector.load %arg12[%240, %c0_127] : memref<32x128xf32, #tpu.memory_space<vmem>>, vector<1x128xf32>
    %242 = arith.subf %239, %241 : vector<1x128xf32>
    %c8_128 = arith.constant 8 : index
    %c0_129 = arith.constant 0 : index
    %243 = vector.load %arg14[%c8_128, %c0_129] : memref<32x128xf32, #tpu.memory_space<vmem>>, vector<1x128xf32>
    tpu.vector_store %arg14[%c8_128, %c0_129], %242 {strides = array<i32>} : memref<32x128xf32, #tpu.memory_space<vmem>>, vector<1x128xf32>,
    %c9_130 = arith.constant 9 : index
    %244 = memref.load %arg2[%c9_130] : memref<17xi32, #tpu.memory_space<smem>>
    %c9_131 = arith.constant 9 : index
    %245 = memref.load %arg3[%c9_131] : memref<17xi32, #tpu.memory_space<smem>>
    %246 = arith.index_cast %244 : i32 to index
    %c0_132 = arith.constant 0 : index
    %247 = vector.load %arg13[%246, %c0_132] : memref<16x128xf32, #tpu.memory_space<vmem>>, vector<1x128xf32>
    %248 = arith.index_cast %245 : i32 to index
    %c0_133 = arith.constant 0 : index
    %249 = vector.load %arg12[%248, %c0_133] : memref<32x128xf32, #tpu.memory_space<vmem>>, vector<1x128xf32>
    %250 = arith.subf %247, %249 : vector<1x128xf32>
    %c9_134 = arith.constant 9 : index
    %c0_135 = arith.constant 0 : index
    %251 = vector.load %arg14[%c9_134, %c0_135] : memref<32x128xf32, #tpu.memory_space<vmem>>, vector<1x128xf32>
    tpu.vector_store %arg14[%c9_134, %c0_135], %250 {strides = array<i32>} : memref<32x128xf32, #tpu.memory_space<vmem>>, vector<1x128xf32>,
    %c10_136 = arith.constant 10 : index
    %252 = memref.load %arg2[%c10_136] : memref<17xi32, #tpu.memory_space<smem>>
    %c10_137 = arith.constant 10 : index
    %253 = memref.load %arg3[%c10_137] : memref<17xi32, #tpu.memory_space<smem>>
    %254 = arith.index_cast %252 : i32 to index
    %c0_138 = arith.constant 0 : index
    %255 = vector.load %arg13[%254, %c0_138] : memref<16x128xf32, #tpu.memory_space<vmem>>, vector<1x128xf32>
    %256 = arith.index_cast %253 : i32 to index
    %c0_139 = arith.constant 0 : index
    %257 = vector.load %arg12[%256, %c0_139] : memref<32x128xf32, #tpu.memory_space<vmem>>, vector<1x128xf32>
    %258 = arith.subf %255, %257 : vector<1x128xf32>
    %c10_140 = arith.constant 10 : index
    %c0_141 = arith.constant 0 : index
    %259 = vector.load %arg14[%c10_140, %c0_141] : memref<32x128xf32, #tpu.memory_space<vmem>>, vector<1x128xf32>
    tpu.vector_store %arg14[%c10_140, %c0_141], %258 {strides = array<i32>} : memref<32x128xf32, #tpu.memory_space<vmem>>, vector<1x128xf32>,
    %c11_142 = arith.constant 11 : index
    %260 = memref.load %arg2[%c11_142] : memref<17xi32, #tpu.memory_space<smem>>
    %c11_143 = arith.constant 11 : index
    %261 = memref.load %arg3[%c11_143] : memref<17xi32, #tpu.memory_space<smem>>
    %262 = arith.index_cast %260 : i32 to index
    %c0_144 = arith.constant 0 : index
    %263 = vector.load %arg13[%262, %c0_144] : memref<16x128xf32, #tpu.memory_space<vmem>>, vector<1x128xf32>
    %264 = arith.index_cast %261 : i32 to index
    %c0_145 = arith.constant 0 : index
    %265 = vector.load %arg12[%264, %c0_145] : memref<32x128xf32, #tpu.memory_space<vmem>>, vector<1x128xf32>
    %266 = arith.subf %263, %265 : vector<1x128xf32>
    %c11_146 = arith.constant 11 : index
    %c0_147 = arith.constant 0 : index
    %267 = vector.load %arg14[%c11_146, %c0_147] : memref<32x128xf32, #tpu.memory_space<vmem>>, vector<1x128xf32>
    tpu.vector_store %arg14[%c11_146, %c0_147], %266 {strides = array<i32>} : memref<32x128xf32, #tpu.memory_space<vmem>>, vector<1x128xf32>,
    %c12_148 = arith.constant 12 : index
    %268 = memref.load %arg2[%c12_148] : memref<17xi32, #tpu.memory_space<smem>>
    %c12_149 = arith.constant 12 : index
    %269 = memref.load %arg3[%c12_149] : memref<17xi32, #tpu.memory_space<smem>>
    %270 = arith.index_cast %268 : i32 to index
    %c0_150 = arith.constant 0 : index
    %271 = vector.load %arg13[%270, %c0_150] : memref<16x128xf32, #tpu.memory_space<vmem>>, vector<1x128xf32>
    %272 = arith.index_cast %269 : i32 to index
    %c0_151 = arith.constant 0 : index
    %273 = vector.load %arg12[%272, %c0_151] : memref<32x128xf32, #tpu.memory_space<vmem>>, vector<1x128xf32>
    %274 = arith.subf %271, %273 : vector<1x128xf32>
    %c12_152 = arith.constant 12 : index
    %c0_153 = arith.constant 0 : index
    %275 = vector.load %arg14[%c12_152, %c0_153] : memref<32x128xf32, #tpu.memory_space<vmem>>, vector<1x128xf32>
    tpu.vector_store %arg14[%c12_152, %c0_153], %274 {strides = array<i32>} : memref<32x128xf32, #tpu.memory_space<vmem>>, vector<1x128xf32>,
    %c13_154 = arith.constant 13 : index
    %276 = memref.load %arg2[%c13_154] : memref<17xi32, #tpu.memory_space<smem>>
    %c13_155 = arith.constant 13 : index
    %277 = memref.load %arg3[%c13_155] : memref<17xi32, #tpu.memory_space<smem>>
    %278 = arith.index_cast %276 : i32 to index
    %c0_156 = arith.constant 0 : index
    %279 = vector.load %arg13[%278, %c0_156] : memref<16x128xf32, #tpu.memory_space<vmem>>, vector<1x128xf32>
    %280 = arith.index_cast %277 : i32 to index
    %c0_157 = arith.constant 0 : index
    %281 = vector.load %arg12[%280, %c0_157] : memref<32x128xf32, #tpu.memory_space<vmem>>, vector<1x128xf32>
    %282 = arith.subf %279, %281 : vector<1x128xf32>
    %c13_158 = arith.constant 13 : index
    %c0_159 = arith.constant 0 : index
    %283 = vector.load %arg14[%c13_158, %c0_159] : memref<32x128xf32, #tpu.memory_space<vmem>>, vector<1x128xf32>
    tpu.vector_store %arg14[%c13_158, %c0_159], %282 {strides = array<i32>} : memref<32x128xf32, #tpu.memory_space<vmem>>, vector<1x128xf32>,
    %c14_160 = arith.constant 14 : index
    %284 = memref.load %arg2[%c14_160] : memref<17xi32, #tpu.memory_space<smem>>
    %c14_161 = arith.constant 14 : index
    %285 = memref.load %arg3[%c14_161] : memref<17xi32, #tpu.memory_space<smem>>
    %286 = arith.index_cast %284 : i32 to index
    %c0_162 = arith.constant 0 : index
    %287 = vector.load %arg13[%286, %c0_162] : memref<16x128xf32, #tpu.memory_space<vmem>>, vector<1x128xf32>
    %288 = arith.index_cast %285 : i32 to index
    %c0_163 = arith.constant 0 : index
    %289 = vector.load %arg12[%288, %c0_163] : memref<32x128xf32, #tpu.memory_space<vmem>>, vector<1x128xf32>
    %290 = arith.subf %287, %289 : vector<1x128xf32>
    %c14_164 = arith.constant 14 : index
    %c0_165 = arith.constant 0 : index
    %291 = vector.load %arg14[%c14_164, %c0_165] : memref<32x128xf32, #tpu.memory_space<vmem>>, vector<1x128xf32>
    tpu.vector_store %arg14[%c14_164, %c0_165], %290 {strides = array<i32>} : memref<32x128xf32, #tpu.memory_space<vmem>>, vector<1x128xf32>,
    %c15_166 = arith.constant 15 : index
    %292 = memref.load %arg2[%c15_166] : memref<17xi32, #tpu.memory_space<smem>>
    %c15_167 = arith.constant 15 : index
    %293 = memref.load %arg3[%c15_167] : memref<17xi32, #tpu.memory_space<smem>>
    %294 = arith.index_cast %292 : i32 to index
    %c0_168 = arith.constant 0 : index
    %295 = vector.load %arg13[%294, %c0_168] : memref<16x128xf32, #tpu.memory_space<vmem>>, vector<1x128xf32>
    %296 = arith.index_cast %293 : i32 to index
    %c0_169 = arith.constant 0 : index
    %297 = vector.load %arg12[%296, %c0_169] : memref<32x128xf32, #tpu.memory_space<vmem>>, vector<1x128xf32>
    %298 = arith.subf %295, %297 : vector<1x128xf32>
    %c15_170 = arith.constant 15 : index
    %c0_171 = arith.constant 0 : index
    %299 = vector.load %arg14[%c15_170, %c0_171] : memref<32x128xf32, #tpu.memory_space<vmem>>, vector<1x128xf32>
    tpu.vector_store %arg14[%c15_170, %c0_171], %298 {strides = array<i32>} : memref<32x128xf32, #tpu.memory_space<vmem>>, vector<1x128xf32>,
    %c16_172 = arith.constant 16 : index
    %300 = memref.load %arg2[%c16_172] : memref<17xi32, #tpu.memory_space<smem>>
    %c16_173 = arith.constant 16 : index
    %301 = memref.load %arg3[%c16_173] : memref<17xi32, #tpu.memory_space<smem>>
    %302 = arith.index_cast %300 : i32 to index
    %c0_174 = arith.constant 0 : index
    %303 = vector.load %arg13[%302, %c0_174] : memref<16x128xf32, #tpu.memory_space<vmem>>, vector<1x128xf32>
    %304 = arith.index_cast %301 : i32 to index
    %c0_175 = arith.constant 0 : index
    %305 = vector.load %arg12[%304, %c0_175] : memref<32x128xf32, #tpu.memory_space<vmem>>, vector<1x128xf32>
    %306 = arith.subf %303, %305 : vector<1x128xf32>
    %c16_176 = arith.constant 16 : index
    %c0_177 = arith.constant 0 : index
    %307 = vector.load %arg14[%c16_176, %c0_177] : memref<32x128xf32, #tpu.memory_space<vmem>>, vector<1x128xf32>
    tpu.vector_store %arg14[%c16_176, %c0_177], %306 {strides = array<i32>} : memref<32x128xf32, #tpu.memory_space<vmem>>, vector<1x128xf32>,
    %c0_178 = arith.constant 0 : index
    %c0_179 = arith.constant 0 : index
    %308 = vector.load %arg14[%c0_178, %c0_179] : memref<32x128xf32, #tpu.memory_space<vmem>>, vector<32x128xf32>
    %c0_180 = arith.constant 0 : index
    %c0_181 = arith.constant 0 : index
    %309 = vector.load %arg7[%c0_180, %c0_181] : memref<128x128xf32, #tpu.memory_space<vmem>>, vector<128x128xf32>
    %cst_182 = arith.constant dense<0.000000e+00> : vector<32x128xf32>
    %310 = tpu.matmul %308, %309, %cst_182 {dimension_numbers = #tpu.dot_dimension_numbers<[1], [0], [0], [1], [0, 0, 1, 1], [], []>} : vector<32x128xf32>, vector<128x128xf32>, vector<32x128xf32> -> vector<32x128xf32>
    %311 = arith.addf %2, %310 : vector<32x128xf32>
    %cst_183 = arith.constant 0.000000e+00 : f32
    %312 = vector.broadcast %cst_183 : f32 to vector<32x128xf32>
    %313 = arith.maximumf %311, %312 : vector<32x128xf32>
    %c0_184 = arith.constant 0 : index
    %c0_185 = arith.constant 0 : index
    %314 = vector.load %arg12[%c0_184, %c0_185] : memref<32x128xf32, #tpu.memory_space<vmem>>, vector<32x128xf32>
    tpu.vector_store %arg12[%c0_184, %c0_185], %313 {strides = array<i32>} : memref<32x128xf32, #tpu.memory_space<vmem>>, vector<32x128xf32>,
    %cst_186 = arith.constant 0.000000e+00 : f32
    %315 = vector.broadcast %cst_186 : f32 to vector<16x128xf32>
    %c0_187 = arith.constant 0 : index
    %c0_188 = arith.constant 0 : index
    %316 = vector.load %arg13[%c0_187, %c0_188] : memref<16x128xf32, #tpu.memory_space<vmem>>, vector<16x128xf32>
    tpu.vector_store %arg13[%c0_187, %c0_188], %315 {strides = array<i32>} : memref<16x128xf32, #tpu.memory_space<vmem>>, vector<16x128xf32>,
    %cst_189 = arith.constant 0.000000e+00 : f32
    %317 = vector.broadcast %cst_189 : f32 to vector<1x128xf32>
    %c0_190 = arith.constant 0 : index
    %318 = memref.load %arg1[%c0_190] : memref<36xi32, #tpu.memory_space<smem>>
    %319 = arith.index_cast %318 : i32 to index
    %c0_191 = arith.constant 0 : index
    %320 = vector.load %arg12[%319, %c0_191] : memref<32x128xf32, #tpu.memory_space<vmem>>, vector<1x128xf32>
    %321 = arith.addf %317, %320 : vector<1x128xf32>
    %c1_192 = arith.constant 1 : index
    %322 = memref.load %arg1[%c1_192] : memref<36xi32, #tpu.memory_space<smem>>
    %323 = arith.index_cast %322 : i32 to index
    %c0_193 = arith.constant 0 : index
    %324 = vector.load %arg12[%323, %c0_193] : memref<32x128xf32, #tpu.memory_space<vmem>>, vector<1x128xf32>
    %325 = arith.addf %321, %324 : vector<1x128xf32>
    %c2_194 = arith.constant 2 : index
    %326 = memref.load %arg1[%c2_194] : memref<36xi32, #tpu.memory_space<smem>>
    %327 = arith.index_cast %326 : i32 to index
    %c0_195 = arith.constant 0 : index
    %328 = vector.load %arg12[%327, %c0_195] : memref<32x128xf32, #tpu.memory_space<vmem>>, vector<1x128xf32>
    %329 = arith.addf %325, %328 : vector<1x128xf32>
    %c3_196 = arith.constant 3 : index
    %330 = memref.load %arg1[%c3_196] : memref<36xi32, #tpu.memory_space<smem>>
    %331 = arith.index_cast %330 : i32 to index
    %c0_197 = arith.constant 0 : index
    %332 = vector.load %arg12[%331, %c0_197] : memref<32x128xf32, #tpu.memory_space<vmem>>, vector<1x128xf32>
    %333 = arith.addf %329, %332 : vector<1x128xf32>
    %c0_198 = arith.constant 0 : index
    %c0_199 = arith.constant 0 : index
    %334 = vector.load %arg13[%c0_198, %c0_199] : memref<16x128xf32, #tpu.memory_space<vmem>>, vector<1x128xf32>
    tpu.vector_store %arg13[%c0_198, %c0_199], %333 {strides = array<i32>} : memref<16x128xf32, #tpu.memory_space<vmem>>, vector<1x128xf32>,
    %cst_200 = arith.constant 0.000000e+00 : f32
    %335 = vector.broadcast %cst_200 : f32 to vector<1x128xf32>
    %c4_201 = arith.constant 4 : index
    %336 = memref.load %arg1[%c4_201] : memref<36xi32, #tpu.memory_space<smem>>
    %337 = arith.index_cast %336 : i32 to index
    %c0_202 = arith.constant 0 : index
    %338 = vector.load %arg12[%337, %c0_202] : memref<32x128xf32, #tpu.memory_space<vmem>>, vector<1x128xf32>
    %339 = arith.addf %335, %338 : vector<1x128xf32>
    %c5_203 = arith.constant 5 : index
    %340 = memref.load %arg1[%c5_203] : memref<36xi32, #tpu.memory_space<smem>>
    %341 = arith.index_cast %340 : i32 to index
    %c0_204 = arith.constant 0 : index
    %342 = vector.load %arg12[%341, %c0_204] : memref<32x128xf32, #tpu.memory_space<vmem>>, vector<1x128xf32>
    %343 = arith.addf %339, %342 : vector<1x128xf32>
    %c6_205 = arith.constant 6 : index
    %344 = memref.load %arg1[%c6_205] : memref<36xi32, #tpu.memory_space<smem>>
    %345 = arith.index_cast %344 : i32 to index
    %c0_206 = arith.constant 0 : index
    %346 = vector.load %arg12[%345, %c0_206] : memref<32x128xf32, #tpu.memory_space<vmem>>, vector<1x128xf32>
    %347 = arith.addf %343, %346 : vector<1x128xf32>
    %c7_207 = arith.constant 7 : index
    %348 = memref.load %arg1[%c7_207] : memref<36xi32, #tpu.memory_space<smem>>
    %349 = arith.index_cast %348 : i32 to index
    %c0_208 = arith.constant 0 : index
    %350 = vector.load %arg12[%349, %c0_208] : memref<32x128xf32, #tpu.memory_space<vmem>>, vector<1x128xf32>
    %351 = arith.addf %347, %350 : vector<1x128xf32>
    %c1_209 = arith.constant 1 : index
    %c0_210 = arith.constant 0 : index
    %352 = vector.load %arg13[%c1_209, %c0_210] : memref<16x128xf32, #tpu.memory_space<vmem>>, vector<1x128xf32>
    tpu.vector_store %arg13[%c1_209, %c0_210], %351 {strides = array<i32>} : memref<16x128xf32, #tpu.memory_space<vmem>>, vector<1x128xf32>,
    %cst_211 = arith.constant 0.000000e+00 : f32
    %353 = vector.broadcast %cst_211 : f32 to vector<1x128xf32>
    %c8_212 = arith.constant 8 : index
    %354 = memref.load %arg1[%c8_212] : memref<36xi32, #tpu.memory_space<smem>>
    %355 = arith.index_cast %354 : i32 to index
    %c0_213 = arith.constant 0 : index
    %356 = vector.load %arg12[%355, %c0_213] : memref<32x128xf32, #tpu.memory_space<vmem>>, vector<1x128xf32>
    %357 = arith.addf %353, %356 : vector<1x128xf32>
    %c9_214 = arith.constant 9 : index
    %358 = memref.load %arg1[%c9_214] : memref<36xi32, #tpu.memory_space<smem>>
    %359 = arith.index_cast %358 : i32 to index
    %c0_215 = arith.constant 0 : index
    %360 = vector.load %arg12[%359, %c0_215] : memref<32x128xf32, #tpu.memory_space<vmem>>, vector<1x128xf32>
    %361 = arith.addf %357, %360 : vector<1x128xf32>
    %c10_216 = arith.constant 10 : index
    %362 = memref.load %arg1[%c10_216] : memref<36xi32, #tpu.memory_space<smem>>
    %363 = arith.index_cast %362 : i32 to index
    %c0_217 = arith.constant 0 : index
    %364 = vector.load %arg12[%363, %c0_217] : memref<32x128xf32, #tpu.memory_space<vmem>>, vector<1x128xf32>
    %365 = arith.addf %361, %364 : vector<1x128xf32>
    %c11_218 = arith.constant 11 : index
    %366 = memref.load %arg1[%c11_218] : memref<36xi32, #tpu.memory_space<smem>>
    %367 = arith.index_cast %366 : i32 to index
    %c0_219 = arith.constant 0 : index
    %368 = vector.load %arg12[%367, %c0_219] : memref<32x128xf32, #tpu.memory_space<vmem>>, vector<1x128xf32>
    %369 = arith.addf %365, %368 : vector<1x128xf32>
    %c2_220 = arith.constant 2 : index
    %c0_221 = arith.constant 0 : index
    %370 = vector.load %arg13[%c2_220, %c0_221] : memref<16x128xf32, #tpu.memory_space<vmem>>, vector<1x128xf32>
    tpu.vector_store %arg13[%c2_220, %c0_221], %369 {strides = array<i32>} : memref<16x128xf32, #tpu.memory_space<vmem>>, vector<1x128xf32>,
    %cst_222 = arith.constant 0.000000e+00 : f32
    %371 = vector.broadcast %cst_222 : f32 to vector<1x128xf32>
    %c12_223 = arith.constant 12 : index
    %372 = memref.load %arg1[%c12_223] : memref<36xi32, #tpu.memory_space<smem>>
    %373 = arith.index_cast %372 : i32 to index
    %c0_224 = arith.constant 0 : index
    %374 = vector.load %arg12[%373, %c0_224] : memref<32x128xf32, #tpu.memory_space<vmem>>, vector<1x128xf32>
    %375 = arith.addf %371, %374 : vector<1x128xf32>
    %c13_225 = arith.constant 13 : index
    %376 = memref.load %arg1[%c13_225] : memref<36xi32, #tpu.memory_space<smem>>
    %377 = arith.index_cast %376 : i32 to index
    %c0_226 = arith.constant 0 : index
    %378 = vector.load %arg12[%377, %c0_226] : memref<32x128xf32, #tpu.memory_space<vmem>>, vector<1x128xf32>
    %379 = arith.addf %375, %378 : vector<1x128xf32>
    %c14_227 = arith.constant 14 : index
    %380 = memref.load %arg1[%c14_227] : memref<36xi32, #tpu.memory_space<smem>>
    %381 = arith.index_cast %380 : i32 to index
    %c0_228 = arith.constant 0 : index
    %382 = vector.load %arg12[%381, %c0_228] : memref<32x128xf32, #tpu.memory_space<vmem>>, vector<1x128xf32>
    %383 = arith.addf %379, %382 : vector<1x128xf32>
    %c15_229 = arith.constant 15 : index
    %384 = memref.load %arg1[%c15_229] : memref<36xi32, #tpu.memory_space<smem>>
    %385 = arith.index_cast %384 : i32 to index
    %c0_230 = arith.constant 0 : index
    %386 = vector.load %arg12[%385, %c0_230] : memref<32x128xf32, #tpu.memory_space<vmem>>, vector<1x128xf32>
    %387 = arith.addf %383, %386 : vector<1x128xf32>
    %c3_231 = arith.constant 3 : index
    %c0_232 = arith.constant 0 : index
    %388 = vector.load %arg13[%c3_231, %c0_232] : memref<16x128xf32, #tpu.memory_space<vmem>>, vector<1x128xf32>
    tpu.vector_store %arg13[%c3_231, %c0_232], %387 {strides = array<i32>} : memref<16x128xf32, #tpu.memory_space<vmem>>, vector<1x128xf32>,
    %cst_233 = arith.constant 0.000000e+00 : f32
    %389 = vector.broadcast %cst_233 : f32 to vector<1x128xf32>
    %c16_234 = arith.constant 16 : index
    %390 = memref.load %arg1[%c16_234] : memref<36xi32, #tpu.memory_space<smem>>
    %391 = arith.index_cast %390 : i32 to index
    %c0_235 = arith.constant 0 : index
    %392 = vector.load %arg12[%391, %c0_235] : memref<32x128xf32, #tpu.memory_space<vmem>>, vector<1x128xf32>
    %393 = arith.addf %389, %392 : vector<1x128xf32>
    %c17_236 = arith.constant 17 : index
    %394 = memref.load %arg1[%c17_236] : memref<36xi32, #tpu.memory_space<smem>>
    %395 = arith.index_cast %394 : i32 to index
    %c0_237 = arith.constant 0 : index
    %396 = vector.load %arg12[%395, %c0_237] : memref<32x128xf32, #tpu.memory_space<vmem>>, vector<1x128xf32>
    %397 = arith.addf %393, %396 : vector<1x128xf32>
    %c18_238 = arith.constant 18 : index
    %398 = memref.load %arg1[%c18_238] : memref<36xi32, #tpu.memory_space<smem>>
    %399 = arith.index_cast %398 : i32 to index
    %c0_239 = arith.constant 0 : index
    %400 = vector.load %arg12[%399, %c0_239] : memref<32x128xf32, #tpu.memory_space<vmem>>, vector<1x128xf32>
    %401 = arith.addf %397, %400 : vector<1x128xf32>
    %c19_240 = arith.constant 19 : index
    %402 = memref.load %arg1[%c19_240] : memref<36xi32, #tpu.memory_space<smem>>
    %403 = arith.index_cast %402 : i32 to index
    %c0_241 = arith.constant 0 : index
    %404 = vector.load %arg12[%403, %c0_241] : memref<32x128xf32, #tpu.memory_space<vmem>>, vector<1x128xf32>
    %405 = arith.addf %401, %404 : vector<1x128xf32>
    %c4_242 = arith.constant 4 : index
    %c0_243 = arith.constant 0 : index
    %406 = vector.load %arg13[%c4_242, %c0_243] : memref<16x128xf32, #tpu.memory_space<vmem>>, vector<1x128xf32>
    tpu.vector_store %arg13[%c4_242, %c0_243], %405 {strides = array<i32>} : memref<16x128xf32, #tpu.memory_space<vmem>>, vector<1x128xf32>,
    %cst_244 = arith.constant 0.000000e+00 : f32
    %407 = vector.broadcast %cst_244 : f32 to vector<1x128xf32>
    %c20_245 = arith.constant 20 : index
    %408 = memref.load %arg1[%c20_245] : memref<36xi32, #tpu.memory_space<smem>>
    %409 = arith.index_cast %408 : i32 to index
    %c0_246 = arith.constant 0 : index
    %410 = vector.load %arg12[%409, %c0_246] : memref<32x128xf32, #tpu.memory_space<vmem>>, vector<1x128xf32>
    %411 = arith.addf %407, %410 : vector<1x128xf32>
    %c21_247 = arith.constant 21 : index
    %412 = memref.load %arg1[%c21_247] : memref<36xi32, #tpu.memory_space<smem>>
    %413 = arith.index_cast %412 : i32 to index
    %c0_248 = arith.constant 0 : index
    %414 = vector.load %arg12[%413, %c0_248] : memref<32x128xf32, #tpu.memory_space<vmem>>, vector<1x128xf32>
    %415 = arith.addf %411, %414 : vector<1x128xf32>
    %c22_249 = arith.constant 22 : index
    %416 = memref.load %arg1[%c22_249] : memref<36xi32, #tpu.memory_space<smem>>
    %417 = arith.index_cast %416 : i32 to index
    %c0_250 = arith.constant 0 : index
    %418 = vector.load %arg12[%417, %c0_250] : memref<32x128xf32, #tpu.memory_space<vmem>>, vector<1x128xf32>
    %419 = arith.addf %415, %418 : vector<1x128xf32>
    %c23_251 = arith.constant 23 : index
    %420 = memref.load %arg1[%c23_251] : memref<36xi32, #tpu.memory_space<smem>>
    %421 = arith.index_cast %420 : i32 to index
    %c0_252 = arith.constant 0 : index
    %422 = vector.load %arg12[%421, %c0_252] : memref<32x128xf32, #tpu.memory_space<vmem>>, vector<1x128xf32>
    %423 = arith.addf %419, %422 : vector<1x128xf32>
    %c5_253 = arith.constant 5 : index
    %c0_254 = arith.constant 0 : index
    %424 = vector.load %arg13[%c5_253, %c0_254] : memref<16x128xf32, #tpu.memory_space<vmem>>, vector<1x128xf32>
    tpu.vector_store %arg13[%c5_253, %c0_254], %423 {strides = array<i32>} : memref<16x128xf32, #tpu.memory_space<vmem>>, vector<1x128xf32>,
    %cst_255 = arith.constant 0.000000e+00 : f32
    %425 = vector.broadcast %cst_255 : f32 to vector<1x128xf32>
    %c24_256 = arith.constant 24 : index
    %426 = memref.load %arg1[%c24_256] : memref<36xi32, #tpu.memory_space<smem>>
    %427 = arith.index_cast %426 : i32 to index
    %c0_257 = arith.constant 0 : index
    %428 = vector.load %arg12[%427, %c0_257] : memref<32x128xf32, #tpu.memory_space<vmem>>, vector<1x128xf32>
    %429 = arith.addf %425, %428 : vector<1x128xf32>
    %c25_258 = arith.constant 25 : index
    %430 = memref.load %arg1[%c25_258] : memref<36xi32, #tpu.memory_space<smem>>
    %431 = arith.index_cast %430 : i32 to index
    %c0_259 = arith.constant 0 : index
    %432 = vector.load %arg12[%431, %c0_259] : memref<32x128xf32, #tpu.memory_space<vmem>>, vector<1x128xf32>
    %433 = arith.addf %429, %432 : vector<1x128xf32>
    %c26_260 = arith.constant 26 : index
    %434 = memref.load %arg1[%c26_260] : memref<36xi32, #tpu.memory_space<smem>>
    %435 = arith.index_cast %434 : i32 to index
    %c0_261 = arith.constant 0 : index
    %436 = vector.load %arg12[%435, %c0_261] : memref<32x128xf32, #tpu.memory_space<vmem>>, vector<1x128xf32>
    %437 = arith.addf %433, %436 : vector<1x128xf32>
    %c27_262 = arith.constant 27 : index
    %438 = memref.load %arg1[%c27_262] : memref<36xi32, #tpu.memory_space<smem>>
    %439 = arith.index_cast %438 : i32 to index
    %c0_263 = arith.constant 0 : index
    %440 = vector.load %arg12[%439, %c0_263] : memref<32x128xf32, #tpu.memory_space<vmem>>, vector<1x128xf32>
    %441 = arith.addf %437, %440 : vector<1x128xf32>
    %c6_264 = arith.constant 6 : index
    %c0_265 = arith.constant 0 : index
    %442 = vector.load %arg13[%c6_264, %c0_265] : memref<16x128xf32, #tpu.memory_space<vmem>>, vector<1x128xf32>
    tpu.vector_store %arg13[%c6_264, %c0_265], %441 {strides = array<i32>} : memref<16x128xf32, #tpu.memory_space<vmem>>, vector<1x128xf32>,
    %cst_266 = arith.constant 0.000000e+00 : f32
    %443 = vector.broadcast %cst_266 : f32 to vector<1x128xf32>
    %c28_267 = arith.constant 28 : index
    %444 = memref.load %arg1[%c28_267] : memref<36xi32, #tpu.memory_space<smem>>
    %445 = arith.index_cast %444 : i32 to index
    %c0_268 = arith.constant 0 : index
    %446 = vector.load %arg12[%445, %c0_268] : memref<32x128xf32, #tpu.memory_space<vmem>>, vector<1x128xf32>
    %447 = arith.addf %443, %446 : vector<1x128xf32>
    %c29_269 = arith.constant 29 : index
    %448 = memref.load %arg1[%c29_269] : memref<36xi32, #tpu.memory_space<smem>>
    %449 = arith.index_cast %448 : i32 to index
    %c0_270 = arith.constant 0 : index
    %450 = vector.load %arg12[%449, %c0_270] : memref<32x128xf32, #tpu.memory_space<vmem>>, vector<1x128xf32>
    %451 = arith.addf %447, %450 : vector<1x128xf32>
    %c30_271 = arith.constant 30 : index
    %452 = memref.load %arg1[%c30_271] : memref<36xi32, #tpu.memory_space<smem>>
    %453 = arith.index_cast %452 : i32 to index
    %c0_272 = arith.constant 0 : index
    %454 = vector.load %arg12[%453, %c0_272] : memref<32x128xf32, #tpu.memory_space<vmem>>, vector<1x128xf32>
    %455 = arith.addf %451, %454 : vector<1x128xf32>
    %c31_273 = arith.constant 31 : index
    %456 = memref.load %arg1[%c31_273] : memref<36xi32, #tpu.memory_space<smem>>
    %457 = arith.index_cast %456 : i32 to index
    %c0_274 = arith.constant 0 : index
    %458 = vector.load %arg12[%457, %c0_274] : memref<32x128xf32, #tpu.memory_space<vmem>>, vector<1x128xf32>
    %459 = arith.addf %455, %458 : vector<1x128xf32>
    %c7_275 = arith.constant 7 : index
    %c0_276 = arith.constant 0 : index
    %460 = vector.load %arg13[%c7_275, %c0_276] : memref<16x128xf32, #tpu.memory_space<vmem>>, vector<1x128xf32>
    tpu.vector_store %arg13[%c7_275, %c0_276], %459 {strides = array<i32>} : memref<16x128xf32, #tpu.memory_space<vmem>>, vector<1x128xf32>,
    %cst_277 = arith.constant 0.000000e+00 : f32
    %461 = vector.broadcast %cst_277 : f32 to vector<1x128xf32>
    %c32_278 = arith.constant 32 : index
    %462 = memref.load %arg1[%c32_278] : memref<36xi32, #tpu.memory_space<smem>>
    %463 = arith.index_cast %462 : i32 to index
    %c0_279 = arith.constant 0 : index
    %464 = vector.load %arg12[%463, %c0_279] : memref<32x128xf32, #tpu.memory_space<vmem>>, vector<1x128xf32>
    %465 = arith.addf %461, %464 : vector<1x128xf32>
    %c33_280 = arith.constant 33 : index
    %466 = memref.load %arg1[%c33_280] : memref<36xi32, #tpu.memory_space<smem>>
    %467 = arith.index_cast %466 : i32 to index
    %c0_281 = arith.constant 0 : index
    %468 = vector.load %arg12[%467, %c0_281] : memref<32x128xf32, #tpu.memory_space<vmem>>, vector<1x128xf32>
    %469 = arith.addf %465, %468 : vector<1x128xf32>
    %c34_282 = arith.constant 34 : index
    %470 = memref.load %arg1[%c34_282] : memref<36xi32, #tpu.memory_space<smem>>
    %471 = arith.index_cast %470 : i32 to index
    %c0_283 = arith.constant 0 : index
    %472 = vector.load %arg12[%471, %c0_283] : memref<32x128xf32, #tpu.memory_space<vmem>>, vector<1x128xf32>
    %473 = arith.addf %469, %472 : vector<1x128xf32>
    %c35_284 = arith.constant 35 : index
    %474 = memref.load %arg1[%c35_284] : memref<36xi32, #tpu.memory_space<smem>>
    %475 = arith.index_cast %474 : i32 to index
    %c0_285 = arith.constant 0 : index
    %476 = vector.load %arg12[%475, %c0_285] : memref<32x128xf32, #tpu.memory_space<vmem>>, vector<1x128xf32>
    %477 = arith.addf %473, %476 : vector<1x128xf32>
    %c8_286 = arith.constant 8 : index
    %c0_287 = arith.constant 0 : index
    %478 = vector.load %arg13[%c8_286, %c0_287] : memref<16x128xf32, #tpu.memory_space<vmem>>, vector<1x128xf32>
    tpu.vector_store %arg13[%c8_286, %c0_287], %477 {strides = array<i32>} : memref<16x128xf32, #tpu.memory_space<vmem>>, vector<1x128xf32>,
    %c0_288 = arith.constant 0 : index
    %479 = memref.load %arg2[%c0_288] : memref<17xi32, #tpu.memory_space<smem>>
    %c0_289 = arith.constant 0 : index
    %480 = memref.load %arg3[%c0_289] : memref<17xi32, #tpu.memory_space<smem>>
    %481 = arith.index_cast %479 : i32 to index
    %c0_290 = arith.constant 0 : index
    %482 = vector.load %arg13[%481, %c0_290] : memref<16x128xf32, #tpu.memory_space<vmem>>, vector<1x128xf32>
    %483 = arith.index_cast %480 : i32 to index
    %c0_291 = arith.constant 0 : index
    %484 = vector.load %arg12[%483, %c0_291] : memref<32x128xf32, #tpu.memory_space<vmem>>, vector<1x128xf32>
    %485 = arith.subf %482, %484 : vector<1x128xf32>
    %c0_292 = arith.constant 0 : index
    %c0_293 = arith.constant 0 : index
    %486 = vector.load %arg14[%c0_292, %c0_293] : memref<32x128xf32, #tpu.memory_space<vmem>>, vector<1x128xf32>
    tpu.vector_store %arg14[%c0_292, %c0_293], %485 {strides = array<i32>} : memref<32x128xf32, #tpu.memory_space<vmem>>, vector<1x128xf32>,
    %c1_294 = arith.constant 1 : index
    %487 = memref.load %arg2[%c1_294] : memref<17xi32, #tpu.memory_space<smem>>
    %c1_295 = arith.constant 1 : index
    %488 = memref.load %arg3[%c1_295] : memref<17xi32, #tpu.memory_space<smem>>
    %489 = arith.index_cast %487 : i32 to index
    %c0_296 = arith.constant 0 : index
    %490 = vector.load %arg13[%489, %c0_296] : memref<16x128xf32, #tpu.memory_space<vmem>>, vector<1x128xf32>
    %491 = arith.index_cast %488 : i32 to index
    %c0_297 = arith.constant 0 : index
    %492 = vector.load %arg12[%491, %c0_297] : memref<32x128xf32, #tpu.memory_space<vmem>>, vector<1x128xf32>
    %493 = arith.subf %490, %492 : vector<1x128xf32>
    %c1_298 = arith.constant 1 : index
    %c0_299 = arith.constant 0 : index
    %494 = vector.load %arg14[%c1_298, %c0_299] : memref<32x128xf32, #tpu.memory_space<vmem>>, vector<1x128xf32>
    tpu.vector_store %arg14[%c1_298, %c0_299], %493 {strides = array<i32>} : memref<32x128xf32, #tpu.memory_space<vmem>>, vector<1x128xf32>,
    %c2_300 = arith.constant 2 : index
    %495 = memref.load %arg2[%c2_300] : memref<17xi32, #tpu.memory_space<smem>>
    %c2_301 = arith.constant 2 : index
    %496 = memref.load %arg3[%c2_301] : memref<17xi32, #tpu.memory_space<smem>>
    %497 = arith.index_cast %495 : i32 to index
    %c0_302 = arith.constant 0 : index
    %498 = vector.load %arg13[%497, %c0_302] : memref<16x128xf32, #tpu.memory_space<vmem>>, vector<1x128xf32>
    %499 = arith.index_cast %496 : i32 to index
    %c0_303 = arith.constant 0 : index
    %500 = vector.load %arg12[%499, %c0_303] : memref<32x128xf32, #tpu.memory_space<vmem>>, vector<1x128xf32>
    %501 = arith.subf %498, %500 : vector<1x128xf32>
    %c2_304 = arith.constant 2 : index
    %c0_305 = arith.constant 0 : index
    %502 = vector.load %arg14[%c2_304, %c0_305] : memref<32x128xf32, #tpu.memory_space<vmem>>, vector<1x128xf32>
    tpu.vector_store %arg14[%c2_304, %c0_305], %501 {strides = array<i32>} : memref<32x128xf32, #tpu.memory_space<vmem>>, vector<1x128xf32>,
    %c3_306 = arith.constant 3 : index
    %503 = memref.load %arg2[%c3_306] : memref<17xi32, #tpu.memory_space<smem>>
    %c3_307 = arith.constant 3 : index
    %504 = memref.load %arg3[%c3_307] : memref<17xi32, #tpu.memory_space<smem>>
    %505 = arith.index_cast %503 : i32 to index
    %c0_308 = arith.constant 0 : index
    %506 = vector.load %arg13[%505, %c0_308] : memref<16x128xf32, #tpu.memory_space<vmem>>, vector<1x128xf32>
    %507 = arith.index_cast %504 : i32 to index
    %c0_309 = arith.constant 0 : index
    %508 = vector.load %arg12[%507, %c0_309] : memref<32x128xf32, #tpu.memory_space<vmem>>, vector<1x128xf32>
    %509 = arith.subf %506, %508 : vector<1x128xf32>
    %c3_310 = arith.constant 3 : index
    %c0_311 = arith.constant 0 : index
    %510 = vector.load %arg14[%c3_310, %c0_311] : memref<32x128xf32, #tpu.memory_space<vmem>>, vector<1x128xf32>
    tpu.vector_store %arg14[%c3_310, %c0_311], %509 {strides = array<i32>} : memref<32x128xf32, #tpu.memory_space<vmem>>, vector<1x128xf32>,
    %c4_312 = arith.constant 4 : index
    %511 = memref.load %arg2[%c4_312] : memref<17xi32, #tpu.memory_space<smem>>
    %c4_313 = arith.constant 4 : index
    %512 = memref.load %arg3[%c4_313] : memref<17xi32, #tpu.memory_space<smem>>
    %513 = arith.index_cast %511 : i32 to index
    %c0_314 = arith.constant 0 : index
    %514 = vector.load %arg13[%513, %c0_314] : memref<16x128xf32, #tpu.memory_space<vmem>>, vector<1x128xf32>
    %515 = arith.index_cast %512 : i32 to index
    %c0_315 = arith.constant 0 : index
    %516 = vector.load %arg12[%515, %c0_315] : memref<32x128xf32, #tpu.memory_space<vmem>>, vector<1x128xf32>
    %517 = arith.subf %514, %516 : vector<1x128xf32>
    %c4_316 = arith.constant 4 : index
    %c0_317 = arith.constant 0 : index
    %518 = vector.load %arg14[%c4_316, %c0_317] : memref<32x128xf32, #tpu.memory_space<vmem>>, vector<1x128xf32>
    tpu.vector_store %arg14[%c4_316, %c0_317], %517 {strides = array<i32>} : memref<32x128xf32, #tpu.memory_space<vmem>>, vector<1x128xf32>,
    %c5_318 = arith.constant 5 : index
    %519 = memref.load %arg2[%c5_318] : memref<17xi32, #tpu.memory_space<smem>>
    %c5_319 = arith.constant 5 : index
    %520 = memref.load %arg3[%c5_319] : memref<17xi32, #tpu.memory_space<smem>>
    %521 = arith.index_cast %519 : i32 to index
    %c0_320 = arith.constant 0 : index
    %522 = vector.load %arg13[%521, %c0_320] : memref<16x128xf32, #tpu.memory_space<vmem>>, vector<1x128xf32>
    %523 = arith.index_cast %520 : i32 to index
    %c0_321 = arith.constant 0 : index
    %524 = vector.load %arg12[%523, %c0_321] : memref<32x128xf32, #tpu.memory_space<vmem>>, vector<1x128xf32>
    %525 = arith.subf %522, %524 : vector<1x128xf32>
    %c5_322 = arith.constant 5 : index
    %c0_323 = arith.constant 0 : index
    %526 = vector.load %arg14[%c5_322, %c0_323] : memref<32x128xf32, #tpu.memory_space<vmem>>, vector<1x128xf32>
    tpu.vector_store %arg14[%c5_322, %c0_323], %525 {strides = array<i32>} : memref<32x128xf32, #tpu.memory_space<vmem>>, vector<1x128xf32>,
    %c6_324 = arith.constant 6 : index
    %527 = memref.load %arg2[%c6_324] : memref<17xi32, #tpu.memory_space<smem>>
    %c6_325 = arith.constant 6 : index
    %528 = memref.load %arg3[%c6_325] : memref<17xi32, #tpu.memory_space<smem>>
    %529 = arith.index_cast %527 : i32 to index
    %c0_326 = arith.constant 0 : index
    %530 = vector.load %arg13[%529, %c0_326] : memref<16x128xf32, #tpu.memory_space<vmem>>, vector<1x128xf32>
    %531 = arith.index_cast %528 : i32 to index
    %c0_327 = arith.constant 0 : index
    %532 = vector.load %arg12[%531, %c0_327] : memref<32x128xf32, #tpu.memory_space<vmem>>, vector<1x128xf32>
    %533 = arith.subf %530, %532 : vector<1x128xf32>
    %c6_328 = arith.constant 6 : index
    %c0_329 = arith.constant 0 : index
    %534 = vector.load %arg14[%c6_328, %c0_329] : memref<32x128xf32, #tpu.memory_space<vmem>>, vector<1x128xf32>
    tpu.vector_store %arg14[%c6_328, %c0_329], %533 {strides = array<i32>} : memref<32x128xf32, #tpu.memory_space<vmem>>, vector<1x128xf32>,
    %c7_330 = arith.constant 7 : index
    %535 = memref.load %arg2[%c7_330] : memref<17xi32, #tpu.memory_space<smem>>
    %c7_331 = arith.constant 7 : index
    %536 = memref.load %arg3[%c7_331] : memref<17xi32, #tpu.memory_space<smem>>
    %537 = arith.index_cast %535 : i32 to index
    %c0_332 = arith.constant 0 : index
    %538 = vector.load %arg13[%537, %c0_332] : memref<16x128xf32, #tpu.memory_space<vmem>>, vector<1x128xf32>
    %539 = arith.index_cast %536 : i32 to index
    %c0_333 = arith.constant 0 : index
    %540 = vector.load %arg12[%539, %c0_333] : memref<32x128xf32, #tpu.memory_space<vmem>>, vector<1x128xf32>
    %541 = arith.subf %538, %540 : vector<1x128xf32>
    %c7_334 = arith.constant 7 : index
    %c0_335 = arith.constant 0 : index
    %542 = vector.load %arg14[%c7_334, %c0_335] : memref<32x128xf32, #tpu.memory_space<vmem>>, vector<1x128xf32>
    tpu.vector_store %arg14[%c7_334, %c0_335], %541 {strides = array<i32>} : memref<32x128xf32, #tpu.memory_space<vmem>>, vector<1x128xf32>,
    %c8_336 = arith.constant 8 : index
    %543 = memref.load %arg2[%c8_336] : memref<17xi32, #tpu.memory_space<smem>>
    %c8_337 = arith.constant 8 : index
    %544 = memref.load %arg3[%c8_337] : memref<17xi32, #tpu.memory_space<smem>>
    %545 = arith.index_cast %543 : i32 to index
    %c0_338 = arith.constant 0 : index
    %546 = vector.load %arg13[%545, %c0_338] : memref<16x128xf32, #tpu.memory_space<vmem>>, vector<1x128xf32>
    %547 = arith.index_cast %544 : i32 to index
    %c0_339 = arith.constant 0 : index
    %548 = vector.load %arg12[%547, %c0_339] : memref<32x128xf32, #tpu.memory_space<vmem>>, vector<1x128xf32>
    %549 = arith.subf %546, %548 : vector<1x128xf32>
    %c8_340 = arith.constant 8 : index
    %c0_341 = arith.constant 0 : index
    %550 = vector.load %arg14[%c8_340, %c0_341] : memref<32x128xf32, #tpu.memory_space<vmem>>, vector<1x128xf32>
    tpu.vector_store %arg14[%c8_340, %c0_341], %549 {strides = array<i32>} : memref<32x128xf32, #tpu.memory_space<vmem>>, vector<1x128xf32>,
    %c9_342 = arith.constant 9 : index
    %551 = memref.load %arg2[%c9_342] : memref<17xi32, #tpu.memory_space<smem>>
    %c9_343 = arith.constant 9 : index
    %552 = memref.load %arg3[%c9_343] : memref<17xi32, #tpu.memory_space<smem>>
    %553 = arith.index_cast %551 : i32 to index
    %c0_344 = arith.constant 0 : index
    %554 = vector.load %arg13[%553, %c0_344] : memref<16x128xf32, #tpu.memory_space<vmem>>, vector<1x128xf32>
    %555 = arith.index_cast %552 : i32 to index
    %c0_345 = arith.constant 0 : index
    %556 = vector.load %arg12[%555, %c0_345] : memref<32x128xf32, #tpu.memory_space<vmem>>, vector<1x128xf32>
    %557 = arith.subf %554, %556 : vector<1x128xf32>
    %c9_346 = arith.constant 9 : index
    %c0_347 = arith.constant 0 : index
    %558 = vector.load %arg14[%c9_346, %c0_347] : memref<32x128xf32, #tpu.memory_space<vmem>>, vector<1x128xf32>
    tpu.vector_store %arg14[%c9_346, %c0_347], %557 {strides = array<i32>} : memref<32x128xf32, #tpu.memory_space<vmem>>, vector<1x128xf32>,
    %c10_348 = arith.constant 10 : index
    %559 = memref.load %arg2[%c10_348] : memref<17xi32, #tpu.memory_space<smem>>
    %c10_349 = arith.constant 10 : index
    %560 = memref.load %arg3[%c10_349] : memref<17xi32, #tpu.memory_space<smem>>
    %561 = arith.index_cast %559 : i32 to index
    %c0_350 = arith.constant 0 : index
    %562 = vector.load %arg13[%561, %c0_350] : memref<16x128xf32, #tpu.memory_space<vmem>>, vector<1x128xf32>
    %563 = arith.index_cast %560 : i32 to index
    %c0_351 = arith.constant 0 : index
    %564 = vector.load %arg12[%563, %c0_351] : memref<32x128xf32, #tpu.memory_space<vmem>>, vector<1x128xf32>
    %565 = arith.subf %562, %564 : vector<1x128xf32>
    %c10_352 = arith.constant 10 : index
    %c0_353 = arith.constant 0 : index
    %566 = vector.load %arg14[%c10_352, %c0_353] : memref<32x128xf32, #tpu.memory_space<vmem>>, vector<1x128xf32>
    tpu.vector_store %arg14[%c10_352, %c0_353], %565 {strides = array<i32>} : memref<32x128xf32, #tpu.memory_space<vmem>>, vector<1x128xf32>,
    %c11_354 = arith.constant 11 : index
    %567 = memref.load %arg2[%c11_354] : memref<17xi32, #tpu.memory_space<smem>>
    %c11_355 = arith.constant 11 : index
    %568 = memref.load %arg3[%c11_355] : memref<17xi32, #tpu.memory_space<smem>>
    %569 = arith.index_cast %567 : i32 to index
    %c0_356 = arith.constant 0 : index
    %570 = vector.load %arg13[%569, %c0_356] : memref<16x128xf32, #tpu.memory_space<vmem>>, vector<1x128xf32>
    %571 = arith.index_cast %568 : i32 to index
    %c0_357 = arith.constant 0 : index
    %572 = vector.load %arg12[%571, %c0_357] : memref<32x128xf32, #tpu.memory_space<vmem>>, vector<1x128xf32>
    %573 = arith.subf %570, %572 : vector<1x128xf32>
    %c11_358 = arith.constant 11 : index
    %c0_359 = arith.constant 0 : index
    %574 = vector.load %arg14[%c11_358, %c0_359] : memref<32x128xf32, #tpu.memory_space<vmem>>, vector<1x128xf32>
    tpu.vector_store %arg14[%c11_358, %c0_359], %573 {strides = array<i32>} : memref<32x128xf32, #tpu.memory_space<vmem>>, vector<1x128xf32>,
    %c12_360 = arith.constant 12 : index
    %575 = memref.load %arg2[%c12_360] : memref<17xi32, #tpu.memory_space<smem>>
    %c12_361 = arith.constant 12 : index
    %576 = memref.load %arg3[%c12_361] : memref<17xi32, #tpu.memory_space<smem>>
    %577 = arith.index_cast %575 : i32 to index
    %c0_362 = arith.constant 0 : index
    %578 = vector.load %arg13[%577, %c0_362] : memref<16x128xf32, #tpu.memory_space<vmem>>, vector<1x128xf32>
    %579 = arith.index_cast %576 : i32 to index
    %c0_363 = arith.constant 0 : index
    %580 = vector.load %arg12[%579, %c0_363] : memref<32x128xf32, #tpu.memory_space<vmem>>, vector<1x128xf32>
    %581 = arith.subf %578, %580 : vector<1x128xf32>
    %c12_364 = arith.constant 12 : index
    %c0_365 = arith.constant 0 : index
    %582 = vector.load %arg14[%c12_364, %c0_365] : memref<32x128xf32, #tpu.memory_space<vmem>>, vector<1x128xf32>
    tpu.vector_store %arg14[%c12_364, %c0_365], %581 {strides = array<i32>} : memref<32x128xf32, #tpu.memory_space<vmem>>, vector<1x128xf32>,
    %c13_366 = arith.constant 13 : index
    %583 = memref.load %arg2[%c13_366] : memref<17xi32, #tpu.memory_space<smem>>
    %c13_367 = arith.constant 13 : index
    %584 = memref.load %arg3[%c13_367] : memref<17xi32, #tpu.memory_space<smem>>
    %585 = arith.index_cast %583 : i32 to index
    %c0_368 = arith.constant 0 : index
    %586 = vector.load %arg13[%585, %c0_368] : memref<16x128xf32, #tpu.memory_space<vmem>>, vector<1x128xf32>
    %587 = arith.index_cast %584 : i32 to index
    %c0_369 = arith.constant 0 : index
    %588 = vector.load %arg12[%587, %c0_369] : memref<32x128xf32, #tpu.memory_space<vmem>>, vector<1x128xf32>
    %589 = arith.subf %586, %588 : vector<1x128xf32>
    %c13_370 = arith.constant 13 : index
    %c0_371 = arith.constant 0 : index
    %590 = vector.load %arg14[%c13_370, %c0_371] : memref<32x128xf32, #tpu.memory_space<vmem>>, vector<1x128xf32>
    tpu.vector_store %arg14[%c13_370, %c0_371], %589 {strides = array<i32>} : memref<32x128xf32, #tpu.memory_space<vmem>>, vector<1x128xf32>,
    %c14_372 = arith.constant 14 : index
    %591 = memref.load %arg2[%c14_372] : memref<17xi32, #tpu.memory_space<smem>>
    %c14_373 = arith.constant 14 : index
    %592 = memref.load %arg3[%c14_373] : memref<17xi32, #tpu.memory_space<smem>>
    %593 = arith.index_cast %591 : i32 to index
    %c0_374 = arith.constant 0 : index
    %594 = vector.load %arg13[%593, %c0_374] : memref<16x128xf32, #tpu.memory_space<vmem>>, vector<1x128xf32>
    %595 = arith.index_cast %592 : i32 to index
    %c0_375 = arith.constant 0 : index
    %596 = vector.load %arg12[%595, %c0_375] : memref<32x128xf32, #tpu.memory_space<vmem>>, vector<1x128xf32>
    %597 = arith.subf %594, %596 : vector<1x128xf32>
    %c14_376 = arith.constant 14 : index
    %c0_377 = arith.constant 0 : index
    %598 = vector.load %arg14[%c14_376, %c0_377] : memref<32x128xf32, #tpu.memory_space<vmem>>, vector<1x128xf32>
    tpu.vector_store %arg14[%c14_376, %c0_377], %597 {strides = array<i32>} : memref<32x128xf32, #tpu.memory_space<vmem>>, vector<1x128xf32>,
    %c15_378 = arith.constant 15 : index
    %599 = memref.load %arg2[%c15_378] : memref<17xi32, #tpu.memory_space<smem>>
    %c15_379 = arith.constant 15 : index
    %600 = memref.load %arg3[%c15_379] : memref<17xi32, #tpu.memory_space<smem>>
    %601 = arith.index_cast %599 : i32 to index
    %c0_380 = arith.constant 0 : index
    %602 = vector.load %arg13[%601, %c0_380] : memref<16x128xf32, #tpu.memory_space<vmem>>, vector<1x128xf32>
    %603 = arith.index_cast %600 : i32 to index
    %c0_381 = arith.constant 0 : index
    %604 = vector.load %arg12[%603, %c0_381] : memref<32x128xf32, #tpu.memory_space<vmem>>, vector<1x128xf32>
    %605 = arith.subf %602, %604 : vector<1x128xf32>
    %c15_382 = arith.constant 15 : index
    %c0_383 = arith.constant 0 : index
    %606 = vector.load %arg14[%c15_382, %c0_383] : memref<32x128xf32, #tpu.memory_space<vmem>>, vector<1x128xf32>
    tpu.vector_store %arg14[%c15_382, %c0_383], %605 {strides = array<i32>} : memref<32x128xf32, #tpu.memory_space<vmem>>, vector<1x128xf32>,
    %c16_384 = arith.constant 16 : index
    %607 = memref.load %arg2[%c16_384] : memref<17xi32, #tpu.memory_space<smem>>
    %c16_385 = arith.constant 16 : index
    %608 = memref.load %arg3[%c16_385] : memref<17xi32, #tpu.memory_space<smem>>
    %609 = arith.index_cast %607 : i32 to index
    %c0_386 = arith.constant 0 : index
    %610 = vector.load %arg13[%609, %c0_386] : memref<16x128xf32, #tpu.memory_space<vmem>>, vector<1x128xf32>
    %611 = arith.index_cast %608 : i32 to index
    %c0_387 = arith.constant 0 : index
    %612 = vector.load %arg12[%611, %c0_387] : memref<32x128xf32, #tpu.memory_space<vmem>>, vector<1x128xf32>
    %613 = arith.subf %610, %612 : vector<1x128xf32>
    %c16_388 = arith.constant 16 : index
    %c0_389 = arith.constant 0 : index
    %614 = vector.load %arg14[%c16_388, %c0_389] : memref<32x128xf32, #tpu.memory_space<vmem>>, vector<1x128xf32>
    tpu.vector_store %arg14[%c16_388, %c0_389], %613 {strides = array<i32>} : memref<32x128xf32, #tpu.memory_space<vmem>>, vector<1x128xf32>,
    %c0_390 = arith.constant 0 : index
    %c0_391 = arith.constant 0 : index
    %615 = vector.load %arg14[%c0_390, %c0_391] : memref<32x128xf32, #tpu.memory_space<vmem>>, vector<32x128xf32>
    %c0_392 = arith.constant 0 : index
    %c0_393 = arith.constant 0 : index
    %616 = vector.load %arg7[%c0_392, %c0_393] : memref<128x128xf32, #tpu.memory_space<vmem>>, vector<128x128xf32>
    %cst_394 = arith.constant dense<0.000000e+00> : vector<32x128xf32>
    %617 = tpu.matmul %615, %616, %cst_394 {dimension_numbers = #tpu.dot_dimension_numbers<[1], [0], [0], [1], [0, 0, 1, 1], [], []>} : vector<32x128xf32>, vector<128x128xf32>, vector<32x128xf32> -> vector<32x128xf32>
    %618 = arith.addf %2, %617 : vector<32x128xf32>
    %cst_395 = arith.constant 0.000000e+00 : f32
    %619 = vector.broadcast %cst_395 : f32 to vector<32x128xf32>
    %620 = arith.maximumf %618, %619 : vector<32x128xf32>
    %c0_396 = arith.constant 0 : index
    %c0_397 = arith.constant 0 : index
    %621 = vector.load %arg12[%c0_396, %c0_397] : memref<32x128xf32, #tpu.memory_space<vmem>>, vector<32x128xf32>
    tpu.vector_store %arg12[%c0_396, %c0_397], %620 {strides = array<i32>} : memref<32x128xf32, #tpu.memory_space<vmem>>, vector<32x128xf32>,
    %cst_398 = arith.constant 0.000000e+00 : f32
    %622 = vector.broadcast %cst_398 : f32 to vector<16x128xf32>
    %c0_399 = arith.constant 0 : index
    %c0_400 = arith.constant 0 : index
    %623 = vector.load %arg13[%c0_399, %c0_400] : memref<16x128xf32, #tpu.memory_space<vmem>>, vector<16x128xf32>
    tpu.vector_store %arg13[%c0_399, %c0_400], %622 {strides = array<i32>} : memref<16x128xf32, #tpu.memory_space<vmem>>, vector<16x128xf32>,
    %cst_401 = arith.constant 0.000000e+00 : f32
    %624 = vector.broadcast %cst_401 : f32 to vector<1x128xf32>
    %c0_402 = arith.constant 0 : index
    %625 = memref.load %arg1[%c0_402] : memref<36xi32, #tpu.memory_space<smem>>
    %626 = arith.index_cast %625 : i32 to index
    %c0_403 = arith.constant 0 : index
    %627 = vector.load %arg12[%626, %c0_403] : memref<32x128xf32, #tpu.memory_space<vmem>>, vector<1x128xf32>
    %628 = arith.addf %624, %627 : vector<1x128xf32>
    %c1_404 = arith.constant 1 : index
    %629 = memref.load %arg1[%c1_404] : memref<36xi32, #tpu.memory_space<smem>>
    %630 = arith.index_cast %629 : i32 to index
    %c0_405 = arith.constant 0 : index
    %631 = vector.load %arg12[%630, %c0_405] : memref<32x128xf32, #tpu.memory_space<vmem>>, vector<1x128xf32>
    %632 = arith.addf %628, %631 : vector<1x128xf32>
    %c2_406 = arith.constant 2 : index
    %633 = memref.load %arg1[%c2_406] : memref<36xi32, #tpu.memory_space<smem>>
    %634 = arith.index_cast %633 : i32 to index
    %c0_407 = arith.constant 0 : index
    %635 = vector.load %arg12[%634, %c0_407] : memref<32x128xf32, #tpu.memory_space<vmem>>, vector<1x128xf32>
    %636 = arith.addf %632, %635 : vector<1x128xf32>
    %c3_408 = arith.constant 3 : index
    %637 = memref.load %arg1[%c3_408] : memref<36xi32, #tpu.memory_space<smem>>
    %638 = arith.index_cast %637 : i32 to index
    %c0_409 = arith.constant 0 : index
    %639 = vector.load %arg12[%638, %c0_409] : memref<32x128xf32, #tpu.memory_space<vmem>>, vector<1x128xf32>
    %640 = arith.addf %636, %639 : vector<1x128xf32>
    %c0_410 = arith.constant 0 : index
    %c0_411 = arith.constant 0 : index
    %641 = vector.load %arg13[%c0_410, %c0_411] : memref<16x128xf32, #tpu.memory_space<vmem>>, vector<1x128xf32>
    tpu.vector_store %arg13[%c0_410, %c0_411], %640 {strides = array<i32>} : memref<16x128xf32, #tpu.memory_space<vmem>>, vector<1x128xf32>,
    %cst_412 = arith.constant 0.000000e+00 : f32
    %642 = vector.broadcast %cst_412 : f32 to vector<1x128xf32>
    %c4_413 = arith.constant 4 : index
    %643 = memref.load %arg1[%c4_413] : memref<36xi32, #tpu.memory_space<smem>>
    %644 = arith.index_cast %643 : i32 to index
    %c0_414 = arith.constant 0 : index
    %645 = vector.load %arg12[%644, %c0_414] : memref<32x128xf32, #tpu.memory_space<vmem>>, vector<1x128xf32>
    %646 = arith.addf %642, %645 : vector<1x128xf32>
    %c5_415 = arith.constant 5 : index
    %647 = memref.load %arg1[%c5_415] : memref<36xi32, #tpu.memory_space<smem>>
    %648 = arith.index_cast %647 : i32 to index
    %c0_416 = arith.constant 0 : index
    %649 = vector.load %arg12[%648, %c0_416] : memref<32x128xf32, #tpu.memory_space<vmem>>, vector<1x128xf32>
    %650 = arith.addf %646, %649 : vector<1x128xf32>
    %c6_417 = arith.constant 6 : index
    %651 = memref.load %arg1[%c6_417] : memref<36xi32, #tpu.memory_space<smem>>
    %652 = arith.index_cast %651 : i32 to index
    %c0_418 = arith.constant 0 : index
    %653 = vector.load %arg12[%652, %c0_418] : memref<32x128xf32, #tpu.memory_space<vmem>>, vector<1x128xf32>
    %654 = arith.addf %650, %653 : vector<1x128xf32>
    %c7_419 = arith.constant 7 : index
    %655 = memref.load %arg1[%c7_419] : memref<36xi32, #tpu.memory_space<smem>>
    %656 = arith.index_cast %655 : i32 to index
    %c0_420 = arith.constant 0 : index
    %657 = vector.load %arg12[%656, %c0_420] : memref<32x128xf32, #tpu.memory_space<vmem>>, vector<1x128xf32>
    %658 = arith.addf %654, %657 : vector<1x128xf32>
    %c1_421 = arith.constant 1 : index
    %c0_422 = arith.constant 0 : index
    %659 = vector.load %arg13[%c1_421, %c0_422] : memref<16x128xf32, #tpu.memory_space<vmem>>, vector<1x128xf32>
    tpu.vector_store %arg13[%c1_421, %c0_422], %658 {strides = array<i32>} : memref<16x128xf32, #tpu.memory_space<vmem>>, vector<1x128xf32>,
    %cst_423 = arith.constant 0.000000e+00 : f32
    %660 = vector.broadcast %cst_423 : f32 to vector<1x128xf32>
    %c8_424 = arith.constant 8 : index
    %661 = memref.load %arg1[%c8_424] : memref<36xi32, #tpu.memory_space<smem>>
    %662 = arith.index_cast %661 : i32 to index
    %c0_425 = arith.constant 0 : index
    %663 = vector.load %arg12[%662, %c0_425] : memref<32x128xf32, #tpu.memory_space<vmem>>, vector<1x128xf32>
    %664 = arith.addf %660, %663 : vector<1x128xf32>
    %c9_426 = arith.constant 9 : index
    %665 = memref.load %arg1[%c9_426] : memref<36xi32, #tpu.memory_space<smem>>
    %666 = arith.index_cast %665 : i32 to index
    %c0_427 = arith.constant 0 : index
    %667 = vector.load %arg12[%666, %c0_427] : memref<32x128xf32, #tpu.memory_space<vmem>>, vector<1x128xf32>
    %668 = arith.addf %664, %667 : vector<1x128xf32>
    %c10_428 = arith.constant 10 : index
    %669 = memref.load %arg1[%c10_428] : memref<36xi32, #tpu.memory_space<smem>>
    %670 = arith.index_cast %669 : i32 to index
    %c0_429 = arith.constant 0 : index
    %671 = vector.load %arg12[%670, %c0_429] : memref<32x128xf32, #tpu.memory_space<vmem>>, vector<1x128xf32>
    %672 = arith.addf %668, %671 : vector<1x128xf32>
    %c11_430 = arith.constant 11 : index
    %673 = memref.load %arg1[%c11_430] : memref<36xi32, #tpu.memory_space<smem>>
    %674 = arith.index_cast %673 : i32 to index
    %c0_431 = arith.constant 0 : index
    %675 = vector.load %arg12[%674, %c0_431] : memref<32x128xf32, #tpu.memory_space<vmem>>, vector<1x128xf32>
    %676 = arith.addf %672, %675 : vector<1x128xf32>
    %c2_432 = arith.constant 2 : index
    %c0_433 = arith.constant 0 : index
    %677 = vector.load %arg13[%c2_432, %c0_433] : memref<16x128xf32, #tpu.memory_space<vmem>>, vector<1x128xf32>
    tpu.vector_store %arg13[%c2_432, %c0_433], %676 {strides = array<i32>} : memref<16x128xf32, #tpu.memory_space<vmem>>, vector<1x128xf32>,
    %cst_434 = arith.constant 0.000000e+00 : f32
    %678 = vector.broadcast %cst_434 : f32 to vector<1x128xf32>
    %c12_435 = arith.constant 12 : index
    %679 = memref.load %arg1[%c12_435] : memref<36xi32, #tpu.memory_space<smem>>
    %680 = arith.index_cast %679 : i32 to index
    %c0_436 = arith.constant 0 : index
    %681 = vector.load %arg12[%680, %c0_436] : memref<32x128xf32, #tpu.memory_space<vmem>>, vector<1x128xf32>
    %682 = arith.addf %678, %681 : vector<1x128xf32>
    %c13_437 = arith.constant 13 : index
    %683 = memref.load %arg1[%c13_437] : memref<36xi32, #tpu.memory_space<smem>>
    %684 = arith.index_cast %683 : i32 to index
    %c0_438 = arith.constant 0 : index
    %685 = vector.load %arg12[%684, %c0_438] : memref<32x128xf32, #tpu.memory_space<vmem>>, vector<1x128xf32>
    %686 = arith.addf %682, %685 : vector<1x128xf32>
    %c14_439 = arith.constant 14 : index
    %687 = memref.load %arg1[%c14_439] : memref<36xi32, #tpu.memory_space<smem>>
    %688 = arith.index_cast %687 : i32 to index
    %c0_440 = arith.constant 0 : index
    %689 = vector.load %arg12[%688, %c0_440] : memref<32x128xf32, #tpu.memory_space<vmem>>, vector<1x128xf32>
    %690 = arith.addf %686, %689 : vector<1x128xf32>
    %c15_441 = arith.constant 15 : index
    %691 = memref.load %arg1[%c15_441] : memref<36xi32, #tpu.memory_space<smem>>
    %692 = arith.index_cast %691 : i32 to index
    %c0_442 = arith.constant 0 : index
    %693 = vector.load %arg12[%692, %c0_442] : memref<32x128xf32, #tpu.memory_space<vmem>>, vector<1x128xf32>
    %694 = arith.addf %690, %693 : vector<1x128xf32>
    %c3_443 = arith.constant 3 : index
    %c0_444 = arith.constant 0 : index
    %695 = vector.load %arg13[%c3_443, %c0_444] : memref<16x128xf32, #tpu.memory_space<vmem>>, vector<1x128xf32>
    tpu.vector_store %arg13[%c3_443, %c0_444], %694 {strides = array<i32>} : memref<16x128xf32, #tpu.memory_space<vmem>>, vector<1x128xf32>,
    %cst_445 = arith.constant 0.000000e+00 : f32
    %696 = vector.broadcast %cst_445 : f32 to vector<1x128xf32>
    %c16_446 = arith.constant 16 : index
    %697 = memref.load %arg1[%c16_446] : memref<36xi32, #tpu.memory_space<smem>>
    %698 = arith.index_cast %697 : i32 to index
    %c0_447 = arith.constant 0 : index
    %699 = vector.load %arg12[%698, %c0_447] : memref<32x128xf32, #tpu.memory_space<vmem>>, vector<1x128xf32>
    %700 = arith.addf %696, %699 : vector<1x128xf32>
    %c17_448 = arith.constant 17 : index
    %701 = memref.load %arg1[%c17_448] : memref<36xi32, #tpu.memory_space<smem>>
    %702 = arith.index_cast %701 : i32 to index
    %c0_449 = arith.constant 0 : index
    %703 = vector.load %arg12[%702, %c0_449] : memref<32x128xf32, #tpu.memory_space<vmem>>, vector<1x128xf32>
    %704 = arith.addf %700, %703 : vector<1x128xf32>
    %c18_450 = arith.constant 18 : index
    %705 = memref.load %arg1[%c18_450] : memref<36xi32, #tpu.memory_space<smem>>
    %706 = arith.index_cast %705 : i32 to index
    %c0_451 = arith.constant 0 : index
    %707 = vector.load %arg12[%706, %c0_451] : memref<32x128xf32, #tpu.memory_space<vmem>>, vector<1x128xf32>
    %708 = arith.addf %704, %707 : vector<1x128xf32>
    %c19_452 = arith.constant 19 : index
    %709 = memref.load %arg1[%c19_452] : memref<36xi32, #tpu.memory_space<smem>>
    %710 = arith.index_cast %709 : i32 to index
    %c0_453 = arith.constant 0 : index
    %711 = vector.load %arg12[%710, %c0_453] : memref<32x128xf32, #tpu.memory_space<vmem>>, vector<1x128xf32>
    %712 = arith.addf %708, %711 : vector<1x128xf32>
    %c4_454 = arith.constant 4 : index
    %c0_455 = arith.constant 0 : index
    %713 = vector.load %arg13[%c4_454, %c0_455] : memref<16x128xf32, #tpu.memory_space<vmem>>, vector<1x128xf32>
    tpu.vector_store %arg13[%c4_454, %c0_455], %712 {strides = array<i32>} : memref<16x128xf32, #tpu.memory_space<vmem>>, vector<1x128xf32>,
    %cst_456 = arith.constant 0.000000e+00 : f32
    %714 = vector.broadcast %cst_456 : f32 to vector<1x128xf32>
    %c20_457 = arith.constant 20 : index
    %715 = memref.load %arg1[%c20_457] : memref<36xi32, #tpu.memory_space<smem>>
    %716 = arith.index_cast %715 : i32 to index
    %c0_458 = arith.constant 0 : index
    %717 = vector.load %arg12[%716, %c0_458] : memref<32x128xf32, #tpu.memory_space<vmem>>, vector<1x128xf32>
    %718 = arith.addf %714, %717 : vector<1x128xf32>
    %c21_459 = arith.constant 21 : index
    %719 = memref.load %arg1[%c21_459] : memref<36xi32, #tpu.memory_space<smem>>
    %720 = arith.index_cast %719 : i32 to index
    %c0_460 = arith.constant 0 : index
    %721 = vector.load %arg12[%720, %c0_460] : memref<32x128xf32, #tpu.memory_space<vmem>>, vector<1x128xf32>
    %722 = arith.addf %718, %721 : vector<1x128xf32>
    %c22_461 = arith.constant 22 : index
    %723 = memref.load %arg1[%c22_461] : memref<36xi32, #tpu.memory_space<smem>>
    %724 = arith.index_cast %723 : i32 to index
    %c0_462 = arith.constant 0 : index
    %725 = vector.load %arg12[%724, %c0_462] : memref<32x128xf32, #tpu.memory_space<vmem>>, vector<1x128xf32>
    %726 = arith.addf %722, %725 : vector<1x128xf32>
    %c23_463 = arith.constant 23 : index
    %727 = memref.load %arg1[%c23_463] : memref<36xi32, #tpu.memory_space<smem>>
    %728 = arith.index_cast %727 : i32 to index
    %c0_464 = arith.constant 0 : index
    %729 = vector.load %arg12[%728, %c0_464] : memref<32x128xf32, #tpu.memory_space<vmem>>, vector<1x128xf32>
    %730 = arith.addf %726, %729 : vector<1x128xf32>
    %c5_465 = arith.constant 5 : index
    %c0_466 = arith.constant 0 : index
    %731 = vector.load %arg13[%c5_465, %c0_466] : memref<16x128xf32, #tpu.memory_space<vmem>>, vector<1x128xf32>
    tpu.vector_store %arg13[%c5_465, %c0_466], %730 {strides = array<i32>} : memref<16x128xf32, #tpu.memory_space<vmem>>, vector<1x128xf32>,
    %cst_467 = arith.constant 0.000000e+00 : f32
    %732 = vector.broadcast %cst_467 : f32 to vector<1x128xf32>
    %c24_468 = arith.constant 24 : index
    %733 = memref.load %arg1[%c24_468] : memref<36xi32, #tpu.memory_space<smem>>
    %734 = arith.index_cast %733 : i32 to index
    %c0_469 = arith.constant 0 : index
    %735 = vector.load %arg12[%734, %c0_469] : memref<32x128xf32, #tpu.memory_space<vmem>>, vector<1x128xf32>
    %736 = arith.addf %732, %735 : vector<1x128xf32>
    %c25_470 = arith.constant 25 : index
    %737 = memref.load %arg1[%c25_470] : memref<36xi32, #tpu.memory_space<smem>>
    %738 = arith.index_cast %737 : i32 to index
    %c0_471 = arith.constant 0 : index
    %739 = vector.load %arg12[%738, %c0_471] : memref<32x128xf32, #tpu.memory_space<vmem>>, vector<1x128xf32>
    %740 = arith.addf %736, %739 : vector<1x128xf32>
    %c26_472 = arith.constant 26 : index
    %741 = memref.load %arg1[%c26_472] : memref<36xi32, #tpu.memory_space<smem>>
    %742 = arith.index_cast %741 : i32 to index
    %c0_473 = arith.constant 0 : index
    %743 = vector.load %arg12[%742, %c0_473] : memref<32x128xf32, #tpu.memory_space<vmem>>, vector<1x128xf32>
    %744 = arith.addf %740, %743 : vector<1x128xf32>
    %c27_474 = arith.constant 27 : index
    %745 = memref.load %arg1[%c27_474] : memref<36xi32, #tpu.memory_space<smem>>
    %746 = arith.index_cast %745 : i32 to index
    %c0_475 = arith.constant 0 : index
    %747 = vector.load %arg12[%746, %c0_475] : memref<32x128xf32, #tpu.memory_space<vmem>>, vector<1x128xf32>
    %748 = arith.addf %744, %747 : vector<1x128xf32>
    %c6_476 = arith.constant 6 : index
    %c0_477 = arith.constant 0 : index
    %749 = vector.load %arg13[%c6_476, %c0_477] : memref<16x128xf32, #tpu.memory_space<vmem>>, vector<1x128xf32>
    tpu.vector_store %arg13[%c6_476, %c0_477], %748 {strides = array<i32>} : memref<16x128xf32, #tpu.memory_space<vmem>>, vector<1x128xf32>,
    %cst_478 = arith.constant 0.000000e+00 : f32
    %750 = vector.broadcast %cst_478 : f32 to vector<1x128xf32>
    %c28_479 = arith.constant 28 : index
    %751 = memref.load %arg1[%c28_479] : memref<36xi32, #tpu.memory_space<smem>>
    %752 = arith.index_cast %751 : i32 to index
    %c0_480 = arith.constant 0 : index
    %753 = vector.load %arg12[%752, %c0_480] : memref<32x128xf32, #tpu.memory_space<vmem>>, vector<1x128xf32>
    %754 = arith.addf %750, %753 : vector<1x128xf32>
    %c29_481 = arith.constant 29 : index
    %755 = memref.load %arg1[%c29_481] : memref<36xi32, #tpu.memory_space<smem>>
    %756 = arith.index_cast %755 : i32 to index
    %c0_482 = arith.constant 0 : index
    %757 = vector.load %arg12[%756, %c0_482] : memref<32x128xf32, #tpu.memory_space<vmem>>, vector<1x128xf32>
    %758 = arith.addf %754, %757 : vector<1x128xf32>
    %c30_483 = arith.constant 30 : index
    %759 = memref.load %arg1[%c30_483] : memref<36xi32, #tpu.memory_space<smem>>
    %760 = arith.index_cast %759 : i32 to index
    %c0_484 = arith.constant 0 : index
    %761 = vector.load %arg12[%760, %c0_484] : memref<32x128xf32, #tpu.memory_space<vmem>>, vector<1x128xf32>
    %762 = arith.addf %758, %761 : vector<1x128xf32>
    %c31_485 = arith.constant 31 : index
    %763 = memref.load %arg1[%c31_485] : memref<36xi32, #tpu.memory_space<smem>>
    %764 = arith.index_cast %763 : i32 to index
    %c0_486 = arith.constant 0 : index
    %765 = vector.load %arg12[%764, %c0_486] : memref<32x128xf32, #tpu.memory_space<vmem>>, vector<1x128xf32>
    %766 = arith.addf %762, %765 : vector<1x128xf32>
    %c7_487 = arith.constant 7 : index
    %c0_488 = arith.constant 0 : index
    %767 = vector.load %arg13[%c7_487, %c0_488] : memref<16x128xf32, #tpu.memory_space<vmem>>, vector<1x128xf32>
    tpu.vector_store %arg13[%c7_487, %c0_488], %766 {strides = array<i32>} : memref<16x128xf32, #tpu.memory_space<vmem>>, vector<1x128xf32>,
    %cst_489 = arith.constant 0.000000e+00 : f32
    %768 = vector.broadcast %cst_489 : f32 to vector<1x128xf32>
    %c32_490 = arith.constant 32 : index
    %769 = memref.load %arg1[%c32_490] : memref<36xi32, #tpu.memory_space<smem>>
    %770 = arith.index_cast %769 : i32 to index
    %c0_491 = arith.constant 0 : index
    %771 = vector.load %arg12[%770, %c0_491] : memref<32x128xf32, #tpu.memory_space<vmem>>, vector<1x128xf32>
    %772 = arith.addf %768, %771 : vector<1x128xf32>
    %c33_492 = arith.constant 33 : index
    %773 = memref.load %arg1[%c33_492] : memref<36xi32, #tpu.memory_space<smem>>
    %774 = arith.index_cast %773 : i32 to index
    %c0_493 = arith.constant 0 : index
    %775 = vector.load %arg12[%774, %c0_493] : memref<32x128xf32, #tpu.memory_space<vmem>>, vector<1x128xf32>
    %776 = arith.addf %772, %775 : vector<1x128xf32>
    %c34_494 = arith.constant 34 : index
    %777 = memref.load %arg1[%c34_494] : memref<36xi32, #tpu.memory_space<smem>>
    %778 = arith.index_cast %777 : i32 to index
    %c0_495 = arith.constant 0 : index
    %779 = vector.load %arg12[%778, %c0_495] : memref<32x128xf32, #tpu.memory_space<vmem>>, vector<1x128xf32>
    %780 = arith.addf %776, %779 : vector<1x128xf32>
    %c35_496 = arith.constant 35 : index
    %781 = memref.load %arg1[%c35_496] : memref<36xi32, #tpu.memory_space<smem>>
    %782 = arith.index_cast %781 : i32 to index
    %c0_497 = arith.constant 0 : index
    %783 = vector.load %arg12[%782, %c0_497] : memref<32x128xf32, #tpu.memory_space<vmem>>, vector<1x128xf32>
    %784 = arith.addf %780, %783 : vector<1x128xf32>
    %c8_498 = arith.constant 8 : index
    %c0_499 = arith.constant 0 : index
    %785 = vector.load %arg13[%c8_498, %c0_499] : memref<16x128xf32, #tpu.memory_space<vmem>>, vector<1x128xf32>
    tpu.vector_store %arg13[%c8_498, %c0_499], %784 {strides = array<i32>} : memref<16x128xf32, #tpu.memory_space<vmem>>, vector<1x128xf32>,
    %c0_500 = arith.constant 0 : index
    %c0_501 = arith.constant 0 : index
    %786 = vector.load %arg5[%c0_500, %c0_501] : memref<16x128xf32, #tpu.memory_space<vmem>>, vector<16x128xf32>
    %c0_502 = arith.constant 0 : index
    %c0_503 = arith.constant 0 : index
    %787 = vector.load %arg8[%c0_502, %c0_503] : memref<128x128xf32, #tpu.memory_space<vmem>>, vector<128x128xf32>
    %cst_504 = arith.constant dense<0.000000e+00> : vector<16x128xf32>
    %788 = tpu.matmul %786, %787, %cst_504 {dimension_numbers = #tpu.dot_dimension_numbers<[1], [0], [0], [1], [0, 0, 1, 1], [], []>} : vector<16x128xf32>, vector<128x128xf32>, vector<16x128xf32> -> vector<16x128xf32>
    %c0_505 = arith.constant 0 : index
    %c0_506 = arith.constant 0 : index
    %789 = vector.load %arg13[%c0_505, %c0_506] : memref<16x128xf32, #tpu.memory_space<vmem>>, vector<16x128xf32>
    %c0_507 = arith.constant 0 : index
    %c0_508 = arith.constant 0 : index
    %790 = vector.load %arg9[%c0_507, %c0_508] : memref<128x128xf32, #tpu.memory_space<vmem>>, vector<128x128xf32>
    %cst_509 = arith.constant dense<0.000000e+00> : vector<16x128xf32>
    %791 = tpu.matmul %789, %790, %cst_509 {dimension_numbers = #tpu.dot_dimension_numbers<[1], [0], [0], [1], [0, 0, 1, 1], [], []>} : vector<16x128xf32>, vector<128x128xf32>, vector<16x128xf32> -> vector<16x128xf32>
    %792 = arith.addf %788, %791 : vector<16x128xf32>
    %c0_510 = arith.constant 0 : index
    %c0_511 = arith.constant 0 : index
    %793 = vector.load %arg10[%c0_510, %c0_511] : memref<1x128xf32, #tpu.memory_space<vmem>>, vector<1x128xf32>
    %794 = vector.broadcast %793 : vector<1x128xf32> to vector<16x128xf32>
    %795 = arith.addf %792, %794 : vector<16x128xf32>
    %cst_512 = arith.constant 0.000000e+00 : f32
    %796 = vector.broadcast %cst_512 : f32 to vector<16x128xf32>
    %797 = arith.maximumf %795, %796 : vector<16x128xf32>
    %c0_513 = arith.constant 0 : index
    %c0_514 = arith.constant 0 : index
    %798 = vector.load %arg11[%c0_513, %c0_514] : memref<16x128xf32, #tpu.memory_space<vmem>>, vector<16x128xf32>
    tpu.vector_store %arg11[%c0_513, %c0_514], %797 {strides = array<i32>} : memref<16x128xf32, #tpu.memory_space<vmem>>, vector<16x128xf32>,
    return
  }
  func.func @transform_0(%arg0: i32, %arg1: memref<36xi32, #tpu.memory_space<smem>>, %arg2: memref<17xi32, #tpu.memory_space<smem>>, %arg3: memref<17xi32, #tpu.memory_space<smem>>) -> (i32, i32) {
    %c0_i32 = arith.constant 0 : i32
    %c0_i32_0 = arith.constant 0 : i32
    %c0_i32_1 = arith.constant 0 : i32
    return %c0_i32, %c0_i32_0 : i32, i32
  }
  func.func @transform_1(%arg0: i32, %arg1: memref<36xi32, #tpu.memory_space<smem>>, %arg2: memref<17xi32, #tpu.memory_space<smem>>, %arg3: memref<17xi32, #tpu.memory_space<smem>>) -> (i32, i32) {
    %c0_i32 = arith.constant 0 : i32
    %c0_i32_0 = arith.constant 0 : i32
    %c0_i32_1 = arith.constant 0 : i32
    return %c0_i32, %c0_i32_0 : i32, i32
  }
  func.func @transform_2(%arg0: i32, %arg1: memref<36xi32, #tpu.memory_space<smem>>, %arg2: memref<17xi32, #tpu.memory_space<smem>>, %arg3: memref<17xi32, #tpu.memory_space<smem>>) -> (i32, i32) {
    %c0_i32 = arith.constant 0 : i32
    %c0_i32_0 = arith.constant 0 : i32
    %c0_i32_1 = arith.constant 0 : i32
    return %c0_i32, %c0_i32_0 : i32, i32
  }
  func.func @transform_3(%arg0: i32, %arg1: memref<36xi32, #tpu.memory_space<smem>>, %arg2: memref<17xi32, #tpu.memory_space<smem>>, %arg3: memref<17xi32, #tpu.memory_space<smem>>) -> (i32, i32) {
    %c0_i32 = arith.constant 0 : i32
    %c0_i32_0 = arith.constant 0 : i32
    %c0_i32_1 = arith.constant 0 : i32
    return %c0_i32, %c0_i32_0 : i32, i32
  }
  func.func @transform_4(%arg0: i32, %arg1: memref<36xi32, #tpu.memory_space<smem>>, %arg2: memref<17xi32, #tpu.memory_space<smem>>, %arg3: memref<17xi32, #tpu.memory_space<smem>>) -> (i32, i32) {
    %c0_i32 = arith.constant 0 : i32
    %c0_i32_0 = arith.constant 0 : i32
    %c0_i32_1 = arith.constant 0 : i32
    return %c0_i32, %c0_i32_0 : i32, i32
  }
  func.func @transform_5(%arg0: i32, %arg1: memref<36xi32, #tpu.memory_space<smem>>, %arg2: memref<17xi32, #tpu.memory_space<smem>>, %arg3: memref<17xi32, #tpu.memory_space<smem>>) -> (i32, i32) {
    %c0_i32 = arith.constant 0 : i32
    %c0_i32_0 = arith.constant 0 : i32
    %c0_i32_1 = arith.constant 0 : i32
    return %c0_i32, %c0_i32_0 : i32, i32
  }
  func.func @transform_6(%arg0: i32, %arg1: memref<36xi32, #tpu.memory_space<smem>>, %arg2: memref<17xi32, #tpu.memory_space<smem>>, %arg3: memref<17xi32, #tpu.memory_space<smem>>) -> (i32, i32) {
    %c0_i32 = arith.constant 0 : i32
    %c0_i32_0 = arith.constant 0 : i32
    %c0_i32_1 = arith.constant 0 : i32
    return %c0_i32, %c0_i32_0 : i32, i32
  }
  func.func @transform_7(%arg0: i32, %arg1: memref<36xi32, #tpu.memory_space<smem>>, %arg2: memref<17xi32, #tpu.memory_space<smem>>, %arg3: memref<17xi32, #tpu.memory_space<smem>>) -> (i32, i32) {
    %c0_i32 = arith.constant 0 : i32
    %c0_i32_0 = arith.constant 0 : i32
    %c0_i32_1 = arith.constant 0 : i32
    return %c0_i32, %c0_i32_0 : i32, i32
  }
}

</mosaic_0001>

<bundles_post_ra>
// kernel: tpu_custom_call.1
= control target key start
LH: loop header
LB: loop body
LE: loop exit
PB: predicated region body
PF: predicated region fallthrough
CT: control target
= control target key end

     0   :  { %s3281_s0 = inlined_call_operand.hbm [shape: s32[36], index: 0, kind: input, shape index: {}]   ;;  %s3282_s3 = inlined_call_operand.hbm [shape: f32[32,128], index: 3, kind: input, shape index: {}]   ;;  %s3283_s4 = inlined_call_operand.hbm [shape: f32[16,128], index: 4, kind: input, shape index: {}]   ;;  %s3284_s5 = inlined_call_operand.hbm [shape: f32[128,128], index: 5, kind: input, shape index: {}]   ;;  %s3285_s6 = inlined_call_operand.hbm [shape: f32[128,128], index: 6, kind: input, shape index: {}]   ;;  %s3286_s7 = inlined_call_operand.hbm [shape: f32[128,128], index: 7, kind: input, shape index: {}]   ;;  %s3287_s8 = inlined_call_operand.hbm [shape: f32[128,128], index: 8, kind: input, shape index: {}]   ;;  %s3288_s9 = inlined_call_operand.vmem [shape: f32[1,128], index: 9, kind: input, shape index: {}]   ;;  %s3289_s10 = inlined_call_operand.hbm [shape: f32[16,128], index: 10, kind: output, shape index: {}]   ;;  %s3290_s1 = inlined_call_operand.vmem [shape: s32[17], index: 1, kind: input, shape index: {}]   ;;  %s3291_s2 = inlined_call_operand.vmem [shape: s32[17], index: 2, kind: input, shape index: {}]  }
   0x1   :  { %3458 = sst [smem:[#allocation93_spill]] %s3288_s9  ;;  %s2233_s15 = scalar_lea.hbm %s3281_s0, 16 }
   0x2   :  { %3459 = sst [smem:[#allocation94_spill]] %s3289_s10  ;;  %p2234_p0 = scmp.ne.s32.totalorder %s3281_s0, %s2233_s15 }
   0x3   :  { %p2237_p1 = scmp.lt.u32.totalorder %s2233_s15, %s3281_s0 }
   0x5   :  { %p2239_p2 = pnand %p2237_p1, %p2234_p0 }
   0x7   :  { %2242 = shalt.err (!%p2239_p2)  }
   0x8   :  { %s2433_s20 = smov [#allocation6]   ;;  %s17_s25 = sshll.u32 %s3290_s1, 4  ;;  %s18_s25 = int_to_ptr.vmem [resolvable:$true] %s17_s25 }
   0x9   :  { %16 = dma.hbm_to_smem %s3281_s0, 16, %s2433_s20, [#allocation5] }
   0xa   :  { %s21_s28 = sshll.u32 %s3291_s2, 4  ;;  %s2243_s29 = scalar_lea.vmem %s18_s25, 16  ;;  %s22_s28 = int_to_ptr.vmem [resolvable:$true] %s21_s28 }
   0xb   :  { %p2244_p3 = scmp.ne.s32.totalorder %s18_s25, %s2243_s29  ;;  %p2248_p4 = scmp.lt.s32.totalorder %s18_s25, %s18_s25 }
   0xc   :  { %p2249_p5 = scmp.lt.s32.totalorder %s2243_s29, %s2243_s29 }
   0xe   :  { %p2250_p6 = por %p2249_p5, %p2248_p4 }
  0x10   :  { %p2251_p7 = pnand %p2250_p6, %p2244_p3 }
  0x12   :  { %2254 = shalt.err (!%p2251_p7)  }
  0x13   :  { %s2434_s30 = smov [#allocation7]   ;;  %s2255_s0 = scalar_lea.vmem %s22_s28, 16 }
  0x14   :  { %20 = dma.vmem_to_smem %s18_s25, 16, %s2434_s30, [#allocation5] }
  0x15   :  { %p2256_p8 = scmp.ne.s32.totalorder %s22_s28, %s2255_s0  ;;  %p2260_p9 = scmp.lt.s32.totalorder %s22_s28, %s22_s28 }
  0x16   :  { %p2261_p10 = scmp.lt.s32.totalorder %s2255_s0, %s2255_s0 }
  0x18   :  { %p2262_p11 = por %p2261_p10, %p2260_p9 }
  0x1a   :  { %p2263_p12 = pnand %p2262_p11, %p2256_p8 }
  0x1c   :  { %2266 = shalt.err (!%p2263_p12)  }
  0x1d   :  { %s2435_s1 = smov [#allocation8]  }
  0x1e   :  { %24 = dma.vmem_to_smem %s22_s28, 16, %s2435_s1, [#allocation5] }
  0x1f   :  { %2421 = dma.done.wait [#allocation5], 48 }
  0x20   :  { %2422 = vsyncadd [#allocation5], 4294967248 }
  0x21   :  { %26 = sfence }
  0x22   :  { %27 = vsyncpa [#allocation10], 0 }
  0x23   :  { %28 = vsyncpa [#allocation13], 0 }
  0x24   :  { %29 = vsyncpa [#allocation16], 0 }
  0x25   :  { %30 = vsyncpa [#allocation19], 0 }
  0x26   :  { %31 = vsyncpa [#allocation11], 0  ;;  %s2436_s2 = smov [#allocation12]   ;;  %s2437_s12 = smov [#allocation15]  }
  0x27   :  { %s49_s11 = sshll.u32 %s2436_s2, 4  ;;  %s73_s13 = sshll.u32 %s2437_s12, 4  ;;  %s50_s11 = int_to_ptr.vmem [resolvable:$true] %s49_s11  ;;  %s2519_s13 = int_to_ptr.vmem [resolvable:$true] %s73_s13 }
  0x28   :  { %s2267_s16 = scalar_lea.hbm %s3283_s4, 256 }
  0x29   :  { %p2268_p13 = scmp.ne.s32.totalorder %s3283_s4, %s2267_s16  ;;  %p2271_p0 = scmp.lt.u32.totalorder %s2267_s16, %s3283_s4 }
  0x2b   :  { %p2273_p1 = pnand %p2271_p0, %p2268_p13 }
  0x2d   :  { %2276 = shalt.err (!%p2273_p1)
}
  0x2e   :  { %s2277_s21 = scalar_lea.vmem %s50_s11, 256  ;;  %p2282_p3 = scmp.lt.s32.totalorder %s50_s11, %s50_s11 }
  0x2f   :  { %p2278_p2 = scmp.ne.s32.totalorder %s50_s11, %s2277_s21  ;;  %p2283_p4 = scmp.lt.s32.totalorder %s2277_s21, %s2277_s21 }
  0x31   :  { %p2284_p5 = por %p2283_p4, %p2282_p3 }
  0x33   :  { %p2285_p6 = pnand %p2284_p5, %p2278_p2 }
  0x35   :  { %2288 = shalt.err (!%p2285_p6)
}
  0x36   :  { %s3292_s22 = smov 128   ;;  %s3293_s23 = smov 8  }
  0x37   :  { %55 = dma.hbm_to_vmem [thread:$0]  %s3283_s4, 256, %s50_s11, [#allocation13], %s3292_s22, %s3292_s22, %s3293_s23  }
  0x38   :  { %s2289_s28 = scalar_lea.hbm %s3285_s6, 2048 }
  0x39   :  { %p2290_p7 = scmp.ne.s32.totalorder %s3285_s6, %s2289_s28  ;;  %p2293_p8 = scmp.lt.u32.totalorder %s2289_s28, %s3285_s6 }
  0x3b   :  { %p2295_p9 = pnand %p2293_p8, %p2290_p7 }
  0x3d   :  { %2298 = shalt.err (!%p2295_p9)
}
  0x3e   :  { %s2299_s2 = scalar_lea.vmem %s2519_s13, 2048  ;;  %p2304_p11 = scmp.lt.s32.totalorder %s2519_s13, %s2519_s13 }
  0x3f   :  { %p2300_p10 = scmp.ne.s32.totalorder %s2519_s13, %s2299_s2  ;;  %p2305_p12 = scmp.lt.s32.totalorder %s2299_s2, %s2299_s2 }
  0x41   :  { %p2306_p13 = por %p2305_p12, %p2304_p11 }
  0x43   :  { %p2307_p0 = pnand %p2306_p13, %p2300_p10 }
  0x45   :  { %2310 = shalt.err (!%p2307_p0)
}
  0x46   :  { %79 = dma.hbm_to_vmem [thread:$0]  %s3285_s6, 2048, %s2519_s13, [#allocation16], %s3292_s22, %s3292_s22, %s3293_s23  }
  0x47   :  { %s2440_s12 = smov [#allocation9]   ;;  %s2441_s15 = smov [#allocation14]  }
  0x48   :  { %s37_s14 = sshll.u32 %s2440_s12, 4  ;;  %s61_s16 = sshll.u32 %s2441_s15, 4  ;;  %s38_s14 = int_to_ptr.vmem [resolvable:$true] %s37_s14  ;;  %s2556_s16 = int_to_ptr.vmem [resolvable:$true] %s61_s16 }
  0x49   :  { %s2311_s19 = scalar_lea.hbm %s3282_s3, 512 }
  0x4a   :  { %p2312_p1 = scmp.ne.s32.totalorder %s3282_s3, %s2311_s19  ;;  %p2315_p2 = scmp.lt.u32.totalorder %s2311_s19, %s3282_s3 }
  0x4c   :  { %p2317_p3 = pnand %p2315_p2, %p2312_p1 }
  0x4e   :  { %2320 = shalt.err (!%p2317_p3)
}
  0x4f   :  { %s2321_s6 = scalar_lea.vmem %s38_s14, 512  ;;  %p2326_p5 = scmp.lt.s32.totalorder %s38_s14, %s38_s14 }
  0x50   :  { %p2322_p4 = scmp.ne.s32.totalorder %s38_s14, %s2321_s6  ;;  %p2327_p6 = scmp.lt.s32.totalorder %s2321_s6, %s2321_s6 }
  0x52   :  { %p2328_p7 = por %p2327_p6, %p2326_p5 }
  0x54   :  { %p2329_p8 = pnand %p2328_p7, %p2322_p4 }
  0x56   :  { %2332 = shalt.err (!%p2329_p8)
}
  0x57   :  { %43 = dma.hbm_to_vmem [thread:$0]  %s3282_s3, 512, %s38_s14, [#allocation10], %s3292_s22, %s3292_s22, %s3293_s23  }
  0x58   :  { %s2333_s29 = scalar_lea.hbm %s3284_s5, 2048 }
  0x59   :  { %p2334_p9 = scmp.ne.s32.totalorder %s3284_s5, %s2333_s29  ;;  %p2337_p10 = scmp.lt.u32.totalorder %s2333_s29, %s3284_s5 }
  0x5b   :  { %p2339_p11 = pnand %p2337_p10, %p2334_p9 }
  0x5d   :  { %2342 = shalt.err (!%p2339_p11)
}
  0x5e   :  { %s2343_s4 = scalar_lea.vmem %s2556_s16, 2048  ;;  %p2348_p13 = scmp.lt.s32.totalorder %s2556_s16, %s2556_s16 }
  0x5f   :  { %p2344_p12 = scmp.ne.s32.totalorder %s2556_s16, %s2343_s4  ;;  %p2349_p0 = scmp.lt.s32.totalorder %s2343_s4, %s2343_s4 }
  0x61   :  { %p2350_p1 = por %p2349_p0, %p2348_p13 }
  0x63   :  { %p2351_p2 = pnand %p2350_p1, %p2344_p12 }
  0x65   :  { %2354 = shalt.err (!%p2351_p2)
}
  0x66   :  { %67 = dma.hbm_to_vmem [thread:$0]  %s3284_s5, 2048, %s2556_s16, [#allocation13], %s3292_s22, %s3292_s22, %s3293_s23  }
  0x67   :  { %s2442_s12 = smov [#allocation17]   ;;  %s2443_s15 = smov [#allocation18]  }
  0x68   :  { %s85_s14 = sshll.u32 %s2442_s12, 4  ;;  %s97_s17 = sshll.u32 %s2443_s15, 4  ;;  %s86_s14 = int_to_ptr.vmem [resolvable:$true] %s85_s14  ;;  %s2593_s17 = int_to_ptr.vmem [resolvable:$true] %s97_s17 }
  0x69   :  { %s2355_s20 = scalar_lea.hbm %s3286_s7, 2048 }
  0x6a   :  { %p2356_p3 = scmp.ne.s32.totalorder %s3286_s7, %s2355_s20  ;;  %p2359_p4 = scmp.lt.u32.totalorder %s2355_s20, %s3286_s7 }
  0x6c   :  { %p2361_p5 = pnand %p2359_p4, %p2356_p3 }
  0x6e   :  { %2364 = shalt.err (!%p2361_p5)
}
  0x6f   :  { %s2365_s5 = scalar_lea.vmem %s86_s14, 2048  ;;  %p2370_p7 = scmp.lt.s32.totalorder %s86_s14, %s86_s14 }
  0x70   :  { %p2366_p6 = scmp.ne.s32.totalorder %s86_s14, %s2365_s5  ;;  %p2371_p8 = scmp.lt.s32.totalorder %s2365_s5, %s2365_s5 }
  0x72   :  { %p2372_p9 = por %p2371_p8, %p2370_p7 }
  0x74   :  { %p2373_p10 = pnand %p2372_p9, %p2366_p6 }
  0x76   :  { %2376 = shalt.err (!%p2373_p10)
}
  0x77   :  { %91 = dma.hbm_to_vmem [thread:$0]  %s3286_s7, 2048, %s86_s14, [#allocation16], %s3292_s22, %s3292_s22, %s3293_s23  }
  0x78   :  { %s2377_s28 = scalar_lea.hbm %s3287_s8, 2048 }
  0x79   :  { %p2378_p11 = scmp.ne.s32.totalorder %s3287_s8, %s2377_s28  ;;  %p2381_p12 = scmp.lt.u32.totalorder %s2377_s28, %s3287_s8 }
  0x7b   :  { %p2383_p13 = pnand %p2381_p12, %p2378_p11 }
  0x7d   :  { %2386 = shalt.err (!%p2383_p13)
}
  0x7e   :  { %s2387_s2 = scalar_lea.vmem %s2593_s17, 2048  ;;  %p2392_p1 = scmp.lt.s32.totalorder %s2593_s17, %s2593_s17 }
  0x7f   :  { %p2388_p0 = scmp.ne.s32.totalorder %s2593_s17, %s2387_s2  ;;  %p2393_p2 = scmp.lt.s32.totalorder %s2387_s2, %s2387_s2 }
  0x81   :  { %p2394_p3 = por %p2393_p2, %p2392_p1 }
  0x83   :  { %p2395_p4 = pnand %p2394_p3, %p2388_p0 }
  0x85   :  { %2398 = shalt.err (!%p2395_p4)
}
  0x86   :  { %103 = dma.hbm_to_vmem [thread:$0]  %s3287_s8, 2048, %s2593_s17, [#allocation19], %s3292_s22, %s3292_s22, %s3293_s23  }
  0x87   :  { %2423 = dma.done.wait [#allocation10], 512  }
  0x88   :  { %2424 = vsyncadd [#allocation10], 4294966784 }
  0x89   :  { %2425 = dma.done.wait [#allocation13], 2304  }
  0x8a   :  { %2426 = vsyncadd [#allocation13], 4294964992 }
  0x8b   :  { %2427 = dma.done.wait [#allocation16], 4096  }
  0x8c   :  { %2428 = vsyncadd [#allocation16], 4294963200 }
  0x8d   :  { %2429 = dma.done.wait [#allocation19], 2048  }
  0x8e   :  { %2430 = vsyncadd [#allocation19], 4294965248  ;;  %v128_v0 = vld [vmem:[#allocation14] sm:$0xff]  ;;  %v129_v1 = vld [vmem:[#allocation14 + $0x8] sm:$0xff]  ;;  %v2444_v36 = vmov 0.0   ;;  %s2636_s8 = sld [smem:[#allocation6]] }
  0x8f   :  { %v130_v2 = vld [vmem:[#allocation14 + $0x10] sm:$0xff]  ;;  %v2057_v3 = vpack.c.bf16 %v129_v1, %v128_v0  ;;  %v131_v4 = vld [vmem:[#allocation14 + $0x18] sm:$0xff]  ;;  %v132_v6 = vld [vmem:[#allocation14 + $0x20] sm:$0xff]  ;;  %237 = vst [vmem:[#allocation4] sm:$0xff] %v2444_v36  ;;  %s2638_s3 = sld [smem:[#allocation6 + $0x1]]  ;;  %s2640_s11 = sld [smem:[#allocation6 + $0x2]] }
  0x90   :  { %v2061_v5 = vpack.c.bf16 %v131_v4, %v130_v2  ;;  %v133_v7 = vld [vmem:[#allocation14 + $0x28] sm:$0xff]  ;;  %v124_v9 = vld [vmem:[#allocation9] sm:$0xff]  ;;  %v135_v11 = vld [vmem:[#allocation14 + $0x38] sm:$0xff]  ;;  %241 = vst [vmem:[#allocation3] sm:$0xff] %v2444_v36  ;;  %s2642_s12 = sld [smem:[#allocation6 + $0x3]]  ;;  %s2644_s14 = sld [smem:[#allocation6 + $0x4]] }
  0x91   :  { %2058 = vmatprep.subr.bf16.mxu0 %v2057_v3  ;;  %v2065_v8 = vpack.c.bf16 %v133_v7, %v132_v6  ;;  %v134_v10 = vld [vmem:[#allocation14 + $0x30] sm:$0xff]  ;;  %1905 = vmatprep.mubr.f32.mxu0 %v124_v9  ;;  %v136_v13 = vld [vmem:[#allocation14 + $0x40] sm:$0xff]  ;;  %v137_v14 = vld [vmem:[#allocation14 + $0x48] sm:$0xff]  ;;  %242 = vst [vmem:[#allocation3 + $0x8] sm:$0xff] %v2444_v36  ;;  %s2646_s15 = sld [smem:[#allocation6 + $0x5]]  ;;  %s2648_s17 = sld [smem:[#allocation6 + $0x6]] }
  0x92   :  { %2060 = vmatpush3.bf16.msra.mxu0 %v2057_v3  ;;  %v2069_v12 = vpack.c.bf16 %v135_v11, %v134_v10  ;;  %v2073_v15 = vpack.c.bf16 %v137_v14, %v136_v13  ;;  %v138_v16 = vld [vmem:[#allocation14 + $0x50] sm:$0xff]  ;;  %v139_v17 = vld [vmem:[#allocation14 + $0x58] sm:$0xff]  ;;  %v140_v19 = vld [vmem:[#allocation14 + $0x60] sm:$0xff]  ;;  %238 = vst [vmem:[#allocation4 + $0x8] sm:$0xff] %v2444_v36  ;;  %s2650_s18 = sld [smem:[#allocation6 + $0x7]]  ;;  %s2652_s19 = sld [smem:[#allocation6 + $0x8]] }
  0x93   :  { %2062 = vmatprep.subr.bf16.mxu0 %v2061_v5  ;;  %v2077_v18 = vpack.c.bf16 %v139_v17, %v138_v16  ;;  %v141_v20 = vld [vmem:[#allocation14 + $0x68] sm:$0xff]  ;;  %v142_v22 = vld [vmem:[#allocation14 + $0x70] sm:$0xff]  ;;  %v143_v23 = vld [vmem:[#allocation14 + $0x78] sm:$0xff]  ;;  %239 = vst [vmem:[#allocation4 + $0x10] sm:$0xff] %v2444_v36  ;;  %s2654_s20 = sld [smem:[#allocation6 + $0x9]]  ;;  %s2656_s21 = sld [smem:[#allocation6 + $0xa]] }
  0x94   :  { %v2081_v21 = vpack.c.bf16 %v141_v20, %v140_v19  ;;  %v2085_v24 = vpack.c.bf16 %v143_v23, %v142_v22  ;;  %v125_v25 = vld [vmem:[#allocation9 + $0x8] sm:$0xff]  ;;  %v126_v26 = vld [vmem:[#allocation9 + $0x10] sm:$0xff]  ;;  %v127_v27 = vld [vmem:[#allocation9 + $0x18] sm:$0xff]  ;;  %240 = vst [vmem:[#allocation4 + $0x18] sm:$0xff] %v2444_v36  ;;  %s2658_s24 = sld [smem:[#allocation6 + $0xb]]  ;;  %s2660_s25 = sld [smem:[#allocation6 + $0xc]] }
  0x95   :  { %v536_v28 = vld [vmem:[#allocation15] sm:$0xff]  ;;  %v537_v29 = vld [vmem:[#allocation15 + $0x8] sm:$0xff]  ;;  %v538_v31 = vld [vmem:[#allocation15 + $0x10] sm:$0xff]  ;;  %3460 = sst [smem:[#allocation27_spill]] %s2638_s3  ;;  %s2662_s6 = sld [smem:[#allocation6 + $0xd]] }
  0x96   :  { %2064 = vmatpush3.bf16.msra.mxu0 %v2061_v5  ;;  %v2089_v30 = vpack.c.bf16 %v537_v29, %v536_v28  ;;  %v539_v32 = vld [vmem:[#allocation15 + $0x18] sm:$0xff]  ;;  %v540_v33 = vld [vmem:[#allocation15 + $0x20] sm:$0xff]  ;;  %v541_v35 = vld [vmem:[#allocation15 + $0x28] sm:$0xff]  ;;  %3461 = sst [smem:[#allocation28_spill]] %s2642_s12  ;;  %s2664_s5 = sld [smem:[#allocation6 + $0xe]] }
  0x97   :  { %2066 = vmatprep.subr.bf16.mxu0 %v2065_v8  ;;  %v2093_v34 = vpack.c.bf16 %v539_v32, %v538_v31  ;;  %v2097_v37 = vpack.c.bf16 %v541_v35, %v540_v33  ;;  %v542_v38 = vld [vmem:[#allocation15 + $0x30] sm:$0xff]  ;;  %v543_v39 = vld [vmem:[#allocation15 + $0x38] sm:$0xff]  ;;  %v544_v41 = vld [vmem:[#allocation15 + $0x40] sm:$0xff]  ;;  %3462 = sst [smem:[#allocation29_spill]] %s2646_s15  ;;  %s2666_s16 = sld [smem:[#allocation6 + $0xf]] }
  0x98   :  { %2090 = vmatprep.subr.bf16.mxu1 %v2089_v30  ;;  %v2101_v40 = vpack.c.bf16 %v543_v39, %v542_v38  ;;  %v545_v42 = vld [vmem:[#allocation15 + $0x48] sm:$0xff]  ;;  %v546_v44 = vld [vmem:[#allocation15 + $0x50] sm:$0xff]  ;;  %v547_v45 = vld [vmem:[#allocation15 + $0x58] sm:$0xff]  ;;  %3463 = sst [smem:[#allocation30_spill]] %s2648_s17  ;;  %s2668_s13 = sld [smem:[#allocation6 + $0x10]] }
  0x99   :  { %2092 = vmatpush3.bf16.msra.mxu1 %v2089_v30  ;;  %v2105_v43 = vpack.c.bf16 %v545_v42, %v544_v41  ;;  %v2109_v46 = vpack.c.bf16 %v547_v45, %v546_v44  ;;  %v548_v47 = vld [vmem:[#allocation15 + $0x60] sm:$0xff]  ;;  %v549_v48 = vld [vmem:[#allocation15 + $0x68] sm:$0xff]  ;;  %v550_v50 = vld [vmem:[#allocation15 + $0x70] sm:$0xff]  ;;  %3464 = sst [smem:[#allocation31_spill]] %s2650_s18  ;;  %s2670_s26 = sld [smem:[#allocation6 + $0x11]] }
  0x9a   :  { %2068 = vmatpush3.bf16.msra.mxu0 %v2065_v8  ;;  %2094 = vmatprep.subr.bf16.mxu1 %v2093_v34  ;;  %v2113_v49 = vpack.c.bf16 %v549_v48, %v548_v47  ;;  %v551_v51 = vld [vmem:[#allocation15 + $0x78] sm:$0xff]  ;;  %3465 = sst [smem:[#allocation32_spill]] %s2652_s19  ;;  %s2672_s27 = sld [smem:[#allocation6 + $0x12]] }
  0x9b   :  { %2070 = vmatprep.subr.bf16.mxu0 %v2069_v12  ;;  %v2117_v52 = vpack.c.bf16 %v551_v51, %v550_v50  ;;  %3466 = sst [smem:[#allocation33_spill]] %s2654_s20  ;;  %s2674_s28 = sld [smem:[#allocation6 + $0x13]] }
  0x9c   :  { %3467 = sst [smem:[#allocation34_spill]] %s2656_s21  ;;  %s2676_s29 = sld [smem:[#allocation6 + $0x14]] }
  0x9d   :  { %2096 = vmatpush3.bf16.msra.mxu1 %v2093_v34  ;;  %3468 = sst [smem:[#allocation35_spill]] %s2658_s24  ;;  %s2678_s30 = sld [smem:[#allocation6 + $0x15]] }
  0x9e   :  { %2072 = vmatpush3.bf16.msra.mxu0 %v2069_v12  ;;  %2098 = vmatprep.subr.bf16.mxu1 %v2097_v37  ;;  %3469 = sst [smem:[#allocation36_spill]] %s2660_s25  ;;  %s2680_s0 = sld [smem:[#allocation6 + $0x16]] }
  0x9f   :  { %2074 = vmatprep.subr.bf16.mxu0 %v2073_v15  ;;  %3470 = sst [smem:[#allocation37_spill]] %s2662_s6  ;;  %s2682_s1 = sld [smem:[#allocation6 + $0x17]] }
  0xa0   :  { %3471 = sst [smem:[#allocation38_spill]] %s2664_s5  ;;  %s2684_s2 = sld [smem:[#allocation6 + $0x18]] }
  0xa1   :  { %2100 = vmatpush3.bf16.msra.mxu1 %v2097_v37  ;;  %3472 = sst [smem:[#allocation39_spill]] %s2666_s16  ;;  %s2686_s7 = sld [smem:[#allocation6 + $0x19]] }
  0xa2   :  { %2076 = vmatpush3.bf16.msra.mxu0 %v2073_v15  ;;  %2102 = vmatprep.subr.bf16.mxu1 %v2101_v40  ;;  %3473 = sst [smem:[#allocation40_spill]] %s2668_s13  ;;  %s2688_s4 = sld [smem:[#allocation6 + $0x1a]] }
  0xa3   :  { %2078 = vmatprep.subr.bf16.mxu0 %v2077_v18  ;;  %3474 = sst [smem:[#allocation41_spill]] %s2670_s26  ;;  %s2690_s22 = sld [smem:[#allocation6 + $0x1b]] }
  0xa4   :  { %3475 = sst [smem:[#allocation42_spill]] %s2672_s27  ;;  %s2692_s23 = sld [smem:[#allocation6 + $0x1c]] }
  0xa5   :  { %2104 = vmatpush3.bf16.msra.mxu1 %v2101_v40  ;;  %3476 = sst [smem:[#allocation43_spill]] %s2674_s28  ;;  %s2694_s10 = sld [smem:[#allocation6 + $0x1d]] }
  0xa6   :  { %2080 = vmatpush3.bf16.msra.mxu0 %v2077_v18  ;;  %2106 = vmatprep.subr.bf16.mxu1 %v2105_v43  ;;  %3477 = sst [smem:[#allocation44_spill]] %s2676_s29  ;;  %s2696_s9 = sld [smem:[#allocation6 + $0x1e]] }
  0xa7   :  { %2082 = vmatprep.subr.bf16.mxu0 %v2081_v21  ;;  %3478 = sst [smem:[#allocation45_spill]] %s2678_s30  ;;  %s2698_s28 = sld [smem:[#allocation6 + $0x1f]] }
  0xa8   :  { %3479 = sst [smem:[#allocation46_spill]] %s2680_s0  ;;  %s2700_s30 = sld [smem:[#allocation6 + $0x20]] }
  0xa9   :  { %2108 = vmatpush3.bf16.msra.mxu1 %v2105_v43  ;;  %3480 = sst [smem:[#allocation47_spill]] %s2682_s1  ;;  %s2702_s0 = sld [smem:[#allocation6 + $0x21]] }
  0xaa   :  { %2084 = vmatpush3.bf16.msra.mxu0 %v2081_v21  ;;  %2110 = vmatprep.subr.bf16.mxu1 %v2109_v46  ;;  %3481 = sst [smem:[#allocation48_spill]] %s2684_s2  ;;  %s2704_s1 = sld [smem:[#allocation6 + $0x22]] }
  0xab   :  { %2086 = vmatprep.subr.bf16.mxu0 %v2085_v24  ;;  %3482 = sst [smem:[#allocation49_spill]] %s2686_s7  ;;  %s2706_s2 = sld [smem:[#allocation6 + $0x23]] }
  0xac   :  { %3483 = sst [smem:[#allocation50_spill]] %s2688_s4  ;;  %s2708_s7 = sld [smem:[#allocation7]] }
  0xad   :  { %2112 = vmatpush3.bf16.msra.mxu1 %v2109_v46  ;;  %3484 = sst [smem:[#allocation51_spill]] %s2690_s22  ;;  %s2710_s4 = sld [smem:[#allocation8]] }
  0xae   :  { %2088 = vmatpush3.bf16.msra.mxu0 %v2085_v24  ;;  %2114 = vmatprep.subr.bf16.mxu1 %v2113_v49  ;;  %3485 = sst [smem:[#allocation52_spill]] %s2692_s23  ;;  %s2712_s22 = sld [smem:[#allocation7 + $0x1]] }
  0xaf   :  { %2122 = vmatprep.subr.bf16.mxu0 %v2089_v30  ;;  %3486 = sst [smem:[#allocation53_spill]] %s2694_s10  ;;  %s2714_s23 = sld [smem:[#allocation8 + $0x1]] }
  0xb0   :  { %3487 = sst [smem:[#allocation54_spill]] %s2696_s9  ;;  %s2716_s10 = sld [smem:[#allocation7 + $0x2]] }
  0xb1   :  { %1906 = vmatmul.mubr.f32.vlgmr.msra.gmra.mrb[0].mxu0 %v125_v25  ;;  %2116 = vmatpush3.bf16.msra.mxu1 %v2113_v49  ;;  %3488 = sst [smem:[#allocation55_spill]] %s2698_s28  ;;  %s2718_s9 = sld [smem:[#allocation8 + $0x2]] }
  0xb2   :  { %1908 = vmatprep.mubr.f32.mxu0 %v126_v26  ;;  %2124 = vmatpush3.bf16.msra.mxu0 %v2089_v30  ;;  %3489 = sst [smem:[#allocation56_spill]] %s2700_s30  ;;  %s2720_s28 = sld [smem:[#allocation7 + $0x3]] }
  0xb3   :  { %2126 = vmatprep.subr.bf16.mxu0 %v2093_v34  ;;  %2118 = vmatprep.subr.bf16.mxu1 %v2117_v52  ;;  %3490 = sst [smem:[#allocation57_spill]] %s2702_s0  ;;  %s2722_s30 = sld [smem:[#allocation8 + $0x3]] }
  0xb4   :  { %3491 = sst [smem:[#allocation58_spill]] %s2704_s1  ;;  %s2724_s0 = sld [smem:[#allocation7 + $0x4]] }
  0xb5   :  { %1909 = vmatmul.mubr.f32.gmra.mrb[2].mxu0 %v127_v27  ;;  %2120 = vmatpush3.bf16.msra.mxu1 %v2117_v52  ;;  %3492 = sst [smem:[#allocation59_spill]] %s2706_s2  ;;  %s2726_s1 = sld [smem:[#allocation8 + $0x4]] }
  0xb6   :  { %2128 = vmatpush3.bf16.msra.mxu0 %v2093_v34  ;;  %3493 = sst [smem:[#allocation60_spill]] %s2708_s7  ;;  %s2728_s2 = sld [smem:[#allocation7 + $0x5]] }
  0xb7   :  { %2130 = vmatprep.subr.bf16.mxu0 %v2097_v37  ;;  %3494 = sst [smem:[#allocation61_spill]] %s2710_s4  ;;  %s2732_s7 = sld [smem:[#allocation8 + $0x5]] }
  0xb8   :  { %3495 = sst [smem:[#allocation62_spill]] %s2712_s22  ;;  %s2760_s22 = sld [smem:[#allocation7 + $0xc]] }
  0xb9   :  { %3496 = sst [smem:[#allocation63_spill]] %s2714_s23 }
  0xba   :  { %2132 = vmatpush3.bf16.msra.mxu0 %v2097_v37  ;;  %3497 = sst [smem:[#allocation64_spill]] %s2716_s10  ;;  %s2737_s10 = sld [smem:[#allocation7 + $0x6]] }
  0xbb   :  { %2134 = vmatprep.subr.bf16.mxu0 %v2101_v40  ;;  %3498 = sst [smem:[#allocation65_spill]] %s2718_s9 }
  0xbc   :  { %3499 = sst [smem:[#allocation66_spill]] %s2720_s28  ;;  %s2740_s28 = sld [smem:[#allocation8 + $0x6]] }
  0xbd   :  { %3500 = sst [smem:[#allocation67_spill]] %s2722_s30  ;;  %s3330_s30 = scalar_lea.vmem [#allocation2], %s2636_s8 }
  0xbe   :  { %2136 = vmatpush3.bf16.msra.mxu0 %v2101_v40  ;;  %3501 = sst [smem:[#allocation68_spill]] %s2724_s0  ;;  %s2742_s0 = sld [smem:[#allocation7 + $0x7]] }
  0xbf   :  { %2138 = vmatprep.subr.bf16.mxu0 %v2105_v43  ;;  %3502 = sst [smem:[#allocation69_spill]] %s2726_s1  ;;  %s2766_s1 = sld [smem:[#allocation7 + $0xf]] }
  0xc0   :  { %3503 = sst [smem:[#allocation70_spill]] %s2728_s2  ;;  %s2746_s2 = sld [smem:[#allocation8 + $0x7]] }
  0xc1   :  { %3504 = sst [smem:[#allocation71_spill]] %s2732_s7  ;;  %s2762_s7 = sld [smem:[#allocation7 + $0xd]] }
  0xc2   :  { %2140 = vmatpush3.bf16.msra.mxu0 %v2105_v43  ;;  %3505 = sst [smem:[#allocation72_spill]] %s2737_s10  ;;  %s2751_s10 = sld [smem:[#allocation7 + $0x8]] }
  0xc3   :  { %2142 = vmatprep.subr.bf16.mxu0 %v2109_v46  ;;  %3506 = sst [smem:[#allocation73_spill]] %s2740_s28  ;;  %s2754_s28 = sld [smem:[#allocation7 + $0x9]] }
  0xc4   :  { %3507 = sst [smem:[#allocation74_spill]] %s2742_s0  ;;  %s2756_s0 = sld [smem:[#allocation7 + $0xa]] }
  0xc5   :  { %3513 = sst [smem:[#allocation80_spill]] %s2760_s22  ;;  %s2776_s22 = sld [smem:[#allocation8 + $0x9]] }
  0xc6   :  { %2144 = vmatpush3.bf16.msra.mxu0 %v2109_v46  ;;  %3508 = sst [smem:[#allocation75_spill]] %s2746_s2  ;;  %s2758_s2 = sld [smem:[#allocation7 + $0xb]] }
  0xc7   :  { %2146 = vmatprep.subr.bf16.mxu0 %v2113_v49  ;;  %3514 = sst [smem:[#allocation81_spill]] %s2762_s7 }
  0xc8   :  { %3509 = sst [smem:[#allocation76_spill]] %s2751_s10  ;;  %s2764_s10 = sld [smem:[#allocation7 + $0xe]] }
  0xc9   :  { %3510 = sst [smem:[#allocation77_spill]] %s2754_s28  ;;  %s2768_s28 = sld [smem:[#allocation8 + $0x8]] }
  0xca   :  { %2148 = vmatpush3.bf16.msra.mxu0 %v2113_v49  ;;  %3511 = sst [smem:[#allocation78_spill]] %s2756_s0  ;;  %s3332_s0 = scalar_lea.vmem [#allocation2], %s2638_s3 }
  0xcb   :  { %2150 = vmatprep.subr.bf16.mxu0 %v2117_v52  ;;  %3516 = sst [smem:[#allocation83_spill]] %s2766_s1  ;;  %s3334_s1 = scalar_lea.vmem [#allocation2], %s2646_s15 }
  0xcc   :  { %3512 = sst [smem:[#allocation79_spill]] %s2758_s2  ;;  %s3336_s3 = scalar_lea.vmem [#allocation2], %s2640_s11 }
  0xcd   :  { %3518 = sst [smem:[#allocation85_spill]] %s2776_s22  ;;  %s3340_s15 = scalar_lea.vmem [#allocation2], %s2648_s17 }
  0xce   :  { %2152 = vmatpush3.bf16.msra.mxu0 %v2117_v52  ;;  %3515 = sst [smem:[#allocation82_spill]] %s2764_s10  ;;  %s3333_s10 = scalar_lea.vmem [#allocation2], %s2644_s14 }
  0xcf   :  { %3517 = sst [smem:[#allocation84_spill]] %s2768_s28  ;;  %s3548_s17 = sld [smem:[#allocation73_spill]] }
 0x184   :  { %v2730_v53 = vpop.f32.mrb[0].mxu0 }
 0x185   :  { %v230_v54 = vmax.f32 %v2730_v53, 0.0  ;;  %v2735_v55 = vpop.f32.mrb[1].mxu0 }
 0x186   :  { %v229_v56 = vmax.f32 %v2735_v55, 0.0 }
 0x187   :  { %234 = vst [vmem:[#allocation2 + $0x8] sm:$0xff] %v230_v54 }
 0x188   :  { %233 = vst [vmem:[#allocation2] sm:$0xff] %v229_v56  ;;  %v2744_v57 = vpop.f32.mrb[2].mxu0 }
 0x189   :  { %v232_v58 = vmax.f32 %v2744_v57, 0.0  ;;  %v2749_v59 = vpop.f32.mrb[3].mxu0 }
 0x18a   :  { %v231_v60 = vmax.f32 %v2749_v59, 0.0 }
 0x18b   :  { %236 = vst [vmem:[#allocation2 + $0x18] sm:$0xff] %v232_v58 }
 0x18c   :  { %235 = vst [vmem:[#allocation2 + $0x10] sm:$0xff] %v231_v60 }
 0x193   :  { %v245_v61 = vld [vmem:[%s3330_s30] sm:$0x1]  ;;  %s2784_s30 = sld [smem:[#allocation8 + $0xa]] }
 0x194   :  { %v249_v62 = vld [vmem:[%s3332_s0] sm:$0x1]  ;;  %s3337_s0 = scalar_lea.vmem [#allocation2], %s2652_s19  ;;  %s3343_s19 = scalar_lea.vmem [#allocation2], %s2660_s25 }
 0x195   :  { %v250_v63 = vadd.f32 %v249_v62, %v245_v61  ;;  %v262_v0 = vld [vmem:[%s3333_s10] sm:$0x1]  ;;  %s2792_s10 = sld [smem:[#allocation8 + $0xb]]  ;;  %s3402_s25 = scalar_lea.vmem [#allocation2], %s2714_s23 }
 0x196   :  { %v266_v1 = vld [vmem:[%s3334_s1] sm:$0x1]  ;;  %s3339_s1 = scalar_lea.vmem [#allocation2], %s2642_s12  ;;  %s3550_s23 = sld [smem:[#allocation66_spill]] }
 0x197   :  { %v253_v2 = vld [vmem:[%s3336_s3] sm:$0x1]  ;;  %v267_v3 = vadd.f32 %v266_v1, %v262_v0  ;;  %s3342_s3 = scalar_lea.vmem [#allocation2], %s2654_s20 }
 0x198   :  { %v279_v4 = vld [vmem:[%s3337_s0] sm:$0x1]  ;;  %v254_v5 = vadd.f32 %v253_v2, %v250_v63  ;;  %s3341_s0 = scalar_lea.vmem [#allocation2], %s2650_s18 }
 0x199   :  { %3519 = sst [smem:[#allocation86_spill]] %s2784_s30  ;;  %v257_v6 = vld [vmem:[%s3339_s1] sm:$0x1]  ;;  %s3344_s1 = scalar_lea.vmem [#allocation2], %s2662_s6 }
 0x19a   :  { %v270_v7 = vld [vmem:[%s3340_s15] sm:$0x1]  ;;  %v258_v14 = vadd.f32 %v257_v6, %v254_v5  ;;  %s3346_s15 = scalar_lea.vmem [#allocation2], %s2656_s21  ;;  %s3353_s21 = scalar_lea.vmem [#allocation2], %s2664_s5 }
 0x19b   :  { %3520 = sst [smem:[#allocation87_spill]] %s2792_s10  ;;  %v283_v8 = vld [vmem:[%s3342_s3] sm:$0x1]  ;;  %v271_v9 = vadd.f32 %v270_v7, %v267_v3  ;;  %s3349_s3 = scalar_lea.vmem [#allocation2], %s2670_s26 }
 0x19c   :  { %v274_v10 = vld [vmem:[%s3341_s0] sm:$0x1]  ;;  %v284_v11 = vadd.f32 %v283_v8, %v279_v4  ;;  %s3348_s0 = scalar_lea.vmem [#allocation2], %s2668_s13  ;;  %s3355_s13 = scalar_lea.vmem [#allocation2], %s2676_s29  ;;  %259 = vst [vmem:[#allocation3] sm:$0x1] %v258_v14 }
 0x19d   :  { %v296_v12 = vld [vmem:[%s3343_s19] sm:$0x1]  ;;  %s3521_s19 = sld [smem:[#allocation45_spill]]  ;;  %v275_v19 = vadd.f32 %v274_v10, %v271_v9  ;;  %s3357_s26 = scalar_lea.vmem [#allocation2], %s2666_s16 }
 0x19e   :  { %v300_v13 = vld [vmem:[%s3344_s1] sm:$0x1]  ;;  %s3352_s1 = scalar_lea.vmem [#allocation2], %s2658_s24  ;;  %s3525_s24 = sld [smem:[#allocation46_spill]] }
 0x19f   :  { %v287_v15 = vld [vmem:[%s3346_s15] sm:$0x1]  ;;  %v301_v16 = vadd.f32 %v300_v13, %v296_v12  ;;  %s3522_s15 = sld [smem:[#allocation43_spill]]  ;;  %s3526_s5 = sld [smem:[#allocation52_spill]]  ;;  %276 = vst [vmem:[#allocation3 + $0x1] sm:$0x1] %v275_v19 }
 0x1a0   :  { %v313_v17 = vld [vmem:[%s3348_s0] sm:$0x1]  ;;  %v288_v20 = vadd.f32 %v287_v15, %v284_v11  ;;  %s3523_s0 = sld [smem:[#allocation48_spill]] }
 0x1a1   :  { %v317_v18 = vld [vmem:[%s3349_s3] sm:$0x1]  ;;  %s3524_s3 = sld [smem:[#allocation49_spill]]  ;;  %s3547_s6 = sld [smem:[#allocation64_spill]] }
 0x1a2   :  { %v291_v21 = vld [vmem:[%s3352_s1] sm:$0x1]  ;;  %v318_v23 = vadd.f32 %v317_v18, %v313_v17  ;;  %s3359_s1 = scalar_lea.vmem [#allocation2], %s2672_s27  ;;  %s3529_s27 = sld [smem:[#allocation56_spill]] }
 0x1a3   :  { %v304_v22 = vld [vmem:[%s3353_s21] sm:$0x1]  ;;  %s3361_s21 = scalar_lea.vmem [#allocation2], %s3521_s19  ;;  %v292_v29 = vadd.f32 %v291_v21, %v288_v20  ;;  %s3530_s19 = sld [smem:[#allocation47_spill]] }
 0x1a4   :  { %v330_v24 = vld [vmem:[%s3355_s13] sm:$0x1]  ;;  %v305_v25 = vadd.f32 %v304_v22, %v301_v16  ;;  %s3527_s13 = sld [smem:[#allocation53_spill]] }
 0x1a5   :  { %v308_v26 = vld [vmem:[%s3357_s26] sm:$0x1]  ;;  %s3364_s29 = scalar_lea.vmem [#allocation2], %s3522_s15  ;;  %s3528_s26 = sld [smem:[#allocation50_spill]]  ;;  %293 = vst [vmem:[#allocation3 + $0x2] sm:$0x1] %v292_v29 }
 0x1a6   :  { %v321_v27 = vld [vmem:[%s3359_s1] sm:$0x1]  ;;  %s3366_s16 = scalar_lea.vmem [#allocation2], %s3523_s0  ;;  %v309_v35 = vadd.f32 %v308_v26, %v305_v25  ;;  %s3370_s15 = scalar_lea.vmem [#allocation2], %s3526_s5 }
 0x1a7   :  { %v334_v28 = vld [vmem:[%s3361_s21] sm:$0x1]  ;;  %v322_v30 = vadd.f32 %v321_v27, %v318_v23  ;;  %s3367_s1 = scalar_lea.vmem [#allocation2], %s3524_s3  ;;  %s3369_s21 = scalar_lea.vmem [#allocation2], %s3525_s24 }
 0x1a8   :  { %v325_v31 = vld [vmem:[%s3364_s29] sm:$0x1]  ;;  %v335_v32 = vadd.f32 %v334_v28, %v330_v24  ;;  %s3531_s29 = sld [smem:[#allocation54_spill]]  ;;  %s3533_s24 = sld [smem:[#allocation51_spill]]  ;;  %310 = vst [vmem:[#allocation3 + $0x3] sm:$0x1] %v309_v35 }
 0x1a9   :  { %v347_v33 = vld [vmem:[%s3366_s16] sm:$0x1]  ;;  %s3532_s16 = sld [smem:[#allocation57_spill]]  ;;  %v326_v41 = vadd.f32 %v325_v31, %v322_v30  ;;  %s3536_s5 = sld [smem:[#allocation58_spill]] }
 0x1aa   :  { %v351_v34 = vld [vmem:[%s3367_s1] sm:$0x1]  ;;  %s3372_s18 = scalar_lea.vmem [#allocation2], %s3527_s13  ;;  %s3378_s13 = scalar_lea.vmem [#allocation2], %s3530_s19 }
 0x1ab   :  { %v338_v37 = vld [vmem:[%s3369_s21] sm:$0x1]  ;;  %v352_v38 = vadd.f32 %v351_v34, %v347_v33  ;;  %s3375_s1 = scalar_lea.vmem [#allocation2], %s3528_s26  ;;  %s3376_s21 = scalar_lea.vmem [#allocation2], %s3529_s27  ;;  %327 = vst [vmem:[#allocation3 + $0x4] sm:$0x1] %v326_v41 }
 0x1ac   :  { %v364_v39 = vld [vmem:[%s3370_s15] sm:$0x1]  ;;  %v339_v42 = vadd.f32 %v338_v37, %v335_v32  ;;  %s2863_s15 = sld [smem:[#allocation8 + $0xc]]  ;;  %s3537_s27 = sld [smem:[#allocation59_spill]] }
 0x1ad   :  { %v368_v40 = vld [vmem:[%s3372_s18] sm:$0x1]  ;;  %s3535_s18 = sld [smem:[#allocation55_spill]]  ;;  %s3546_s26 = sld [smem:[#allocation62_spill]] }
 0x1ae   :  { %v355_v43 = vld [vmem:[%s3375_s1] sm:$0x1]  ;;  %v369_v44 = vadd.f32 %v368_v40, %v364_v39  ;;  %s3381_s3 = scalar_lea.vmem [#allocation2], %s3531_s29  ;;  %s2879_s19 = sld [smem:[#allocation8 + $0xe]] }
 0x1af   :  { %v381_v45 = vld [vmem:[%s3376_s21] sm:$0x1]  ;;  %v356_v47 = vadd.f32 %v355_v43, %v352_v38  ;;  %s3383_s1 = scalar_lea.vmem [#allocation2], %s3532_s16  ;;  %s3382_s21 = scalar_lea.vmem [#allocation2], %s3533_s24 }
 0x1b0   :  { %v342_v46 = vld [vmem:[%s3378_s13] sm:$0x1]  ;;  %s2877_s13 = sld [smem:[#allocation8 + $0xd]]  ;;  %s2889_s24 = sld [smem:[#allocation7 + $0x10]] }
 0x1b1   :  { %v372_v48 = vld [vmem:[%s3381_s3] sm:$0x1]  ;;  %v343_v50 = vadd.f32 %v342_v46, %v339_v42  ;;  %s3389_s3 = scalar_lea.vmem [#allocation2], %s3536_s5  ;;  %s2891_s16 = sld [smem:[#allocation8 + $0x10]] }
 0x1b2   :  { %3534 = sst [smem:[#allocation88_spill]] %s2863_s15  ;;  %v385_v49 = vld [vmem:[%s3383_s1] sm:$0x1]  ;;  %v373_v52 = vadd.f32 %v372_v48, %v369_v44  ;;  %s3541_s1 = sld [smem:[#allocation67_spill]] }
 0x1b3   :  { %v359_v51 = vld [vmem:[%s3382_s21] sm:$0x1]  ;;  %v386_v54 = vadd.f32 %v385_v49, %v381_v45  ;;  %s3387_s29 = scalar_lea.vmem [#allocation2], %s3535_s18  ;;  %s2887_s21 = sld [smem:[#allocation8 + $0xf]]  ;;  %344 = vst [vmem:[#allocation3 + $0x5] sm:$0x1] %v343_v50 }
 0x1b4   :  { %3539 = sst [smem:[#allocation90_spill]] %s2879_s19  ;;  %v360_v56 = vadd.f32 %v359_v51, %v356_v47  ;;  %v376_v58 = vld [vmem:[%s3387_s29] sm:$0x1]  ;;  %s3543_s18 = sld [smem:[#allocation69_spill]] }
 0x1b5   :  { %v389_v60 = vld [vmem:[%s3389_s3] sm:$0x1]  ;;  %v377_v61 = vadd.f32 %v376_v58, %v373_v52  ;;  %s3544_s29 = sld [smem:[#allocation71_spill]]  ;;  %s3396_s5 = scalar_lea.vmem [#allocation2], %s3537_s27 }
 0x1b6   :  { %3538 = sst [smem:[#allocation89_spill]] %s2877_s13  ;;  %v390_v62 = vadd.f32 %v389_v60, %v386_v54  ;;  %361 = vst [vmem:[#allocation3 + $0x6] sm:$0x1] %v360_v56  ;;  %v393_v63 = vld [vmem:[%s3396_s5] sm:$0x1]  ;;  %s3545_s3 = sld [smem:[#allocation60_spill]] }
 0x1b7   :  { %3542 = sst [smem:[#allocation92_spill]] %s2889_s24  ;;  %378 = vst [vmem:[#allocation3 + $0x7] sm:$0x1] %v377_v61  ;;  %s3399_s0 = scalar_lea.vmem [#allocation2], %s2710_s4  ;;  %v409_v2 = vld [vmem:[%s3402_s25] sm:$0x1] }
 0x1b8   :  { %v394_v0 = vadd.f32 %v393_v63, %v390_v62  ;;  %v401_v1 = vld [vmem:[%s3399_s0] sm:$0x1]  ;;  %s3404_s27 = scalar_lea.vmem [#allocation2], %s2718_s9  ;;  %s3549_s5 = sld [smem:[#allocation75_spill]] }
 0x1b9   :  { %3540 = sst [smem:[#allocation91_spill]] %s2887_s21  ;;  %v417_v3 = vld [vmem:[%s3404_s27] sm:$0x1]  ;;  %s3411_s20 = scalar_lea.vmem [#allocation2], %s3541_s1 }
 0x1ba   :  { %395 = vst [vmem:[#allocation3 + $0x8] sm:$0x1] %v394_v0  ;;  %v425_v4 = vld [vmem:[%s3411_s20] sm:$0x1]  ;;  %s3406_s12 = scalar_lea.vmem [#allocation2], %s3543_s18  ;;  %s3551_s25 = sld [smem:[#allocation68_spill]] }
 0x1bb   :  { %v433_v5 = vld [vmem:[%s3406_s12] sm:$0x1]  ;;  %s3407_s0 = scalar_lea.vmem [#allocation2], %s3544_s29  ;;  %s3409_s9 = scalar_lea.vmem [#allocation3], %s3546_s26 }
 0x1bc   :  { %v441_v6 = vld [vmem:[%s3407_s0] sm:$0x1]  ;;  %s3408_s4 = scalar_lea.vmem [#allocation3], %s3545_s3  ;;  %s3552_s27 = sld [smem:[#allocation70_spill]] }
 0x1bd   :  { %s3410_s1 = scalar_lea.vmem [#allocation3], %s3547_s6  ;;  %s3412_s12 = scalar_lea.vmem [#allocation2], %s3548_s17 }
 0x1be   :  { %v449_v10 = vld [vmem:[%s3412_s12] sm:$0x1]  ;;  %s3414_s0 = scalar_lea.vmem [#allocation2], %s3549_s5  ;;  %s3554_s20 = sld [smem:[#allocation74_spill]] }
 0x1bf   :  { %v457_v11 = vld [vmem:[%s3414_s0] sm:$0x1]  ;;  %s3555_s5 = sld [smem:[#allocation76_spill]] }
 0x1c0   :  { %s3418_s12 = scalar_lea.vmem [#allocation3], %s3551_s25 }
 0x1c1   :  { %v399_v7 = vld [vmem:[%s3408_s4] sm:$0x1]  ;;  %s3415_s4 = scalar_lea.vmem [#allocation2], %s2768_s28  ;;  %s3423_s28 = scalar_lea.vmem [#allocation2], %s2784_s30 }
 0x1c2   :  { %v407_v8 = vld [vmem:[%s3409_s9] sm:$0x1]  ;;  %v402_v13 = vsub.f32 %v399_v7, %v401_v1  ;;  %s3553_s9 = sld [smem:[#allocation72_spill]]  ;;  %s3419_s0 = scalar_lea.vmem [#allocation3], %s3552_s27 }
 0x1c3   :  { %v415_v9 = vld [vmem:[%s3410_s1] sm:$0x1]  ;;  %v410_v14 = vsub.f32 %v407_v8, %v409_v2  ;;  %s3417_s1 = scalar_lea.vmem [#allocation3], %s3550_s23  ;;  %s3579_s27 = sld [smem:[#allocation38_spill]] }
 0x1c4   :  { %v465_v12 = vld [vmem:[%s3415_s4] sm:$0x1]  ;;  %v418_v15 = vsub.f32 %v415_v9, %v417_v3  ;;  %s3421_s4 = scalar_lea.vmem [#allocation2], %s2776_s22  ;;  %s3426_s22 = scalar_lea.vmem [#allocation3], %s3554_s20  ;;  %403 = vst [vmem:[#allocation4] sm:$0x1] %v402_v13 }
 0x1c5   :  { %v423_v16 = vld [vmem:[%s3417_s1] sm:$0x1]  ;;  %s3424_s1 = scalar_lea.vmem [#allocation2], %s2792_s10  ;;  %s3427_s30 = scalar_lea.vmem [#allocation3], %s3555_s5  ;;  %411 = vst [vmem:[#allocation4 + $0x1] sm:$0x1] %v410_v14 }
 0x1c6   :  { %v431_v17 = vld [vmem:[%s3418_s12] sm:$0x1]  ;;  %v426_v22 = vsub.f32 %v423_v16, %v425_v4  ;;  %419 = vst [vmem:[#allocation4 + $0x2] sm:$0x1] %v418_v15 }
 0x1c7   :  { %v439_v18 = vld [vmem:[%s3419_s0] sm:$0x1]  ;;  %v434_v23 = vsub.f32 %v431_v17, %v433_v5  ;;  %s3556_s0 = sld [smem:[#allocation77_spill]] }
 0x1c8   :  { %v473_v19 = vld [vmem:[%s3421_s4] sm:$0x1]  ;;  %v442_v24 = vsub.f32 %v439_v18, %v441_v6  ;;  %s3425_s12 = scalar_lea.vmem [#allocation3], %s3553_s9  ;;  %s3557_s4 = sld [smem:[#allocation78_spill]]  ;;  %427 = vst [vmem:[#allocation4 + $0x3] sm:$0x1] %v426_v22 }
 0x1c9   :  { %v481_v20 = vld [vmem:[%s3423_s28] sm:$0x1]  ;;  %s3428_s28 = scalar_lea.vmem [#allocation2], %s2863_s15  ;;  %435 = vst [vmem:[#allocation4 + $0x4] sm:$0x1] %v434_v23  ;;  %s3574_s15 = scalar_lea.vmem [#allocation2], %s2640_s11 }
 0x1ca   :  { %v489_v21 = vld [vmem:[%s3424_s1] sm:$0x1]  ;;  %s3430_s1 = scalar_lea.vmem [#allocation2], %s2877_s13  ;;  %443 = vst [vmem:[#allocation4 + $0x5] sm:$0x1] %v442_v24  ;;  %s3578_s9 = sld [smem:[#allocation35_spill]] }
 0x1cb   :  { %v447_v25 = vld [vmem:[%s3425_s12] sm:$0x1]  ;;  %s3431_s12 = scalar_lea.vmem [#allocation2], %s2879_s19  ;;  %s3560_s19 = sld [smem:[#allocation83_spill]] }
 0x1cc   :  { %v455_v26 = vld [vmem:[%s3426_s22] sm:$0x1]  ;;  %s3558_s22 = sld [smem:[#allocation80_spill]]  ;;  %v450_v31 = vsub.f32 %v447_v25, %v449_v10  ;;  %s3585_s11 = sld [smem:[#allocation39_spill]] }
 0x1cd   :  { %v463_v27 = vld [vmem:[%s3427_s30] sm:$0x1]  ;;  %v458_v32 = vsub.f32 %v455_v26, %v457_v11  ;;  %s3434_s30 = scalar_lea.vmem [#allocation3], %s3556_s0  ;;  %s3573_s0 = sld [smem:[#allocation34_spill]] }
 0x1ce   :  { %v497_v28 = vld [vmem:[%s3428_s28] sm:$0x1]  ;;  %s3559_s28 = sld [smem:[#allocation82_spill]]  ;;  %s3435_s5 = scalar_lea.vmem [#allocation3], %s3557_s4  ;;  %v466_v37 = vsub.f32 %v463_v27, %v465_v12  ;;  %451 = vst [vmem:[#allocation4 + $0x6] sm:$0x1] %v450_v31 }
 0x1cf   :  { %v505_v29 = vld [vmem:[%s3430_s1] sm:$0x1]  ;;  %s3441_s1 = scalar_lea.vmem [#allocation3], %s2758_s2  ;;  %459 = vst [vmem:[#allocation4 + $0x7] sm:$0x1] %v458_v32  ;;  %s3571_s2 = sld [smem:[#allocation31_spill]] }
 0x1d0   :  { %v513_v30 = vld [vmem:[%s3431_s12] sm:$0x1]  ;;  %s3436_s12 = scalar_lea.vmem [#allocation2], %s2887_s21  ;;  %467 = vst [vmem:[#allocation4 + $0x8] sm:$0x1] %v466_v37  ;;  %s3566_s21 = sld [smem:[#allocation30_spill]] }
 0x1d1   :  { %v471_v33 = vld [vmem:[%s3434_s30] sm:$0x1]  ;;  %s3438_s30 = scalar_lea.vmem [#allocation3], %s2762_s7  ;;  %s3569_s7 = scalar_lea.vmem [#allocation2], %s2636_s8 }
 0x1d2   :  { %v479_v34 = vld [vmem:[%s3435_s5] sm:$0x1]  ;;  %s3437_s13 = scalar_lea.vmem [#allocation3], %s3558_s22  ;;  %v474_v42 = vsub.f32 %v471_v33, %v473_v19  ;;  %s3572_s4 = scalar_lea.vmem [#allocation2], %s2644_s14 }
 0x1d3   :  { %v487_v35 = vld [vmem:[%s3441_s1] sm:$0x1]  ;;  %v482_v43 = vsub.f32 %v479_v34, %v481_v20  ;;  %s3563_s1 = sld [smem:[#allocation28_spill]] }
 0x1d4   :  { %v521_v38 = vld [vmem:[%s3436_s12] sm:$0x1]  ;;  %s3440_s5 = scalar_lea.vmem [#allocation3], %s3559_s28  ;;  %v490_v44 = vsub.f32 %v487_v35, %v489_v21  ;;  %s3439_s12 = scalar_lea.vmem [#allocation3], %s3560_s19  ;;  %475 = vst [vmem:[#allocation4 + $0x9] sm:$0x1] %v474_v42 }
 0x1d5   :  { %v495_v39 = vld [vmem:[%s3437_s13] sm:$0x1]  ;;  %s3442_s13 = scalar_lea.vmem [#allocation3], %s2889_s24  ;;  %483 = vst [vmem:[#allocation4 + $0xa] sm:$0x1] %v482_v43  ;;  %s3567_s19 = sld [smem:[#allocation36_spill]] }
 0x1d6   :  { %v503_v40 = vld [vmem:[%s3438_s30] sm:$0x1]  ;;  %v498_v46 = vsub.f32 %v495_v39, %v497_v28  ;;  %s3443_s30 = scalar_lea.vmem [#allocation2], %s2891_s16  ;;  %491 = vst [vmem:[#allocation4 + $0xb] sm:$0x1] %v490_v44  ;;  %v532_v54 = vld [vmem:[#allocation4] sm:$0xff] }
 0x1d7   :  { %v511_v41 = vld [vmem:[%s3440_s5] sm:$0x1]  ;;  %v506_v47 = vsub.f32 %v503_v40, %v505_v29  ;;  %1943 = vmatprep.mubr.f32.mxu1 %v532_v54  ;;  %s3562_s5 = sld [smem:[#allocation29_spill]]  ;;  %s3576_s24 = sld [smem:[#allocation40_spill]] }
 0x1d8   :  { %v519_v45 = vld [vmem:[%s3439_s12] sm:$0x1]  ;;  %v514_v48 = vsub.f32 %v511_v41, %v513_v30  ;;  %499 = vst [vmem:[#allocation4 + $0xc] sm:$0x1] %v498_v46  ;;  %s3561_s12 = sld [smem:[#allocation27_spill]]  ;;  %s3568_s28 = sld [smem:[#allocation37_spill]] }
 0x1d9   :  { %v527_v49 = vld [vmem:[%s3442_s13] sm:$0x1]  ;;  %v522_v51 = vsub.f32 %v519_v45, %v521_v38  ;;  %507 = vst [vmem:[#allocation4 + $0xd] sm:$0x1] %v506_v47  ;;  %s3564_s13 = sld [smem:[#allocation32_spill]]  ;;  %s3577_s20 = scalar_lea.vmem [#allocation2], %s3563_s1 }
 0x1da   :  { %v529_v50 = vld [vmem:[%s3443_s30] sm:$0x1]  ;;  %650 = vst [vmem:[#allocation3 + $0x8] sm:$0xff] %v2444_v36  ;;  %649 = vst [vmem:[#allocation3] sm:$0xff] %v2444_v36  ;;  %s3565_s30 = sld [smem:[#allocation33_spill]]  ;;  %s3590_s1 = scalar_lea.vmem [#allocation2], %s3573_s0 }
 0x1db   :  { %v530_v52 = vsub.f32 %v527_v49, %v529_v50  ;;  %515 = vst [vmem:[#allocation4 + $0xe] sm:$0x1] %v514_v48  ;;  %523 = vst [vmem:[#allocation4 + $0xf] sm:$0x1] %v522_v51  ;;  %s3584_s14 = scalar_lea.vmem [#allocation2], %s3567_s19  ;;  %s3595_s19 = scalar_lea.vmem [#allocation2], %s3578_s9 }
 0x1dc   :  { %s3600_s0 = scalar_lea.vmem [#allocation2], %s3585_s11  ;;  %s3605_s9 = sld [smem:[#allocation53_spill]] }
 0x1dd   :  { %531 = vst [vmem:[#allocation4 + $0x10] sm:$0x1] %v530_v52  ;;  %s3575_s10 = scalar_lea.vmem [#allocation2], %s3562_s5  ;;  %s3588_s5 = sld [smem:[#allocation45_spill]] }
 0x1de   :  { %s3570_s22 = scalar_lea.vmem [#allocation2], %s3561_s12  ;;  %s3583_s12 = scalar_lea.vmem [#allocation2], %s3566_s21 }
 0x1df   :  { %s3580_s8 = scalar_lea.vmem [#allocation2], %s3564_s13  ;;  %s3591_s13 = sld [smem:[#allocation42_spill]] }
 0x1e0   :  { %s3594_s21 = sld [smem:[#allocation49_spill]]  ;;  %s3610_s11 = sld [smem:[#allocation56_spill]] }
 0x1e2   :  { %v533_v56 = vld [vmem:[#allocation4 + $0x8] sm:$0xff] }
 0x1e3   :  { %1944 = vmatmul.mubr.f32.vlgmr.msra.gmra.mrb[0].mxu1 %v533_v56 }
 0x1e4   :  { %v534_v58 = vld [vmem:[#allocation4 + $0x10] sm:$0xff] }
 0x1e5   :  { %1946 = vmatprep.mubr.f32.mxu1 %v534_v58 }
 0x1e7   :  { %1947 = vmatmul.mubr.f32.gmra.mrb[2].mxu1 %v2444_v36 }
 0x2b6   :  { %v1945_v60 = vpop.f32.mrb[0].mxu1 }
 0x2b7   :  { %v638_v61 = vadd.f32 %v1945_v60, %v2730_v53  ;;  %v618_v62 = vpop.f32.mrb[1].mxu1 }
 0x2b8   :  { %v637_v63 = vadd.f32 %v618_v62, %v2735_v55 }
 0x2b9   :  { %v642_v0 = vmax.f32 %v638_v61, 0.0 }
 0x2ba   :  { %v641_v1 = vmax.f32 %v637_v63, 0.0  ;;  %v1948_v2 = vpop.f32.mrb[2].mxu1 }
 0x2bb   :  { %646 = vst [vmem:[#allocation2 + $0x8] sm:$0xff] %v642_v0  ;;  %v640_v3 = vadd.f32 %v1948_v2, %v2744_v57  ;;  %v628_v4 = vpop.f32.mrb[3].mxu1 }
 0x2bc   :  { %645 = vst [vmem:[#allocation2] sm:$0xff] %v641_v1  ;;  %v639_v5 = vadd.f32 %v628_v4, %v2749_v59 }
 0x2bd   :  { %v644_v6 = vmax.f32 %v640_v3, 0.0 }
 0x2be   :  { %v643_v7 = vmax.f32 %v639_v5, 0.0 }
 0x2bf   :  { %648 = vst [vmem:[#allocation2 + $0x18] sm:$0xff] %v644_v6 }
 0x2c0   :  { %647 = vst [vmem:[#allocation2 + $0x10] sm:$0xff] %v643_v7 }
 0x2c7   :  { %v653_v8 = vld [vmem:[%s3569_s7] sm:$0x1]  ;;  %s3581_s7 = sld [smem:[#allocation41_spill]] }
 0x2c8   :  { %v657_v9 = vld [vmem:[%s3570_s22] sm:$0x1]  ;;  %s3582_s22 = scalar_lea.vmem [#allocation2], %s3565_s30  ;;  %s3592_s30 = scalar_lea.vmem [#allocation2], %s3576_s24 }
 0x2c9   :  { %v658_v10 = vadd.f32 %v657_v9, %v653_v8  ;;  %v670_v11 = vld [vmem:[%s3572_s4] sm:$0x1]  ;;  %s3593_s4 = sld [smem:[#allocation48_spill]] }
 0x2ca   :  { %v661_v12 = vld [vmem:[%s3574_s15] sm:$0x1]  ;;  %s3586_s15 = scalar_lea.vmem [#allocation2], %s3568_s28 }
 0x2cb   :  { %v674_v13 = vld [vmem:[%s3575_s10] sm:$0x1]  ;;  %v662_v14 = vadd.f32 %v661_v12, %v658_v10  ;;  %s3587_s10 = sld [smem:[#allocation44_spill]] }
 0x2cc   :  { %v665_v15 = vld [vmem:[%s3577_s20] sm:$0x1]  ;;  %v675_v16 = vadd.f32 %v674_v13, %v670_v11  ;;  %s3589_s20 = scalar_lea.vmem [#allocation2], %s3571_s2  ;;  %s3599_s2 = sld [smem:[#allocation52_spill]] }
 0x2cd   :  { %v687_v17 = vld [vmem:[%s3580_s8] sm:$0x1]  ;;  %v666_v23 = vadd.f32 %v665_v15, %v662_v14  ;;  %s3596_s8 = scalar_lea.vmem [#allocation2], %s3579_s27  ;;  %s3597_s28 = scalar_lea.vmem [#allocation2], %s3581_s7 }
 0x2ce   :  { %v691_v18 = vld [vmem:[%s3582_s22] sm:$0x1]  ;;  %s3598_s22 = sld [smem:[#allocation46_spill]]  ;;  %s3606_s27 = scalar_lea.vmem [#allocation2], %s3591_s13 }
 0x2cf   :  { %v678_v19 = vld [vmem:[%s3583_s12] sm:$0x1]  ;;  %v692_v20 = vadd.f32 %v691_v18, %v687_v17  ;;  %667 = vst [vmem:[#allocation3] sm:$0x1] %v666_v23  ;;  %s3601_s12 = sld [smem:[#allocation43_spill]]  ;;  %s3607_s7 = scalar_lea.vmem [#allocation2], %s3593_s4 }
 0x2d0   :  { %v704_v21 = vld [vmem:[%s3584_s14] sm:$0x1]  ;;  %v679_v24 = vadd.f32 %v678_v19, %v675_v16  ;;  %s3603_s14 = scalar_lea.vmem [#allocation2], %s3588_s5  ;;  %s3613_s5 = sld [smem:[#allocation51_spill]] }
 0x2d1   :  { %v708_v22 = vld [vmem:[%s3586_s15] sm:$0x1]  ;;  %s3602_s24 = scalar_lea.vmem [#allocation2], %s3587_s10  ;;  %s3604_s15 = sld [smem:[#allocation50_spill]] }
 0x2d2   :  { %v682_v25 = vld [vmem:[%s3589_s20] sm:$0x1]  ;;  %v709_v27 = vadd.f32 %v708_v22, %v704_v21  ;;  %s3608_s20 = sld [smem:[#allocation47_spill]] }
 0x2d3   :  { %v695_v26 = vld [vmem:[%s3590_s1] sm:$0x1]  ;;  %v683_v33 = vadd.f32 %v682_v25, %v679_v24  ;;  %s3609_s1 = scalar_lea.vmem [#allocation2], %s3594_s21  ;;  %s3618_s21 = scalar_lea.vmem [#allocation2], %s3605_s9 }
 0x2d4   :  { %v721_v28 = vld [vmem:[%s3592_s30] sm:$0x1]  ;;  %v696_v29 = vadd.f32 %v695_v26, %v692_v20  ;;  %s3611_s30 = sld [smem:[#allocation57_spill]]  ;;  %s3612_s10 = scalar_lea.vmem [#allocation2], %s3598_s22 }
 0x2d5   :  { %v699_v30 = vld [vmem:[%s3595_s19] sm:$0x1]  ;;  %684 = vst [vmem:[#allocation3 + $0x1] sm:$0x1] %v683_v33  ;;  %s3614_s19 = scalar_lea.vmem [#allocation2], %s3599_s2  ;;  %s3616_s13 = scalar_lea.vmem [#allocation2], %s3601_s12 }
 0x2d6   :  { %v712_v31 = vld [vmem:[%s3596_s8] sm:$0x1]  ;;  %v700_v40 = vadd.f32 %v699_v30, %v696_v29  ;;  %s3615_s8 = sld [smem:[#allocation54_spill]]  ;;  %s3622_s22 = scalar_lea.vmem [#allocation2], %s3610_s11 }
 0x2d7   :  { %v725_v32 = vld [vmem:[%s3597_s28] sm:$0x1]  ;;  %v713_v34 = vadd.f32 %v712_v31, %v709_v27  ;;  %s3617_s4 = scalar_lea.vmem [#allocation2], %s3604_s15  ;;  %s3619_s28 = sld [smem:[#allocation58_spill]] }
 0x2d8   :  { %v716_v35 = vld [vmem:[%s3600_s0] sm:$0x1]  ;;  %v726_v37 = vadd.f32 %v725_v32, %v721_v28  ;;  %701 = vst [vmem:[#allocation3 + $0x2] sm:$0x1] %v700_v40  ;;  %s3620_s0 = sld [smem:[#allocation55_spill]]  ;;  %s3623_s2 = sld [smem:[#allocation59_spill]] }
 0x2d9   :  { %v738_v38 = vld [vmem:[%s3602_s24] sm:$0x1]  ;;  %v717_v45 = vadd.f32 %v716_v35, %v713_v34  ;;  %s3621_s24 = scalar_lea.vmem [#allocation2], %s3608_s20  ;;  %s3625_s12 = scalar_lea.vmem [#allocation2], %s3613_s5 }
 0x2da   :  { %v742_v39 = vld [vmem:[%s3603_s14] sm:$0x1]  ;;  %s3624_s14 = scalar_lea.vmem [#allocation2], %s3611_s30  ;;  %s3628_s9 = sld [smem:[#allocation63_spill]] }
 0x2db   :  { %v729_v41 = vld [vmem:[%s3606_s27] sm:$0x1]  ;;  %v743_v42 = vadd.f32 %v742_v39, %v738_v38  ;;  %718 = vst [vmem:[#allocation3 + $0x3] sm:$0x1] %v717_v45  ;;  %s3627_s27 = sld [smem:[#allocation61_spill]] }
 0x2dc   :  { %v755_v43 = vld [vmem:[%s3607_s7] sm:$0x1]  ;;  %v730_v46 = vadd.f32 %v729_v41, %v726_v37  ;;  %s3626_s15 = scalar_lea.vmem [#allocation2], %s3615_s8  ;;  %s3629_s7 = sld [smem:[#allocation65_spill]] }
 0x2dd   :  { %v759_v44 = vld [vmem:[%s3609_s1] sm:$0x1]  ;;  %s3630_s1 = sld [smem:[#allocation67_spill]]  ;;  %s3631_s20 = scalar_lea.vmem [#allocation2], %s3619_s28 }
 0x2de   :  { %v746_v47 = vld [vmem:[%s3612_s10] sm:$0x1]  ;;  %v760_v48 = vadd.f32 %v759_v44, %v755_v43  ;;  %s3632_s11 = scalar_lea.vmem [#allocation2], %s3620_s0  ;;  %s3633_s30 = scalar_lea.vmem [#allocation2], %s3623_s2 }
 0x2df   :  { %v772_v49 = vld [vmem:[%s3614_s19] sm:$0x1]  ;;  %v747_v51 = vadd.f32 %v746_v47, %v743_v42  ;;  %s3634_s10 = sld [smem:[#allocation75_spill]]  ;;  %s3641_s28 = scalar_lea.vmem [#allocation2], %s3543_s18 }
 0x2e0   :  { %v733_v50 = vld [vmem:[%s3616_s13] sm:$0x1]  ;;  %s3636_s19 = scalar_lea.vmem [#allocation2], %s3628_s9  ;;  %s3638_s13 = sld [smem:[#allocation70_spill]] }
 0x2e1   :  { %v763_v52 = vld [vmem:[%s3617_s4] sm:$0x1]  ;;  %v734_v56 = vadd.f32 %v733_v50, %v730_v46  ;;  %s3635_s5 = scalar_lea.vmem [#allocation2], %s3627_s27  ;;  %s3642_s0 = sld [smem:[#allocation85_spill]] }
 0x2e2   :  { %v776_v54 = vld [vmem:[%s3618_s21] sm:$0x1]  ;;  %v764_v60 = vadd.f32 %v763_v52, %v760_v48  ;;  %s3637_s8 = scalar_lea.vmem [#allocation2], %s3629_s7  ;;  %s3640_s21 = sld [smem:[#allocation84_spill]] }
 0x2e3   :  { %v750_v58 = vld [vmem:[%s3621_s24] sm:$0x1]  ;;  %v777_v61 = vadd.f32 %v776_v54, %v772_v49  ;;  %735 = vst [vmem:[#allocation3 + $0x4] sm:$0x1] %v734_v56  ;;  %s3639_s4 = scalar_lea.vmem [#allocation2], %s3630_s1  ;;  %s3643_s24 = scalar_lea.vmem [#allocation2], %s3544_s29 }
 0x2e4   :  { %v789_v62 = vld [vmem:[%s3622_s22] sm:$0x1]  ;;  %v751_v0 = vadd.f32 %v750_v58, %v747_v51  ;;  %s3644_s22 = sld [smem:[#allocation86_spill]]  ;;  %s3645_s2 = scalar_lea.vmem [#allocation2], %s2891_s16 }
 0x2e5   :  { %v793_v63 = vld [vmem:[%s3624_s14] sm:$0x1]  ;;  %s3646_s14 = scalar_lea.vmem [#allocation3], %s3545_s3  ;;  %s3649_s27 = sld [smem:[#allocation72_spill]] }
 0x2e6   :  { %v767_v1 = vld [vmem:[%s3625_s12] sm:$0x1]  ;;  %v794_v3 = vadd.f32 %v793_v63, %v789_v62  ;;  %752 = vst [vmem:[#allocation3 + $0x5] sm:$0x1] %v751_v0  ;;  %s3647_s12 = scalar_lea.vmem [#allocation3], %s3546_s26  ;;  %s3650_s9 = scalar_lea.vmem [#allocation2], %s3548_s17 }
 0x2e7   :  { %v780_v2 = vld [vmem:[%s3626_s15] sm:$0x1]  ;;  %v768_v4 = vadd.f32 %v767_v1, %v764_v60  ;;  %s3648_s15 = scalar_lea.vmem [#allocation3], %s3547_s6  ;;  %s3651_s7 = sld [smem:[#allocation74_spill]] }
 0x2e8   :  { %v781_v5 = vadd.f32 %v780_v2, %v777_v61  ;;  %v797_v6 = vld [vmem:[%s3631_s20] sm:$0x1]  ;;  %s3652_s1 = scalar_lea.vmem [#allocation2], %s3634_s10  ;;  %s3653_s20 = sld [smem:[#allocation92_spill]] }
 0x2e9   :  { %v784_v7 = vld [vmem:[%s3632_s11] sm:$0x1]  ;;  %v798_v8 = vadd.f32 %v797_v6, %v794_v3  ;;  %769 = vst [vmem:[#allocation3 + $0x6] sm:$0x1] %v768_v4  ;;  %s3654_s18 = sld [smem:[#allocation87_spill]]  ;;  %s3655_s29 = sld [smem:[#allocation88_spill]] }
 0x2ea   :  { %v785_v9 = vadd.f32 %v784_v7, %v781_v5  ;;  %v801_v10 = vld [vmem:[%s3633_s30] sm:$0x1]  ;;  %s3656_s11 = sld [smem:[#allocation89_spill]]  ;;  %s3657_s16 = scalar_lea.vmem [#allocation3], %s3550_s23  ;;  %v2232_v7 = vld [vmem:[#allocation4 + $0x18] sm:$0xff] }
 0x2eb   :  { %v802_v11 = vadd.f32 %v801_v10, %v798_v8  ;;  %v809_v12 = vld [vmem:[%s3635_s5] sm:$0x1]  ;;  %s3658_s3 = scalar_lea.vmem [#allocation3], %s3551_s25  ;;  %s3659_s26 = scalar_lea.vmem [#allocation3], %s3638_s13 }
 0x2ec   :  { %786 = vst [vmem:[#allocation3 + $0x7] sm:$0x1] %v785_v9  ;;  %v817_v13 = vld [vmem:[%s3636_s19] sm:$0x1]  ;;  %s3660_s6 = scalar_lea.vmem [#allocation2], %s3640_s21  ;;  %s3661_s17 = scalar_lea.vmem [#allocation2], %s3642_s0 }
 0x2ed   :  { %803 = vst [vmem:[#allocation3 + $0x8] sm:$0x1] %v802_v11  ;;  %v825_v14 = vld [vmem:[%s3637_s8] sm:$0x1]  ;;  %s3662_s30 = scalar_lea.vmem [#allocation2], %s3644_s22  ;;  %s3663_s10 = sld [smem:[#allocation76_spill]] }
 0x2ee   :  { %v833_v15 = vld [vmem:[%s3639_s4] sm:$0x1]  ;;  %s3664_s5 = sld [smem:[#allocation77_spill]]  ;;  %s3665_s19 = sld [smem:[#allocation78_spill]]  ;;  %v1233_v9 = vld [vmem:[#allocation18 + $0x8] sm:$0xff]  ;;  %v1234_v11 = vld [vmem:[#allocation18 + $0x10] sm:$0xff] }
 0x2ef   :  { %v841_v16 = vld [vmem:[%s3641_s28] sm:$0x1]  ;;  %s3666_s8 = scalar_lea.vmem [#allocation3], %s3649_s27  ;;  %s3667_s4 = sld [smem:[#allocation90_spill]] }
 0x2f0   :  { %v849_v17 = vld [vmem:[%s3643_s24] sm:$0x1]  ;;  %s3668_s23 = scalar_lea.vmem [#allocation3], %s3651_s7  ;;  %s3669_s25 = scalar_lea.vmem [#allocation3], %s3653_s20 }
 0x2f1   :  { %v937_v18 = vld [vmem:[%s3645_s2] sm:$0x1]  ;;  %s3670_s13 = scalar_lea.vmem [#allocation2], %s3654_s18  ;;  %s3671_s21 = scalar_lea.vmem [#allocation2], %s3655_s29 }
 0x2f2   :  { %v857_v22 = vld [vmem:[%s3650_s9] sm:$0x1]  ;;  %s3672_s28 = scalar_lea.vmem [#allocation2], %s3656_s11  ;;  %s3673_s0 = sld [smem:[#allocation79_spill]] }
 0x2f3   :  { %v865_v23 = vld [vmem:[%s3652_s1] sm:$0x1]  ;;  %s3674_s24 = sld [smem:[#allocation80_spill]]  ;;  %s3675_s22 = sld [smem:[#allocation81_spill]] }
 0x2f4   :  { %v807_v19 = vld [vmem:[%s3646_s14] sm:$0x1]  ;;  %s3676_s2 = scalar_lea.vmem [#allocation3], %s3663_s10  ;;  %s3677_s14 = scalar_lea.vmem [#allocation3], %s3664_s5 }
 0x2f5   :  { %v815_v20 = vld [vmem:[%s3647_s12] sm:$0x1]  ;;  %v810_v24 = vsub.f32 %v807_v19, %v809_v12  ;;  %s3678_s12 = scalar_lea.vmem [#allocation3], %s3665_s19  ;;  %s3680_s27 = sld [smem:[#allocation82_spill]] }
 0x2f6   :  { %v823_v21 = vld [vmem:[%s3648_s15] sm:$0x1]  ;;  %v818_v25 = vsub.f32 %v815_v20, %v817_v13  ;;  %s3679_s15 = scalar_lea.vmem [#allocation2], %s3667_s4  ;;  %s3681_s9 = sld [smem:[#allocation83_spill]]  ;;  %v1241_v20 = vld [vmem:[#allocation18 + $0x48] sm:$0xff] }
 0x2f7   :  { %v826_v26 = vsub.f32 %v823_v21, %v825_v14  ;;  %v831_v27 = vld [vmem:[%s3657_s16] sm:$0x1]  ;;  %811 = vst [vmem:[#allocation4] sm:$0x1] %v810_v24  ;;  %s3682_s7 = sld [smem:[#allocation91_spill]]  ;;  %v1237_v14 = vld [vmem:[#allocation18 + $0x28] sm:$0xff] }
 0x2f8   :  { %v839_v28 = vld [vmem:[%s3658_s3] sm:$0x1]  ;;  %v834_v33 = vsub.f32 %v831_v27, %v833_v15  ;;  %819 = vst [vmem:[#allocation4 + $0x1] sm:$0x1] %v818_v25  ;;  %s3683_s1 = scalar_lea.vmem [#allocation3], %s3673_s0  ;;  %s3150_s3 = sld [smem:[#allocation6]] }
 0x2f9   :  { %v847_v29 = vld [vmem:[%s3659_s26] sm:$0x1]  ;;  %v842_v34 = vsub.f32 %v839_v28, %v841_v16  ;;  %827 = vst [vmem:[#allocation4 + $0x2] sm:$0x1] %v826_v26  ;;  %s3684_s20 = scalar_lea.vmem [#allocation3], %s3674_s24  ;;  %s3685_s18 = scalar_lea.vmem [#allocation3], %s3675_s22 }
 0x2fa   :  { %v873_v30 = vld [vmem:[%s3660_s6] sm:$0x1]  ;;  %v850_v35 = vsub.f32 %v847_v29, %v849_v17  ;;  %835 = vst [vmem:[#allocation4 + $0x3] sm:$0x1] %v834_v33  ;;  %v1238_v16 = vld [vmem:[#allocation18 + $0x30] sm:$0xff]  ;;  %v1239_v17 = vld [vmem:[#allocation18 + $0x38] sm:$0xff] }
 0x2fb   :  { %v881_v31 = vld [vmem:[%s3661_s17] sm:$0x1]  ;;  %843 = vst [vmem:[#allocation4 + $0x4] sm:$0x1] %v842_v34  ;;  %s3686_s29 = scalar_lea.vmem [#allocation3], %s3680_s27  ;;  %v2165_v19 = vpack.c.bf16 %v1239_v17, %v1238_v16  ;;  %v1245_v26 = vld [vmem:[#allocation18 + $0x68] sm:$0xff] }
 0x2fc   :  { %v889_v32 = vld [vmem:[%s3662_s30] sm:$0x1]  ;;  %851 = vst [vmem:[#allocation4 + $0x5] sm:$0x1] %v850_v35  ;;  %s3687_s11 = scalar_lea.vmem [#allocation3], %s3681_s9  ;;  %v1246_v28 = vld [vmem:[#allocation18 + $0x70] sm:$0xff] }
 0x2fd   :  { %v855_v37 = vld [vmem:[%s3666_s8] sm:$0x1]  ;;  %s3688_s16 = scalar_lea.vmem [#allocation2], %s3682_s7  ;;  %v1247_v29 = vld [vmem:[#allocation18 + $0x78] sm:$0xff]  ;;  %s3152_s26 = sld [smem:[#allocation6 + $0x1]] }
 0x2fe   :  { %v863_v38 = vld [vmem:[%s3668_s23] sm:$0x1]  ;;  %v858_v43 = vsub.f32 %v855_v37, %v857_v22  ;;  %v1242_v22 = vld [vmem:[#allocation18 + $0x50] sm:$0xff]  ;;  %s3154_s6 = sld [smem:[#allocation6 + $0x2]]  ;;  %s3156_s17 = sld [smem:[#allocation6 + $0x3]] }
 0x2ff   :  { %v935_v39 = vld [vmem:[%s3669_s25] sm:$0x1]  ;;  %v866_v44 = vsub.f32 %v863_v38, %v865_v23  ;;  %v1243_v23 = vld [vmem:[#allocation18 + $0x58] sm:$0xff]  ;;  %s3158_s30 = sld [smem:[#allocation6 + $0x4]]  ;;  %s3160_s10 = sld [smem:[#allocation6 + $0x5]] }
 0x300   :  { %v897_v40 = vld [vmem:[%s3670_s13] sm:$0x1]  ;;  %v938_v45 = vsub.f32 %v935_v39, %v937_v18  ;;  %859 = vst [vmem:[#allocation4 + $0x6] sm:$0x1] %v858_v43  ;;  %v2173_v24 = vpack.c.bf16 %v1243_v23, %v1242_v22  ;;  %s3162_s5 = sld [smem:[#allocation6 + $0x6]]  ;;  %s3164_s19 = sld [smem:[#allocation6 + $0x7]] }
 0x301   :  { %v905_v41 = vld [vmem:[%s3671_s21] sm:$0x1]  ;;  %867 = vst [vmem:[#allocation4 + $0x7] sm:$0x1] %v866_v44  ;;  %s3166_s8 = sld [smem:[#allocation6 + $0x8]]  ;;  %s3168_s4 = sld [smem:[#allocation6 + $0x9]] }
 0x302   :  { %v913_v42 = vld [vmem:[%s3672_s28] sm:$0x1]  ;;  %939 = vst [vmem:[#allocation4 + $0x10] sm:$0x1] %v938_v45  ;;  %s3170_s23 = sld [smem:[#allocation6 + $0xa]]  ;;  %s3172_s25 = sld [smem:[#allocation6 + $0xb]] }
 0x303   :  { %v871_v46 = vld [vmem:[%s3676_s2] sm:$0x1]  ;;  %s3174_s13 = sld [smem:[#allocation6 + $0xc]]  ;;  %s3176_s21 = sld [smem:[#allocation6 + $0xd]] }
 0x304   :  { %v879_v47 = vld [vmem:[%s3677_s14] sm:$0x1]  ;;  %v874_v50 = vsub.f32 %v871_v46, %v873_v30  ;;  %v2181_v30 = vpack.c.bf16 %v1247_v29, %v1246_v28  ;;  %s3178_s28 = sld [smem:[#allocation6 + $0xe]]  ;;  %s3180_s0 = sld [smem:[#allocation6 + $0xf]] }
 0x305   :  { %v887_v48 = vld [vmem:[%s3678_s12] sm:$0x1]  ;;  %v882_v51 = vsub.f32 %v879_v47, %v881_v31  ;;  %s3182_s24 = sld [smem:[#allocation6 + $0x10]]  ;;  %s3184_s22 = sld [smem:[#allocation6 + $0x11]] }
 0x306   :  { %v921_v49 = vld [vmem:[%s3679_s15] sm:$0x1]  ;;  %v890_v52 = vsub.f32 %v887_v48, %v889_v32  ;;  %875 = vst [vmem:[#allocation4 + $0x8] sm:$0x1] %v874_v50  ;;  %v1215_v32 = vld [vmem:[#allocation17 + $0x8] sm:$0xff]  ;;  %s3186_s2 = sld [smem:[#allocation6 + $0x12]] }
 0x307   :  { %v895_v54 = vld [vmem:[%s3683_s1] sm:$0x1]  ;;  %883 = vst [vmem:[#allocation4 + $0x9] sm:$0x1] %v882_v51  ;;  %s3188_s14 = sld [smem:[#allocation6 + $0x13]]  ;;  %s3192_s12 = sld [smem:[#allocation6 + $0x14]] }
 0x308   :  { %v903_v56 = vld [vmem:[%s3684_s20] sm:$0x1]  ;;  %v898_v60 = vsub.f32 %v895_v54, %v897_v40  ;;  %891 = vst [vmem:[#allocation4 + $0xa] sm:$0x1] %v890_v52  ;;  %v940_v4 = vld [vmem:[#allocation4] sm:$0xff]  ;;  %s3194_s15 = sld [smem:[#allocation6 + $0x15]] }
 0x309   :  { %v911_v58 = vld [vmem:[%s3685_s18] sm:$0x1]  ;;  %v906_v61 = vsub.f32 %v903_v56, %v905_v41  ;;  %1981 = vmatprep.mubr.f32.mxu0 %v940_v4  ;;  %s3196_s27 = sld [smem:[#allocation6 + $0x16]]  ;;  %s3198_s9 = sld [smem:[#allocation6 + $0x17]] }
 0x30a   :  { %v914_v62 = vsub.f32 %v911_v58, %v913_v42  ;;  %v919_v63 = vld [vmem:[%s3686_s29] sm:$0x1]  ;;  %899 = vst [vmem:[#allocation4 + $0xb] sm:$0x1] %v898_v60  ;;  %s3202_s7 = sld [smem:[#allocation6 + $0x18]]  ;;  %s3204_s1 = sld [smem:[#allocation6 + $0x19]] }
 0x30b   :  { %v927_v0 = vld [vmem:[%s3687_s11] sm:$0x1]  ;;  %v922_v2 = vsub.f32 %v919_v63, %v921_v49  ;;  %907 = vst [vmem:[#allocation4 + $0xc] sm:$0x1] %v906_v61  ;;  %s3206_s20 = sld [smem:[#allocation6 + $0x1a]]  ;;  %s3208_s18 = sld [smem:[#allocation6 + $0x1b]] }
 0x30c   :  { %v929_v1 = vld [vmem:[%s3688_s16] sm:$0x1]  ;;  %1057 = vst [vmem:[#allocation3] sm:$0xff] %v2444_v36  ;;  %1058 = vst [vmem:[#allocation3 + $0x8] sm:$0xff] %v2444_v36  ;;  %v1235_v36 = vld [vmem:[#allocation18 + $0x18] sm:$0xff]  ;;  %s3210_s29 = sld [smem:[#allocation6 + $0x1c]] }
 0x30d   :  { %v930_v3 = vsub.f32 %v927_v0, %v929_v1  ;;  %915 = vst [vmem:[#allocation4 + $0xd] sm:$0x1] %v914_v62  ;;  %923 = vst [vmem:[#allocation4 + $0xe] sm:$0x1] %v922_v2  ;;  %v942_v6 = vld [vmem:[#allocation4 + $0x10] sm:$0xff]  ;;  %v2157_v12 = vpack.c.bf16 %v1235_v36, %v1234_v11  ;;  %s3212_s11 = sld [smem:[#allocation6 + $0x1d]] }
 0x30e   :  { %v1232_v8 = vld [vmem:[#allocation18] sm:$0xff]  ;;  %s3214_s16 = sld [smem:[#allocation6 + $0x1e]] }
 0x30f   :  { %931 = vst [vmem:[#allocation4 + $0xf] sm:$0x1] %v930_v3  ;;  %v2153_v10 = vpack.c.bf16 %v1233_v9, %v1232_v8  ;;  %v1236_v13 = vld [vmem:[#allocation18 + $0x20] sm:$0xff]  ;;  %3689 = sst [smem:[#allocation69_spill]] %s3196_s27  ;;  %s3218_s27 = sld [smem:[#allocation6 + $0x21]] }
 0x310   :  { %v2161_v15 = vpack.c.bf16 %v1237_v14, %v1236_v13  ;;  %v1240_v18 = vld [vmem:[#allocation18 + $0x40] sm:$0xff]  ;;  %3690 = sst [smem:[#allocation71_spill]] %s3198_s9  ;;  %s3216_s9 = sld [smem:[#allocation6 + $0x20]] }
 0x311   :  { %2154 = vmatprep.subr.bf16.mxu1 %v2153_v10  ;;  %v2169_v21 = vpack.c.bf16 %v1241_v20, %v1240_v18  ;;  %v1244_v25 = vld [vmem:[#allocation18 + $0x60] sm:$0xff]  ;;  %3691 = sst [smem:[#allocation60_spill]] %s3202_s7 }
 0x312   :  { %2156 = vmatpush3.bf16.msra.mxu1 %v2153_v10  ;;  %v2177_v27 = vpack.c.bf16 %v1245_v26, %v1244_v25  ;;  %v1214_v31 = vld [vmem:[#allocation17] sm:$0xff]  ;;  %3692 = sst [smem:[#allocation62_spill]] %s3204_s1  ;;  %s3220_s1 = sld [smem:[#allocation6 + $0x1f]] }
 0x313   :  { %2158 = vmatprep.subr.bf16.mxu1 %v2157_v12  ;;  %v3147_v33 = vpack.c.bf16 %v1215_v32, %v1214_v31  ;;  %3693 = sst [smem:[#allocation64_spill]] %s3206_s20  ;;  %s3222_s20 = sld [smem:[#allocation6 + $0x22]] }
 0x314   :  { %3694 = sst [smem:[#allocation73_spill]] %s3208_s18  ;;  %s3224_s7 = sld [smem:[#allocation6 + $0x23]] }
 0x315   :  { %3695 = sst [smem:[#allocation66_spill]] %s3210_s29  ;;  %s1060_s18 = scalar_lea.vmem [#allocation2], %s3150_s3 }
 0x316   :  { %v941_v5 = vld [vmem:[#allocation4 + $0x8] sm:$0xff]  ;;  %2160 = vmatpush3.bf16.msra.mxu1 %v2157_v12  ;;  %3696 = sst [smem:[#allocation68_spill]] %s3214_s16  ;;  %s1064_s29 = scalar_lea.vmem [#allocation2], %s3152_s26 }
 0x317   :  { %1982 = vmatmul.mubr.f32.vlgmr.msra.gmra.mrb[4].mxu0 %v941_v5  ;;  %2162 = vmatprep.subr.bf16.mxu1 %v2161_v15  ;;  %3697 = sst [smem:[#allocation27_spill]] %s3216_s9  ;;  %s1077_s16 = scalar_lea.vmem [#allocation2], %s3158_s30 }
 0x318   :  { %1984 = vmatprep.mubr.f32.mxu0 %v942_v6  ;;  %3698 = sst [smem:[#allocation29_spill]] %s3218_s27  ;;  %s1081_s9 = scalar_lea.vmem [#allocation2], %s3160_s10 }
 0x319   :  { %3699 = sst [smem:[#allocation28_spill]] %s3222_s20  ;;  %s1068_s27 = scalar_lea.vmem [#allocation2], %s3154_s6 }
 0x31a   :  { %2164 = vmatpush3.bf16.msra.mxu1 %v2161_v15  ;;  %s1094_s20 = scalar_lea.vmem [#allocation2], %s3166_s8  ;;  %s1072_s3 = scalar_lea.vmem [#allocation2], %s3156_s17 }
 0x31b   :  { %1985 = vmatmul.mubr.f32.gmra.mrb[6].mxu0 %v2232_v7  ;;  %2166 = vmatprep.subr.bf16.mxu1 %v2165_v19  ;;  %s1085_s26 = scalar_lea.vmem [#allocation2], %s3162_s5  ;;  %s1089_s30 = scalar_lea.vmem [#allocation2], %s3164_s19 }
 0x31c   :  { %s1111_s6 = scalar_lea.vmem [#allocation2], %s3174_s13  ;;  %s1115_s10 = scalar_lea.vmem [#allocation2], %s3176_s21 }
 0x31d   :  { %s1102_s17 = scalar_lea.vmem [#allocation2], %s3170_s23  ;;  %s1128_s5 = scalar_lea.vmem [#allocation2], %s3182_s24 }
 0x31e   :  { %2168 = vmatpush3.bf16.msra.mxu1 %v2165_v19  ;;  %s1132_s8 = scalar_lea.vmem [#allocation2], %s3184_s22  ;;  %s1106_s19 = scalar_lea.vmem [#allocation2], %s3172_s25 }
 0x31f   :  { %2170 = vmatprep.subr.bf16.mxu1 %v2169_v21  ;;  %s1145_s13 = scalar_lea.vmem [#allocation2], %s3192_s12  ;;  %s3700_s21 = sld [smem:[#allocation60_spill]] }
 0x320   :  { %s3701_s23 = sld [smem:[#allocation62_spill]]  ;;  %s1123_s24 = scalar_lea.vmem [#allocation2], %s3180_s0 }
 0x321   :  { %s1136_s22 = scalar_lea.vmem [#allocation2], %s3186_s2  ;;  %s1140_s25 = scalar_lea.vmem [#allocation2], %s3188_s14 }
 0x322   :  { %2172 = vmatpush3.bf16.msra.mxu1 %v2169_v21  ;;  %s3706_s2 = sld [smem:[#allocation71_spill]]  ;;  %s3709_s14 = sld [smem:[#allocation73_spill]] }
 0x323   :  { %2174 = vmatprep.subr.bf16.mxu1 %v2173_v24 }
 0x325   :  { %s1162_s12 = scalar_lea.vmem [#allocation2], %s3700_s21  ;;  %s3711_s21 = sld [smem:[#allocation93_spill]] }
 0x326   :  { %2176 = vmatpush3.bf16.msra.mxu1 %v2173_v24 }
 0x327   :  { %2178 = vmatprep.subr.bf16.mxu1 %v2177_v27 }
 0x32a   :  { %2180 = vmatpush3.bf16.msra.mxu1 %v2177_v27 }
 0x32b   :  { %2182 = vmatprep.subr.bf16.mxu1 %v2181_v30 }
 0x32e   :  { %2184 = vmatpush3.bf16.msra.mxu1 %v2181_v30 }
 0x32f   :  { %2186 = vmatprep.subr.bf16.mxu1 %v3147_v33 }
 0x3ea   :  { %v1983_v34 = vpop.f32.mrb[4].mxu0 }
 0x3eb   :  { %v1046_v35 = vadd.f32 %v1983_v34, %v2730_v53  ;;  %v1026_v37 = vpop.f32.mrb[5].mxu0 }
 0x3ec   :  { %v1045_v38 = vadd.f32 %v1026_v37, %v2735_v55 }
 0x3ed   :  { %v1050_v39 = vmax.f32 %v1046_v35, 0.0 }
 0x3ee   :  { %v1049_v40 = vmax.f32 %v1045_v38, 0.0  ;;  %v1986_v41 = vpop.f32.mrb[6].mxu0 }
 0x3ef   :  { %1054 = vst [vmem:[#allocation2 + $0x8] sm:$0xff] %v1050_v39  ;;  %v1048_v42 = vadd.f32 %v1986_v41, %v2744_v57  ;;  %v1036_v43 = vpop.f32.mrb[7].mxu0 }
 0x3f0   :  { %1053 = vst [vmem:[#allocation2] sm:$0xff] %v1049_v40  ;;  %v1047_v53 = vadd.f32 %v1036_v43, %v2749_v59 }
 0x3f1   :  { %v1052_v55 = vmax.f32 %v1048_v42, 0.0 }
 0x3f2   :  { %v1051_v44 = vmax.f32 %v1047_v53, 0.0 }
 0x3f3   :  { %1056 = vst [vmem:[#allocation2 + $0x18] sm:$0xff] %v1052_v55 }
 0x3f4   :  { %1055 = vst [vmem:[#allocation2 + $0x10] sm:$0xff] %v1051_v44 }
 0x3fb   :  { %v1061_v57 = vld [vmem:[%s1060_s18] sm:$0x1]  ;;  %s1098_s18 = scalar_lea.vmem [#allocation2], %s3168_s4  ;;  %s1119_s4 = scalar_lea.vmem [#allocation2], %s3178_s28 }
 0x3fc   :  { %v1065_v59 = vld [vmem:[%s1064_s29] sm:$0x1]  ;;  %s3704_s28 = sld [smem:[#allocation64_spill]]  ;;  %s1166_s29 = scalar_lea.vmem [#allocation2], %s3701_s23 }
 0x3fd   :  { %v1066_v45 = vadd.f32 %v1065_v59, %v1061_v57  ;;  %v1078_v46 = vld [vmem:[%s1077_s16] sm:$0x1]  ;;  %s3705_s16 = sld [smem:[#allocation27_spill]]  ;;  %v1216_v57 = vld [vmem:[#allocation17 + $0x10] sm:$0xff]  ;;  %v1217_v59 = vld [vmem:[#allocation17 + $0x18] sm:$0xff]  ;;  %s2445_s23 = smov [#allocation20]  }
 0x3fe   :  { %v1082_v47 = vld [vmem:[%s1081_s9] sm:$0x1]  ;;  %s1149_s9 = scalar_lea.vmem [#allocation2], %s3194_s15 }
 0x3ff   :  { %v1069_v48 = vld [vmem:[%s1068_s27] sm:$0x1]  ;;  %v1083_v49 = vadd.f32 %v1082_v47, %v1078_v46  ;;  %s3702_s27 = sld [smem:[#allocation69_spill]]  ;;  %v2189_v46 = vpack.c.bf16 %v1217_v59, %v1216_v57  ;;  %v1212_v47 = vld [vmem:[#allocation12] sm:$0xff] }
 0x400   :  { %v1095_v50 = vld [vmem:[%s1094_s20] sm:$0x1]  ;;  %v1070_v51 = vadd.f32 %v1069_v48, %v1066_v45  ;;  %s3703_s20 = sld [smem:[#allocation66_spill]] }
 0x401   :  { %v1073_v52 = vld [vmem:[%s1072_s3] sm:$0x1]  ;;  %s3707_s3 = sld [smem:[#allocation68_spill]] }
 0x402   :  { %v1086_v54 = vld [vmem:[%s1085_s26] sm:$0x1]  ;;  %v1074_v0 = vadd.f32 %v1073_v52, %v1070_v51  ;;  %s1183_s26 = scalar_lea.vmem [#allocation2], %s3212_s11  ;;  %v1220_v52 = vld [vmem:[#allocation17 + $0x30] sm:$0xff] }
 0x403   :  { %v1099_v56 = vld [vmem:[%s1098_s18] sm:$0x1]  ;;  %v1087_v58 = vadd.f32 %v1086_v54, %v1083_v49  ;;  %s3708_s18 = sld [smem:[#allocation29_spill]]  ;;  %v1221_v54 = vld [vmem:[#allocation17 + $0x38] sm:$0xff] }
 0x404   :  { %v1090_v60 = vld [vmem:[%s1089_s30] sm:$0x1]  ;;  %v1100_v61 = vadd.f32 %v1099_v56, %v1095_v50  ;;  %1075 = vst [vmem:[#allocation3] sm:$0x1] %v1074_v0  ;;  %s1170_s30 = scalar_lea.vmem [#allocation2], %s3704_s28  ;;  %v1219_v50 = vld [vmem:[#allocation17 + $0x28] sm:$0xff]  ;;  %v2197_v56 = vpack.c.bf16 %v1221_v54, %v1220_v52 }
 0x405   :  { %v1112_v62 = vld [vmem:[%s1111_s6] sm:$0x1]  ;;  %v1091_v5 = vadd.f32 %v1090_v60, %v1087_v58  ;;  %s1153_s0 = scalar_lea.vmem [#allocation2], %s3702_s27  ;;  %s1196_s6 = scalar_lea.vmem [#allocation2], %s3705_s16  ;;  %v1223_v60 = vld [vmem:[#allocation17 + $0x48] sm:$0xff] }
 0x406   :  { %v1116_v63 = vld [vmem:[%s1115_s10] sm:$0x1]  ;;  %s1179_s15 = scalar_lea.vmem [#allocation2], %s3703_s20  ;;  %s1157_s10 = scalar_lea.vmem [#allocation2], %s3706_s2 }
 0x407   :  { %v1103_v1 = vld [vmem:[%s1102_s17] sm:$0x1]  ;;  %v1117_v2 = vadd.f32 %v1116_v63, %v1112_v62  ;;  %1092 = vst [vmem:[#allocation3 + $0x1] sm:$0x1] %v1091_v5  ;;  %s3710_s17 = sld [smem:[#allocation28_spill]]  ;;  %v1224_v62 = vld [vmem:[#allocation17 + $0x50] sm:$0xff] }
 0x408   :  { %v1129_v3 = vld [vmem:[%s1128_s5] sm:$0x1]  ;;  %v1104_v6 = vadd.f32 %v1103_v1, %v1100_v61  ;;  %s1187_s5 = scalar_lea.vmem [#allocation2], %s3707_s3  ;;  %v1225_v63 = vld [vmem:[#allocation17 + $0x58] sm:$0xff] }
 0x409   :  { %v1133_v4 = vld [vmem:[%s1132_s8] sm:$0x1]  ;;  %s1200_s11 = scalar_lea.vmem [#allocation2], %s3708_s18  ;;  %s1174_s8 = scalar_lea.vmem [#allocation2], %s3709_s14  ;;  %v2205_v0 = vpack.c.bf16 %v1225_v63, %v1224_v62 }
 0x40a   :  { %v1107_v7 = vld [vmem:[%s1106_s19] sm:$0x1]  ;;  %v1134_v9 = vadd.f32 %v1133_v4, %v1129_v3  ;;  %s1191_s19 = scalar_lea.vmem [#allocation2], %s3220_s1  ;;  %v1228_v3 = vld [vmem:[#allocation17 + $0x70] sm:$0xff]  ;;  %v1229_v4 = vld [vmem:[#allocation17 + $0x78] sm:$0xff] }
 0x40b   :  { %v1120_v8 = vld [vmem:[%s1119_s4] sm:$0x1]  ;;  %v1108_v14 = vadd.f32 %v1107_v7, %v1104_v6  ;;  %v2213_v5 = vpack.c.bf16 %v1229_v4, %v1228_v3  ;;  %v1213_v6 = vld [vmem:[#allocation12 + $0x8] sm:$0xff] }
 0x40c   :  { %v1146_v10 = vld [vmem:[%s1145_s13] sm:$0x1]  ;;  %v1121_v11 = vadd.f32 %v1120_v8, %v1117_v2  ;;  %s1208_s13 = scalar_lea.vmem [#allocation2], %s3224_s7 }
 0x40d   :  { %v1124_v36 = vld [vmem:[%s1123_s24] sm:$0x1]  ;;  %1109 = vst [vmem:[#allocation3 + $0x2] sm:$0x1] %v1108_v14  ;;  %s1204_s4 = scalar_lea.vmem [#allocation2], %s3710_s17  ;;  %s1416_s24 = sshll.u32 %s2445_s23, 4  ;;  %s1417_s24 = int_to_ptr.vmem [resolvable:$true] %s1416_s24 }
 0x40e   :  { %v1137_v12 = vld [vmem:[%s1136_s22] sm:$0x1]  ;;  %v1125_v20 = vadd.f32 %v1124_v36, %v1121_v11  ;;  %s2399_s27 = scalar_lea.vmem %s1417_s24, 256  ;;  %p2404_p6 = scmp.lt.s32.totalorder %s1417_s24, %s1417_s24 }
 0x40f   :  { %v1150_v13 = vld [vmem:[%s1149_s9] sm:$0x1]  ;;  %v1138_v15 = vadd.f32 %v1137_v12, %v1134_v9  ;;  %p2400_p5 = scmp.ne.s32.totalorder %s1417_s24, %s2399_s27  ;;  %p2405_p7 = scmp.lt.s32.totalorder %s2399_s27, %s2399_s27 }
 0x410   :  { %v1141_v16 = vld [vmem:[%s1140_s25] sm:$0x1]  ;;  %v1151_v17 = vadd.f32 %v1150_v13, %v1146_v10  ;;  %1126 = vst [vmem:[#allocation3 + $0x3] sm:$0x1] %v1125_v20 }
 0x411   :  { %v1163_v18 = vld [vmem:[%s1162_s12] sm:$0x1]  ;;  %v1142_v25 = vadd.f32 %v1141_v16, %v1138_v15  ;;  %p2406_p8 = por %p2405_p7, %p2404_p6 }
 0x412   :  { %v1167_v19 = vld [vmem:[%s1166_s29] sm:$0x1] }
 0x413   :  { %v1154_v21 = vld [vmem:[%s1153_s0] sm:$0x1]  ;;  %v1168_v22 = vadd.f32 %v1167_v19, %v1163_v18  ;;  %1143 = vst [vmem:[#allocation3 + $0x4] sm:$0x1] %v1142_v25  ;;  %p2407_p9 = pnand %p2406_p8, %p2400_p5 }
 0x414   :  { %v1180_v23 = vld [vmem:[%s1179_s15] sm:$0x1]  ;;  %v1155_v26 = vadd.f32 %v1154_v21, %v1151_v17 }
 0x415   :  { %v1184_v24 = vld [vmem:[%s1183_s26] sm:$0x1] }
 0x416   :  { %v1171_v27 = vld [vmem:[%s1170_s30] sm:$0x1]  ;;  %v1185_v28 = vadd.f32 %v1184_v24, %v1180_v23 }
 0x417   :  { %v1197_v29 = vld [vmem:[%s1196_s6] sm:$0x1]  ;;  %v1172_v31 = vadd.f32 %v1171_v27, %v1168_v22 }
 0x418   :  { %v1158_v30 = vld [vmem:[%s1157_s10] sm:$0x1] }
 0x419   :  { %v1188_v32 = vld [vmem:[%s1187_s5] sm:$0x1]  ;;  %v1159_v35 = vadd.f32 %v1158_v30, %v1155_v26 }
 0x41a   :  { %v1201_v34 = vld [vmem:[%s1200_s11] sm:$0x1]  ;;  %v1189_v38 = vadd.f32 %v1188_v32, %v1185_v28 }
 0x41b   :  { %v1175_v37 = vld [vmem:[%s1174_s8] sm:$0x1]  ;;  %v1202_v39 = vadd.f32 %v1201_v34, %v1197_v29  ;;  %1160 = vst [vmem:[#allocation3 + $0x5] sm:$0x1] %v1159_v35 }
 0x41c   :  { %v1176_v40 = vadd.f32 %v1175_v37, %v1172_v31  ;;  %v1192_v41 = vld [vmem:[%s1191_s19] sm:$0x1] }
 0x41d   :  { %v1205_v42 = vld [vmem:[%s1204_s4] sm:$0x1]  ;;  %v1193_v43 = vadd.f32 %v1192_v41, %v1189_v38 }
 0x41e   :  { %v1206_v53 = vadd.f32 %v1205_v42, %v1202_v39  ;;  %1177 = vst [vmem:[#allocation3 + $0x6] sm:$0x1] %v1176_v40  ;;  %v1209_v55 = vld [vmem:[%s1208_s13] sm:$0x1] }
 0x41f   :  { %1194 = vst [vmem:[#allocation3 + $0x7] sm:$0x1] %v1193_v43  ;;  %v1218_v49 = vld [vmem:[#allocation17 + $0x20] sm:$0xff] }
 0x420   :  { %v1210_v44 = vadd.f32 %v1209_v55, %v1206_v53  ;;  %v2193_v51 = vpack.c.bf16 %v1219_v50, %v1218_v49  ;;  %v1222_v58 = vld [vmem:[#allocation17 + $0x40] sm:$0xff] }
 0x421   :  { %v2201_v61 = vpack.c.bf16 %v1223_v60, %v1222_v58  ;;  %v1226_v1 = vld [vmem:[#allocation17 + $0x60] sm:$0xff] }
 0x422   :  { %1211 = vst [vmem:[#allocation3 + $0x8] sm:$0x1] %v1210_v44  ;;  %v1776_v7 = vld [vmem:[%s3711_s21] ss:$0 sm:$0xff] }
 0x426   :  { %v1230_v45 = vld [vmem:[#allocation3] sm:$0xff] }
 0x427   :  { %2019 = vmatprep.mubr.f32.mxu1 %v1230_v45 }
 0x429   :  { %v1231_v48 = vld [vmem:[#allocation3 + $0x8] sm:$0xff] }
 0x42a   :  { %2020 = vmatmul.mubr.f32.vlgmr.msra.gmra.mrb[4].mxu1 %v1231_v48 }
 0x42b   :  { %2188 = vmatpush3.bf16.msra.mxu1 %v3147_v33  ;;  %2054 = vmatprep.mubr.f32.mxu1 %v1212_v47  ;;  %v1227_v33 = vld [vmem:[#allocation17 + $0x68] sm:$0xff] }
 0x42c   :  { %2190 = vmatprep.subr.bf16.mxu1 %v2189_v46  ;;  %v2209_v2 = vpack.c.bf16 %v1227_v33, %v1226_v1 }
 0x42f   :  { %2192 = vmatpush3.bf16.msra.mxu1 %v2189_v46 }
 0x430   :  { %2194 = vmatprep.subr.bf16.mxu1 %v2193_v51 }
 0x433   :  { %2196 = vmatpush3.bf16.msra.mxu1 %v2193_v51 }
 0x434   :  { %2198 = vmatprep.subr.bf16.mxu1 %v2197_v56 }
 0x437   :  { %2200 = vmatpush3.bf16.msra.mxu1 %v2197_v56 }
 0x438   :  { %2202 = vmatprep.subr.bf16.mxu1 %v2201_v61 }
 0x43b   :  { %2204 = vmatpush3.bf16.msra.mxu1 %v2201_v61 }
 0x43c   :  { %2206 = vmatprep.subr.bf16.mxu1 %v2205_v0 }
 0x43f   :  { %2208 = vmatpush3.bf16.msra.mxu1 %v2205_v0 }
 0x440   :  { %2210 = vmatprep.subr.bf16.mxu1 %v2209_v2 }
 0x443   :  { %2212 = vmatpush3.bf16.msra.mxu1 %v2209_v2 }
 0x444   :  { %2214 = vmatprep.subr.bf16.mxu1 %v2213_v5 }
 0x447   :  { %2216 = vmatpush3.bf16.msra.mxu1 %v2213_v5 }
 0x44a   :  { %2055 = vmatmul.mubr.f32.vlgmr.msra.gmra.mrb[4].mxu1 %v1213_v6 }
 0x51d   :  { %v2056_v8 = vpop.f32.mrb[4].mxu1 }
 0x51e   :  { %v1406_v9 = vadd.f32 %v2056_v8, %v1776_v7  ;;  %v1389_v10 = vpop.f32.mrb[5].mxu1 }
 0x51f   :  { %v1405_v11 = vadd.f32 %v1776_v7, %v1389_v10 }
 0x520   :  { %v1408_v36 = vmax.f32 %v1406_v9, 0.0 }
 0x521   :  { %v1407_v12 = vmax.f32 %v1405_v11, 0.0 }
 0x522   :  { %1410 = vst [vmem:[#allocation20 + $0x8] sm:$0xff] %v1408_v36 }
 0x523   :  { %1409 = vst [vmem:[#allocation20] sm:$0xff] %v1407_v12 }
 0x524   :  { %2410 = shalt.err (!%p2407_p9)
}
 0x525   :  { %s3712_s20 = sld [smem:[#allocation94_spill]] }
 0x52b   :  { %s2411_s25 = scalar_lea.hbm %s3712_s20, 256 }
 0x52c   :  { %p2412_p10 = scmp.ne.s32.totalorder %s3712_s20, %s2411_s25  ;;  %p2415_p11 = scmp.lt.u32.totalorder %s2411_s25, %s3712_s20 }
 0x52e   :  { %p2417_p12 = pnand %p2415_p11, %p2412_p10 }
 0x530   :  { %2420 = shalt.err (!%p2417_p12)
}
 0x531   :  { %s3713_s0 = smov 8   ;;  %s3714_s2 = smov 128  }
 0x532   :  { %1422 = dma.vmem_to_hbm [thread:$0]  %s1417_s24, 256, %s3712_s20, [#allocation11], %s3714_s2, %s3714_s2, %s3713_s0  }
 0x533   :  { %2431 = dma.done.wait [#allocation11], 256  }
 0x534   :  { %2432 = vsyncadd [#allocation11], 4294967040 }
 0x535   :  { %1426 = vsyncpa [#allocation10], 1 }
 0x536   :  { %1427 = vsyncpa [#allocation13], 1 }
 0x537   :  { %1428 = vsyncpa [#allocation16], 1 }
 0x538   :  { %1429 = vsyncpa [#allocation19], 1 }
 0x539   :  { %1430 = vsyncpa [#allocation11], 1 }

</bundles_post_ra>
